<compile_context>
chip_gen: v7x
topology: tpu7x:2x2x1
jax: 0.10.0
libtpu: 0.0.40
codegen_flags: <defaults>
</compile_context>

<pallas_src>
import functools

import jax
import jax.numpy as jnp
import numpy as np
from jax import lax
from jax.experimental import pallas as pl
from jax.experimental.pallas import tpu as pltpu


# ----------------------------------------------------------------------------
# Fused Pallas kernel: BiLSTM stack + attention + fc head
# ----------------------------------------------------------------------------
def _fused_forward_kernel(*refs, num_layers, T, H):
    """refs = [emb,
               (w_ih_cat, w_hh_fwd, w_hh_rev, b_cat) * num_layers,
               w1, b1, w2, b2,
               out,
               xw_f_sc, xw_r_sc, seq_f_sc, seq_r_sc]

    emb:      (T, B, Din)      time-major embedded inputs (batch padded)
    w_ih_cat: (Din_l, 8H)      [fwd gates | rev gates] input->gates weight
    w_hh_*:   (H, 4H)          hidden->gates weight per direction
    b_cat:    (1, 8H)          (b_ih + b_hh) for [fwd | rev]
    w1,b1,w2,b2: fc head
    out:      (B, O)
    scratches: xw_*:(T,B,4H) hoisted projections, seq_*:(T,B,H) hidden states
    """
    nlr = 4 * num_layers
    emb_ref = refs[0]
    layer_refs = refs[1:1 + nlr]
    w1_ref, b1_ref, w2_ref, b2_ref = refs[1 + nlr:5 + nlr]
    out_ref = refs[5 + nlr]
    xw_f_sc, xw_r_sc, seq_f_sc, seq_r_sc = refs[6 + nlr:]

    B = emb_ref.shape[1]
    G = 4 * H

    for l in range(num_layers):
        w_ih_ref = layer_refs[4 * l + 0]
        w_hh_f_ref = layer_refs[4 * l + 1]
        w_hh_r_ref = layer_refs[4 * l + 2]
        b_ref = layer_refs[4 * l + 3]

        # --- Hoisted input projection: one big MXU op for all T steps and
        #     both directions, bias folded in (off the serial critical path). ---
        w_ih = w_ih_ref[...]
        if l == 0:
            x_flat = emb_ref[...].reshape(T * B, emb_ref.shape[2])
            xw = jnp.dot(x_flat, w_ih, preferred_element_type=jnp.float32)
        else:
            # Input of layer l is concat(h_fwd, h_rev) of layer l-1.  Instead of
            # concatenating activations, split the weight rows (no lane shuffles).
            xf = seq_f_sc[...].reshape(T * B, H)
            xr = seq_r_sc[...].reshape(T * B, H)
            xw = (jnp.dot(xf, w_ih[0:H, :], preferred_element_type=jnp.float32)
                  + jnp.dot(xr, w_ih[H:2 * H, :], preferred_element_type=jnp.float32))
        xw = (xw + b_ref[...]).reshape(T, B, 2 * G)
        xw_f_sc[...] = xw[:, :, 0:G]
        xw_r_sc[...] = xw[:, :, G:2 * G]

        # Hoist recurrent weights out of the time loop.
        w_hh_f = w_hh_f_ref[...]
        w_hh_r = w_hh_r_ref[...]

        h_f = jnp.zeros((B, H), jnp.float32)
        c_f = jnp.zeros((B, H), jnp.float32)
        h_r = jnp.zeros((B, H), jnp.float32)
        c_r = jnp.zeros((B, H), jnp.float32)

        # Fully unrolled serial recurrence; fwd & rev interleaved so the two
        # independent chains overlap MXU / EUP latency.
        for t in range(T):
            tr = T - 1 - t
            g_f = xw_f_sc[t] + jnp.dot(h_f, w_hh_f,
                                       preferred_element_type=jnp.float32)
            g_r = xw_r_sc[tr] + jnp.dot(h_r, w_hh_r,
                                        preferred_element_type=jnp.float32)

            i_f = jax.nn.sigmoid(g_f[:, 0:H])
            f_f = jax.nn.sigmoid(g_f[:, H:2 * H])
            gg_f = jnp.tanh(g_f[:, 2 * H:3 * H])
            o_f = jax.nn.sigmoid(g_f[:, 3 * H:4 * H])
            c_f = f_f * c_f + i_f * gg_f
            h_f = o_f * jnp.tanh(c_f)

            i_r = jax.nn.sigmoid(g_r[:, 0:H])
            f_r = jax.nn.sigmoid(g_r[:, H:2 * H])
            gg_r = jnp.tanh(g_r[:, 2 * H:3 * H])
            o_r = jax.nn.sigmoid(g_r[:, 3 * H:4 * H])
            c_r = f_r * c_r + i_r * gg_r
            h_r = o_r * jnp.tanh(c_r)

            seq_f_sc[t] = h_f
            seq_r_sc[tr] = h_r

    # --- Attention (softmax over time) + fc1/ReLU + fc2/sigmoid --------------
    # softmax(dim=time) acts independently per (batch, feature), so the fwd and
    # rev feature halves can be reduced separately (no concat needed).
    def _context(o):                       # o: (T, B, H), reduce over time axis 0
        m = jnp.max(o, axis=0, keepdims=True)
        e = jnp.exp(o - m)
        s = jnp.sum(e, axis=0)
        return jnp.sum(e * o, axis=0) / s  # (B, H)

    ctx_f = _context(seq_f_sc[...])
    ctx_r = _context(seq_r_sc[...])

    w1 = w1_ref[...]                       # (2H, H): rows 0:H multiply fwd half
    h1 = (jnp.dot(ctx_f, w1[0:H, :], preferred_element_type=jnp.float32)
          + jnp.dot(ctx_r, w1[H:2 * H, :], preferred_element_type=jnp.float32)
          + b1_ref[...])
    h1 = jnp.maximum(h1, 0.0)
    logits = jnp.dot(h1, w2_ref[...], preferred_element_type=jnp.float32) + b2_ref[...]
    out_ref[...] = jax.nn.sigmoid(logits)


# ----------------------------------------------------------------------------
# Wrapper: glue (embedding gather, batch padding) + single pallas_call
# ----------------------------------------------------------------------------
def forward_pallas(x_tokens, params, *, num_layers):
    emb = params["embedding"][x_tokens]                    # (B, T, Din) gather (glue)
    B, T, Din = emb.shape
    H = params["w_hh_l0"].shape[0]
    O = params["w2"].shape[1]

    x_tbd = jnp.transpose(emb, (1, 0, 2)).astype(jnp.float32)   # (T, B, Din)
    B_pad = max(8, -(-B // 8) * 8)                          # fill f32 sublanes
    if B_pad != B:
        x_tbd = jnp.pad(x_tbd, ((0, 0), (0, B_pad - B), (0, 0)))

    args = [x_tbd]
    for l in range(num_layers):
        w_ih_cat = jnp.concatenate(
            [params[f"w_ih_l{l}"], params[f"w_ih_l{l}_rev"]], axis=1)   # (Din_l, 8H)
        b_cat = jnp.concatenate(
            [params[f"b_l{l}"], params[f"b_l{l}_rev"]], axis=1)         # (1, 8H)
        args += [w_ih_cat, params[f"w_hh_l{l}"], params[f"w_hh_l{l}_rev"], b_cat]
    args += [params["w1"], params["b1"], params["w2"], params["b2"]]

    def zero_map(nd):
        return lambda i, nd=nd: (0,) * nd

    in_specs = [pl.BlockSpec(a.shape, zero_map(a.ndim)) for a in args]

    kernel = functools.partial(_fused_forward_kernel,
                               num_layers=num_layers, T=T, H=H)
    out = pl.pallas_call(
        kernel,
        out_shape=jax.ShapeDtypeStruct((B_pad, O), jnp.float32),
        grid=(1,),
        in_specs=in_specs,
        out_specs=pl.BlockSpec((B_pad, O), lambda i: (0, 0)),
        scratch_shapes=[
            pltpu.VMEM((T, B_pad, 4 * H), jnp.float32),   # hoisted proj, fwd
            pltpu.VMEM((T, B_pad, 4 * H), jnp.float32),   # hoisted proj, rev
            pltpu.VMEM((T, B_pad, H), jnp.float32),       # hidden states, fwd
            pltpu.VMEM((T, B_pad, H), jnp.float32),       # hidden states, rev
        ],
        compiler_params=pltpu.CompilerParams(
            dimension_semantics=("arbitrary",)),
    )(*args)
    return jnp.squeeze(out[:B])                            # matches .squeeze()


# ----------------------------------------------------------------------------
# Pure-JAX reference for validation
# ----------------------------------------------------------------------------
def _lstm_dir_ref(x_tbd, w_ih, w_hh, b, reverse):
    T, B, _ = x_tbd.shape
    H = w_hh.shape[0]
    xs = x_tbd[::-1] if reverse else x_tbd

    def step(carry, x_t):
        h, c = carry
        gates = x_t @ w_ih + h @ w_hh + b
        i = jax.nn.sigmoid(gates[:, :H])
        f = jax.nn.sigmoid(gates[:, H:2 * H])
        g = jnp.tanh(gates[:, 2 * H:3 * H])
        o = jax.nn.sigmoid(gates[:, 3 * H:])
        c = f * c + i * g
        h = o * jnp.tanh(c)
        return (h, c), h

    (_, _), hs = lax.scan(step, (jnp.zeros((B, H)), jnp.zeros((B, H))), xs)
    return hs[::-1] if reverse else hs


def forward_ref(x_tokens, params, *, num_layers):
    emb = params["embedding"][x_tokens]
    layer_in = jnp.transpose(emb, (1, 0, 2))
    for l in range(num_layers):
        fwd = _lstm_dir_ref(layer_in, params[f"w_ih_l{l}"], params[f"w_hh_l{l}"],
                            params[f"b_l{l}"], False)
        bwd = _lstm_dir_ref(layer_in, params[f"w_ih_l{l}_rev"], params[f"w_hh_l{l}_rev"],
                            params[f"b_l{l}_rev"], True)
        layer_in = jnp.concatenate([fwd, bwd], axis=-1)
    o = jnp.transpose(layer_in, (1, 0, 2))                 # (B, T, 2H)
    w = jax.nn.softmax(o, axis=1)
    ctx = jnp.sum(w * o, axis=1)
    h1 = jnp.maximum(ctx @ params["w1"] + params["b1"], 0.0)
    y = jax.nn.sigmoid(h1 @ params["w2"] + params["b2"])
    return jnp.squeeze(y)


# ----------------------------------------------------------------------------
# Deterministic parameter init (PyTorch-like uniform(-1/sqrt(H), 1/sqrt(H)))
# ----------------------------------------------------------------------------
def init_params(key, input_dim, hidden_dim, output_dim, num_layers):
    params = {}
    k = 1.0 / np.sqrt(hidden_dim)
    keys = iter(jax.random.split(key, 64))

    params["embedding"] = jax.random.normal(next(keys), (5, input_dim), jnp.float32)

    for l in range(num_layers):
        din = input_dim if l == 0 else 2 * hidden_dim
        for suffix in ["", "_rev"]:
            params[f"w_ih_l{l}{suffix}"] = jax.random.uniform(
                next(keys), (din, 4 * hidden_dim), jnp.float32, -k, k)
            params[f"w_hh_l{l}{suffix}"] = jax.random.uniform(
                next(keys), (hidden_dim, 4 * hidden_dim), jnp.float32, -k, k)
            b_ih = jax.random.uniform(next(keys), (1, 4 * hidden_dim), jnp.float32, -k, k)
            b_hh = jax.random.uniform(next(keys), (1, 4 * hidden_dim), jnp.float32, -k, k)
            params[f"b_l{l}{suffix}"] = b_ih + b_hh

    k1 = 1.0 / np.sqrt(2 * hidden_dim)
    params["w1"] = jax.random.uniform(next(keys), (2 * hidden_dim, hidden_dim),
                                      jnp.float32, -k1, k1)
    params["b1"] = jax.random.uniform(next(keys), (1, hidden_dim), jnp.float32, -k1, k1)
    k2 = 1.0 / np.sqrt(hidden_dim)
    params["w2"] = jax.random.uniform(next(keys), (hidden_dim, output_dim),
                                      jnp.float32, -k2, k2)
    params["b2"] = jax.random.uniform(next(keys), (1, output_dim), jnp.float32, -k2, k2)
    return params


# ----------------------------------------------------------------------------
if __name__ == "__main__":
    B, T = 2, 8
    INPUT_DIM, HIDDEN_DIM, OUTPUT_DIM, NUM_LAYERS = 16, 32, 1, 2

    key = jax.random.PRNGKey(0)
    k_params, k_x = jax.random.split(key)
    params = init_params(k_params, INPUT_DIM, HIDDEN_DIM, OUTPUT_DIM, NUM_LAYERS)

    # token indices into the 5-entry embedding table
    x = jax.random.randint(k_x, (B, T), 0, 5, dtype=jnp.int32)

    y = forward_pallas(x, params, num_layers=NUM_LAYERS)
    y = jax.block_until_ready(y)

    y_ref = forward_ref(x, params, num_layers=NUM_LAYERS)
    assert y.shape == (B,), y.shape
    assert np.allclose(np.asarray(y), np.asarray(y_ref), rtol=2e-3, atol=2e-3), (
        np.asarray(y), np.asarray(y_ref))

    print("KERNEL_OK")
</pallas_src>

<mosaic_0001>
module attributes {stable_mosaic.version = 11 : i64} {
  func.func @_fused_forward_kernel(%arg0: i32, %arg1: memref<8x8x16xf32, #tpu.memory_space<vmem>>, %arg2: memref<16x256xf32, #tpu.memory_space<vmem>>, %arg3: memref<32x128xf32, #tpu.memory_space<vmem>>, %arg4: memref<32x128xf32, #tpu.memory_space<vmem>>, %arg5: memref<1x256xf32, #tpu.memory_space<vmem>>, %arg6: memref<64x256xf32, #tpu.memory_space<vmem>>, %arg7: memref<32x128xf32, #tpu.memory_space<vmem>>, %arg8: memref<32x128xf32, #tpu.memory_space<vmem>>, %arg9: memref<1x256xf32, #tpu.memory_space<vmem>>, %arg10: memref<64x32xf32, #tpu.memory_space<vmem>>, %arg11: memref<1x32xf32, #tpu.memory_space<vmem>>, %arg12: memref<32x1xf32, #tpu.memory_space<vmem>>, %arg13: memref<1x1xf32, #tpu.memory_space<vmem>>, %arg14: memref<8x1xf32, #tpu.memory_space<vmem>>, %arg15: memref<8x8x128xf32, #tpu.memory_space<vmem>>, %arg16: memref<8x8x128xf32, #tpu.memory_space<vmem>>, %arg17: memref<8x8x32xf32, #tpu.memory_space<vmem>>, %arg18: memref<8x8x32xf32, #tpu.memory_space<vmem>>) attributes {dimension_semantics = [#tpu.dimension_semantics<arbitrary>], iteration_bounds = array<i64: 1>, scalar_prefetch = 0 : i64, scratch_operands = 4 : i64, tpu.core_type = #tpu.core_type<tc>, window_params = [{pipeline_mode = #tpu.pipeline_mode<synchronous>, transform_indices = @transform_0, window_bounds = array<i64: 8, 8, 16>}, {pipeline_mode = #tpu.pipeline_mode<synchronous>, transform_indices = @transform_1, window_bounds = array<i64: 16, 256>}, {pipeline_mode = #tpu.pipeline_mode<synchronous>, transform_indices = @transform_2, window_bounds = array<i64: 32, 128>}, {pipeline_mode = #tpu.pipeline_mode<synchronous>, transform_indices = @transform_3, window_bounds = array<i64: 32, 128>}, {pipeline_mode = #tpu.pipeline_mode<synchronous>, transform_indices = @transform_4, window_bounds = array<i64: 1, 256>}, {pipeline_mode = #tpu.pipeline_mode<synchronous>, transform_indices = @transform_5, window_bounds = array<i64: 64, 256>}, {pipeline_mode = #tpu.pipeline_mode<synchronous>, transform_indices = @transform_6, window_bounds = array<i64: 32, 128>}, {pipeline_mode = #tpu.pipeline_mode<synchronous>, transform_indices = @transform_7, window_bounds = array<i64: 32, 128>}, {pipeline_mode = #tpu.pipeline_mode<synchronous>, transform_indices = @transform_8, window_bounds = array<i64: 1, 256>}, {pipeline_mode = #tpu.pipeline_mode<synchronous>, transform_indices = @transform_9, window_bounds = array<i64: 64, 32>}, {pipeline_mode = #tpu.pipeline_mode<synchronous>, transform_indices = @transform_10, window_bounds = array<i64: 1, 32>}, {pipeline_mode = #tpu.pipeline_mode<synchronous>, transform_indices = @transform_11, window_bounds = array<i64: 32, 1>}, {pipeline_mode = #tpu.pipeline_mode<synchronous>, transform_indices = @transform_12, window_bounds = array<i64: 1, 1>}, {pipeline_mode = #tpu.pipeline_mode<synchronous>, transform_indices = @transform_13, window_bounds = array<i64: 8, 1>}]} {
    %c0 = arith.constant 0 : index
    %c0_0 = arith.constant 0 : index
    %0 = vector.load %arg2[%c0, %c0_0] : memref<16x256xf32, #tpu.memory_space<vmem>>, vector<16x256xf32>
    %c0_1 = arith.constant 0 : index
    %c0_2 = arith.constant 0 : index
    %c0_3 = arith.constant 0 : index
    %1 = vector.load %arg1[%c0_1, %c0_2, %c0_3] : memref<8x8x16xf32, #tpu.memory_space<vmem>>, vector<8x8x16xf32>
    %2 = vector.shape_cast %1 : vector<8x8x16xf32> to vector<64x16xf32>
    %cst = arith.constant dense<0.000000e+00> : vector<64x256xf32>
    %3 = tpu.matmul %2, %0, %cst {dimension_numbers = #tpu.dot_dimension_numbers<[1], [0], [0], [1], [0, 0, 1, 1], [], []>} : vector<64x16xf32>, vector<16x256xf32>, vector<64x256xf32> -> vector<64x256xf32>
    %c0_4 = arith.constant 0 : index
    %c0_5 = arith.constant 0 : index
    %4 = vector.load %arg5[%c0_4, %c0_5] : memref<1x256xf32, #tpu.memory_space<vmem>>, vector<1x256xf32>
    %5 = vector.broadcast %4 : vector<1x256xf32> to vector<64x256xf32>
    %6 = arith.addf %3, %5 : vector<64x256xf32>
    %7 = vector.shape_cast %6 : vector<64x256xf32> to vector<8x8x256xf32>
    %8 = vector.extract_strided_slice %7 {offsets = [0, 0, 0], sizes = [8, 8, 128], strides = [1, 1, 1]} : vector<8x8x256xf32> to vector<8x8x128xf32>
    %c0_6 = arith.constant 0 : index
    %c0_7 = arith.constant 0 : index
    %c0_8 = arith.constant 0 : index
    %9 = vector.load %arg15[%c0_6, %c0_7, %c0_8] : memref<8x8x128xf32, #tpu.memory_space<vmem>>, vector<8x8x128xf32>
    tpu.vector_store %arg15[%c0_6, %c0_7, %c0_8], %8 {strides = array<i32>} : memref<8x8x128xf32, #tpu.memory_space<vmem>>, vector<8x8x128xf32>,
    %10 = vector.extract_strided_slice %7 {offsets = [0, 0, 128], sizes = [8, 8, 128], strides = [1, 1, 1]} : vector<8x8x256xf32> to vector<8x8x128xf32>
    %c0_9 = arith.constant 0 : index
    %c0_10 = arith.constant 0 : index
    %c0_11 = arith.constant 0 : index
    %11 = vector.load %arg16[%c0_9, %c0_10, %c0_11] : memref<8x8x128xf32, #tpu.memory_space<vmem>>, vector<8x8x128xf32>
    tpu.vector_store %arg16[%c0_9, %c0_10, %c0_11], %10 {strides = array<i32>} : memref<8x8x128xf32, #tpu.memory_space<vmem>>, vector<8x8x128xf32>,
    %c0_12 = arith.constant 0 : index
    %c0_13 = arith.constant 0 : index
    %12 = vector.load %arg3[%c0_12, %c0_13] : memref<32x128xf32, #tpu.memory_space<vmem>>, vector<32x128xf32>
    %c0_14 = arith.constant 0 : index
    %c0_15 = arith.constant 0 : index
    %13 = vector.load %arg4[%c0_14, %c0_15] : memref<32x128xf32, #tpu.memory_space<vmem>>, vector<32x128xf32>
    %cst_16 = arith.constant 0.000000e+00 : f32
    %14 = vector.broadcast %cst_16 : f32 to vector<8x32xf32>
    %cst_17 = arith.constant 0.000000e+00 : f32
    %15 = vector.broadcast %cst_17 : f32 to vector<8x32xf32>
    %cst_18 = arith.constant 0.000000e+00 : f32
    %16 = vector.broadcast %cst_18 : f32 to vector<8x32xf32>
    %cst_19 = arith.constant 0.000000e+00 : f32
    %17 = vector.broadcast %cst_19 : f32 to vector<8x32xf32>
    %c0_20 = arith.constant 0 : index
    %c0_21 = arith.constant 0 : index
    %c0_22 = arith.constant 0 : index
    %18 = vector.load %arg15[%c0_20, %c0_21, %c0_22] : memref<8x8x128xf32, #tpu.memory_space<vmem>>, vector<1x8x128xf32>
    %19 = vector.shape_cast %18 : vector<1x8x128xf32> to vector<8x128xf32>
    %cst_23 = arith.constant dense<0.000000e+00> : vector<8x128xf32>
    %20 = tpu.matmul %14, %12, %cst_23 {dimension_numbers = #tpu.dot_dimension_numbers<[1], [0], [0], [1], [0, 0, 1, 1], [], []>} : vector<8x32xf32>, vector<32x128xf32>, vector<8x128xf32> -> vector<8x128xf32>
    %21 = arith.addf %19, %20 : vector<8x128xf32>
    %c7 = arith.constant 7 : index
    %c0_24 = arith.constant 0 : index
    %c0_25 = arith.constant 0 : index
    %22 = vector.load %arg16[%c7, %c0_24, %c0_25] : memref<8x8x128xf32, #tpu.memory_space<vmem>>, vector<1x8x128xf32>
    %23 = vector.shape_cast %22 : vector<1x8x128xf32> to vector<8x128xf32>
    %cst_26 = arith.constant dense<0.000000e+00> : vector<8x128xf32>
    %24 = tpu.matmul %16, %13, %cst_26 {dimension_numbers = #tpu.dot_dimension_numbers<[1], [0], [0], [1], [0, 0, 1, 1], [], []>} : vector<8x32xf32>, vector<32x128xf32>, vector<8x128xf32> -> vector<8x128xf32>
    %25 = arith.addf %23, %24 : vector<8x128xf32>
    %26 = vector.extract_strided_slice %21 {offsets = [0, 0], sizes = [8, 32], strides = [1, 1]} : vector<8x128xf32> to vector<8x32xf32>
    %27 = arith.negf %26 : vector<8x32xf32>
    %28 = math.exp %27 : vector<8x32xf32>
    %cst_27 = arith.constant 1.000000e+00 : f32
    %29 = vector.broadcast %cst_27 : f32 to vector<8x32xf32>
    %30 = arith.addf %29, %28 : vector<8x32xf32>
    %31 = arith.divf %29, %30 : vector<8x32xf32>
    %32 = vector.extract_strided_slice %21 {offsets = [0, 32], sizes = [8, 32], strides = [1, 1]} : vector<8x128xf32> to vector<8x32xf32>
    %33 = arith.negf %32 : vector<8x32xf32>
    %34 = math.exp %33 : vector<8x32xf32>
    %cst_28 = arith.constant 1.000000e+00 : f32
    %35 = vector.broadcast %cst_28 : f32 to vector<8x32xf32>
    %36 = arith.addf %35, %34 : vector<8x32xf32>
    %37 = arith.divf %35, %36 : vector<8x32xf32>
    %38 = vector.extract_strided_slice %21 {offsets = [0, 64], sizes = [8, 32], strides = [1, 1]} : vector<8x128xf32> to vector<8x32xf32>
    %39 = math.tanh %38 : vector<8x32xf32>
    %40 = vector.extract_strided_slice %21 {offsets = [0, 96], sizes = [8, 32], strides = [1, 1]} : vector<8x128xf32> to vector<8x32xf32>
    %41 = arith.negf %40 : vector<8x32xf32>
    %42 = math.exp %41 : vector<8x32xf32>
    %cst_29 = arith.constant 1.000000e+00 : f32
    %43 = vector.broadcast %cst_29 : f32 to vector<8x32xf32>
    %44 = arith.addf %43, %42 : vector<8x32xf32>
    %45 = arith.divf %43, %44 : vector<8x32xf32>
    %46 = arith.mulf %37, %15 : vector<8x32xf32>
    %47 = arith.mulf %31, %39 : vector<8x32xf32>
    %48 = arith.addf %46, %47 : vector<8x32xf32>
    %49 = math.tanh %48 : vector<8x32xf32>
    %50 = arith.mulf %45, %49 : vector<8x32xf32>
    %51 = vector.extract_strided_slice %25 {offsets = [0, 0], sizes = [8, 32], strides = [1, 1]} : vector<8x128xf32> to vector<8x32xf32>
    %52 = arith.negf %51 : vector<8x32xf32>
    %53 = math.exp %52 : vector<8x32xf32>
    %cst_30 = arith.constant 1.000000e+00 : f32
    %54 = vector.broadcast %cst_30 : f32 to vector<8x32xf32>
    %55 = arith.addf %54, %53 : vector<8x32xf32>
    %56 = arith.divf %54, %55 : vector<8x32xf32>
    %57 = vector.extract_strided_slice %25 {offsets = [0, 32], sizes = [8, 32], strides = [1, 1]} : vector<8x128xf32> to vector<8x32xf32>
    %58 = arith.negf %57 : vector<8x32xf32>
    %59 = math.exp %58 : vector<8x32xf32>
    %cst_31 = arith.constant 1.000000e+00 : f32
    %60 = vector.broadcast %cst_31 : f32 to vector<8x32xf32>
    %61 = arith.addf %60, %59 : vector<8x32xf32>
    %62 = arith.divf %60, %61 : vector<8x32xf32>
    %63 = vector.extract_strided_slice %25 {offsets = [0, 64], sizes = [8, 32], strides = [1, 1]} : vector<8x128xf32> to vector<8x32xf32>
    %64 = math.tanh %63 : vector<8x32xf32>
    %65 = vector.extract_strided_slice %25 {offsets = [0, 96], sizes = [8, 32], strides = [1, 1]} : vector<8x128xf32> to vector<8x32xf32>
    %66 = arith.negf %65 : vector<8x32xf32>
    %67 = math.exp %66 : vector<8x32xf32>
    %cst_32 = arith.constant 1.000000e+00 : f32
    %68 = vector.broadcast %cst_32 : f32 to vector<8x32xf32>
    %69 = arith.addf %68, %67 : vector<8x32xf32>
    %70 = arith.divf %68, %69 : vector<8x32xf32>
    %71 = arith.mulf %62, %17 : vector<8x32xf32>
    %72 = arith.mulf %56, %64 : vector<8x32xf32>
    %73 = arith.addf %71, %72 : vector<8x32xf32>
    %74 = math.tanh %73 : vector<8x32xf32>
    %75 = arith.mulf %70, %74 : vector<8x32xf32>
    %c0_33 = arith.constant 0 : index
    %c0_34 = arith.constant 0 : index
    %c0_35 = arith.constant 0 : index
    %76 = vector.load %arg17[%c0_33, %c0_34, %c0_35] : memref<8x8x32xf32, #tpu.memory_space<vmem>>, vector<1x8x32xf32>
    %77 = vector.shape_cast %76 : vector<1x8x32xf32> to vector<8x32xf32>
    %78 = vector.shape_cast %50 : vector<8x32xf32> to vector<1x8x32xf32>
    tpu.vector_store %arg17[%c0_33, %c0_34, %c0_35], %78 {strides = array<i32>} : memref<8x8x32xf32, #tpu.memory_space<vmem>>, vector<1x8x32xf32>,
    %c7_36 = arith.constant 7 : index
    %c0_37 = arith.constant 0 : index
    %c0_38 = arith.constant 0 : index
    %79 = vector.load %arg18[%c7_36, %c0_37, %c0_38] : memref<8x8x32xf32, #tpu.memory_space<vmem>>, vector<1x8x32xf32>
    %80 = vector.shape_cast %79 : vector<1x8x32xf32> to vector<8x32xf32>
    %81 = vector.shape_cast %75 : vector<8x32xf32> to vector<1x8x32xf32>
    tpu.vector_store %arg18[%c7_36, %c0_37, %c0_38], %81 {strides = array<i32>} : memref<8x8x32xf32, #tpu.memory_space<vmem>>, vector<1x8x32xf32>,
    %c1 = arith.constant 1 : index
    %c0_39 = arith.constant 0 : index
    %c0_40 = arith.constant 0 : index
    %82 = vector.load %arg15[%c1, %c0_39, %c0_40] : memref<8x8x128xf32, #tpu.memory_space<vmem>>, vector<1x8x128xf32>
    %83 = vector.shape_cast %82 : vector<1x8x128xf32> to vector<8x128xf32>
    %cst_41 = arith.constant dense<0.000000e+00> : vector<8x128xf32>
    %84 = tpu.matmul %50, %12, %cst_41 {dimension_numbers = #tpu.dot_dimension_numbers<[1], [0], [0], [1], [0, 0, 1, 1], [], []>} : vector<8x32xf32>, vector<32x128xf32>, vector<8x128xf32> -> vector<8x128xf32>
    %85 = arith.addf %83, %84 : vector<8x128xf32>
    %c6 = arith.constant 6 : index
    %c0_42 = arith.constant 0 : index
    %c0_43 = arith.constant 0 : index
    %86 = vector.load %arg16[%c6, %c0_42, %c0_43] : memref<8x8x128xf32, #tpu.memory_space<vmem>>, vector<1x8x128xf32>
    %87 = vector.shape_cast %86 : vector<1x8x128xf32> to vector<8x128xf32>
    %cst_44 = arith.constant dense<0.000000e+00> : vector<8x128xf32>
    %88 = tpu.matmul %75, %13, %cst_44 {dimension_numbers = #tpu.dot_dimension_numbers<[1], [0], [0], [1], [0, 0, 1, 1], [], []>} : vector<8x32xf32>, vector<32x128xf32>, vector<8x128xf32> -> vector<8x128xf32>
    %89 = arith.addf %87, %88 : vector<8x128xf32>
    %90 = vector.extract_strided_slice %85 {offsets = [0, 0], sizes = [8, 32], strides = [1, 1]} : vector<8x128xf32> to vector<8x32xf32>
    %91 = arith.negf %90 : vector<8x32xf32>
    %92 = math.exp %91 : vector<8x32xf32>
    %cst_45 = arith.constant 1.000000e+00 : f32
    %93 = vector.broadcast %cst_45 : f32 to vector<8x32xf32>
    %94 = arith.addf %93, %92 : vector<8x32xf32>
    %95 = arith.divf %93, %94 : vector<8x32xf32>
    %96 = vector.extract_strided_slice %85 {offsets = [0, 32], sizes = [8, 32], strides = [1, 1]} : vector<8x128xf32> to vector<8x32xf32>
    %97 = arith.negf %96 : vector<8x32xf32>
    %98 = math.exp %97 : vector<8x32xf32>
    %cst_46 = arith.constant 1.000000e+00 : f32
    %99 = vector.broadcast %cst_46 : f32 to vector<8x32xf32>
    %100 = arith.addf %99, %98 : vector<8x32xf32>
    %101 = arith.divf %99, %100 : vector<8x32xf32>
    %102 = vector.extract_strided_slice %85 {offsets = [0, 64], sizes = [8, 32], strides = [1, 1]} : vector<8x128xf32> to vector<8x32xf32>
    %103 = math.tanh %102 : vector<8x32xf32>
    %104 = vector.extract_strided_slice %85 {offsets = [0, 96], sizes = [8, 32], strides = [1, 1]} : vector<8x128xf32> to vector<8x32xf32>
    %105 = arith.negf %104 : vector<8x32xf32>
    %106 = math.exp %105 : vector<8x32xf32>
    %cst_47 = arith.constant 1.000000e+00 : f32
    %107 = vector.broadcast %cst_47 : f32 to vector<8x32xf32>
    %108 = arith.addf %107, %106 : vector<8x32xf32>
    %109 = arith.divf %107, %108 : vector<8x32xf32>
    %110 = arith.mulf %101, %48 : vector<8x32xf32>
    %111 = arith.mulf %95, %103 : vector<8x32xf32>
    %112 = arith.addf %110, %111 : vector<8x32xf32>
    %113 = math.tanh %112 : vector<8x32xf32>
    %114 = arith.mulf %109, %113 : vector<8x32xf32>
    %115 = vector.extract_strided_slice %89 {offsets = [0, 0], sizes = [8, 32], strides = [1, 1]} : vector<8x128xf32> to vector<8x32xf32>
    %116 = arith.negf %115 : vector<8x32xf32>
    %117 = math.exp %116 : vector<8x32xf32>
    %cst_48 = arith.constant 1.000000e+00 : f32
    %118 = vector.broadcast %cst_48 : f32 to vector<8x32xf32>
    %119 = arith.addf %118, %117 : vector<8x32xf32>
    %120 = arith.divf %118, %119 : vector<8x32xf32>
    %121 = vector.extract_strided_slice %89 {offsets = [0, 32], sizes = [8, 32], strides = [1, 1]} : vector<8x128xf32> to vector<8x32xf32>
    %122 = arith.negf %121 : vector<8x32xf32>
    %123 = math.exp %122 : vector<8x32xf32>
    %cst_49 = arith.constant 1.000000e+00 : f32
    %124 = vector.broadcast %cst_49 : f32 to vector<8x32xf32>
    %125 = arith.addf %124, %123 : vector<8x32xf32>
    %126 = arith.divf %124, %125 : vector<8x32xf32>
    %127 = vector.extract_strided_slice %89 {offsets = [0, 64], sizes = [8, 32], strides = [1, 1]} : vector<8x128xf32> to vector<8x32xf32>
    %128 = math.tanh %127 : vector<8x32xf32>
    %129 = vector.extract_strided_slice %89 {offsets = [0, 96], sizes = [8, 32], strides = [1, 1]} : vector<8x128xf32> to vector<8x32xf32>
    %130 = arith.negf %129 : vector<8x32xf32>
    %131 = math.exp %130 : vector<8x32xf32>
    %cst_50 = arith.constant 1.000000e+00 : f32
    %132 = vector.broadcast %cst_50 : f32 to vector<8x32xf32>
    %133 = arith.addf %132, %131 : vector<8x32xf32>
    %134 = arith.divf %132, %133 : vector<8x32xf32>
    %135 = arith.mulf %126, %73 : vector<8x32xf32>
    %136 = arith.mulf %120, %128 : vector<8x32xf32>
    %137 = arith.addf %135, %136 : vector<8x32xf32>
    %138 = math.tanh %137 : vector<8x32xf32>
    %139 = arith.mulf %134, %138 : vector<8x32xf32>
    %c1_51 = arith.constant 1 : index
    %c0_52 = arith.constant 0 : index
    %c0_53 = arith.constant 0 : index
    %140 = vector.load %arg17[%c1_51, %c0_52, %c0_53] : memref<8x8x32xf32, #tpu.memory_space<vmem>>, vector<1x8x32xf32>
    %141 = vector.shape_cast %140 : vector<1x8x32xf32> to vector<8x32xf32>
    %142 = vector.shape_cast %114 : vector<8x32xf32> to vector<1x8x32xf32>
    tpu.vector_store %arg17[%c1_51, %c0_52, %c0_53], %142 {strides = array<i32>} : memref<8x8x32xf32, #tpu.memory_space<vmem>>, vector<1x8x32xf32>,
    %c6_54 = arith.constant 6 : index
    %c0_55 = arith.constant 0 : index
    %c0_56 = arith.constant 0 : index
    %143 = vector.load %arg18[%c6_54, %c0_55, %c0_56] : memref<8x8x32xf32, #tpu.memory_space<vmem>>, vector<1x8x32xf32>
    %144 = vector.shape_cast %143 : vector<1x8x32xf32> to vector<8x32xf32>
    %145 = vector.shape_cast %139 : vector<8x32xf32> to vector<1x8x32xf32>
    tpu.vector_store %arg18[%c6_54, %c0_55, %c0_56], %145 {strides = array<i32>} : memref<8x8x32xf32, #tpu.memory_space<vmem>>, vector<1x8x32xf32>,
    %c2 = arith.constant 2 : index
    %c0_57 = arith.constant 0 : index
    %c0_58 = arith.constant 0 : index
    %146 = vector.load %arg15[%c2, %c0_57, %c0_58] : memref<8x8x128xf32, #tpu.memory_space<vmem>>, vector<1x8x128xf32>
    %147 = vector.shape_cast %146 : vector<1x8x128xf32> to vector<8x128xf32>
    %cst_59 = arith.constant dense<0.000000e+00> : vector<8x128xf32>
    %148 = tpu.matmul %114, %12, %cst_59 {dimension_numbers = #tpu.dot_dimension_numbers<[1], [0], [0], [1], [0, 0, 1, 1], [], []>} : vector<8x32xf32>, vector<32x128xf32>, vector<8x128xf32> -> vector<8x128xf32>
    %149 = arith.addf %147, %148 : vector<8x128xf32>
    %c5 = arith.constant 5 : index
    %c0_60 = arith.constant 0 : index
    %c0_61 = arith.constant 0 : index
    %150 = vector.load %arg16[%c5, %c0_60, %c0_61] : memref<8x8x128xf32, #tpu.memory_space<vmem>>, vector<1x8x128xf32>
    %151 = vector.shape_cast %150 : vector<1x8x128xf32> to vector<8x128xf32>
    %cst_62 = arith.constant dense<0.000000e+00> : vector<8x128xf32>
    %152 = tpu.matmul %139, %13, %cst_62 {dimension_numbers = #tpu.dot_dimension_numbers<[1], [0], [0], [1], [0, 0, 1, 1], [], []>} : vector<8x32xf32>, vector<32x128xf32>, vector<8x128xf32> -> vector<8x128xf32>
    %153 = arith.addf %151, %152 : vector<8x128xf32>
    %154 = vector.extract_strided_slice %149 {offsets = [0, 0], sizes = [8, 32], strides = [1, 1]} : vector<8x128xf32> to vector<8x32xf32>
    %155 = arith.negf %154 : vector<8x32xf32>
    %156 = math.exp %155 : vector<8x32xf32>
    %cst_63 = arith.constant 1.000000e+00 : f32
    %157 = vector.broadcast %cst_63 : f32 to vector<8x32xf32>
    %158 = arith.addf %157, %156 : vector<8x32xf32>
    %159 = arith.divf %157, %158 : vector<8x32xf32>
    %160 = vector.extract_strided_slice %149 {offsets = [0, 32], sizes = [8, 32], strides = [1, 1]} : vector<8x128xf32> to vector<8x32xf32>
    %161 = arith.negf %160 : vector<8x32xf32>
    %162 = math.exp %161 : vector<8x32xf32>
    %cst_64 = arith.constant 1.000000e+00 : f32
    %163 = vector.broadcast %cst_64 : f32 to vector<8x32xf32>
    %164 = arith.addf %163, %162 : vector<8x32xf32>
    %165 = arith.divf %163, %164 : vector<8x32xf32>
    %166 = vector.extract_strided_slice %149 {offsets = [0, 64], sizes = [8, 32], strides = [1, 1]} : vector<8x128xf32> to vector<8x32xf32>
    %167 = math.tanh %166 : vector<8x32xf32>
    %168 = vector.extract_strided_slice %149 {offsets = [0, 96], sizes = [8, 32], strides = [1, 1]} : vector<8x128xf32> to vector<8x32xf32>
    %169 = arith.negf %168 : vector<8x32xf32>
    %170 = math.exp %169 : vector<8x32xf32>
    %cst_65 = arith.constant 1.000000e+00 : f32
    %171 = vector.broadcast %cst_65 : f32 to vector<8x32xf32>
    %172 = arith.addf %171, %170 : vector<8x32xf32>
    %173 = arith.divf %171, %172 : vector<8x32xf32>
    %174 = arith.mulf %165, %112 : vector<8x32xf32>
    %175 = arith.mulf %159, %167 : vector<8x32xf32>
    %176 = arith.addf %174, %175 : vector<8x32xf32>
    %177 = math.tanh %176 : vector<8x32xf32>
    %178 = arith.mulf %173, %177 : vector<8x32xf32>
    %179 = vector.extract_strided_slice %153 {offsets = [0, 0], sizes = [8, 32], strides = [1, 1]} : vector<8x128xf32> to vector<8x32xf32>
    %180 = arith.negf %179 : vector<8x32xf32>
    %181 = math.exp %180 : vector<8x32xf32>
    %cst_66 = arith.constant 1.000000e+00 : f32
    %182 = vector.broadcast %cst_66 : f32 to vector<8x32xf32>
    %183 = arith.addf %182, %181 : vector<8x32xf32>
    %184 = arith.divf %182, %183 : vector<8x32xf32>
    %185 = vector.extract_strided_slice %153 {offsets = [0, 32], sizes = [8, 32], strides = [1, 1]} : vector<8x128xf32> to vector<8x32xf32>
    %186 = arith.negf %185 : vector<8x32xf32>
    %187 = math.exp %186 : vector<8x32xf32>
    %cst_67 = arith.constant 1.000000e+00 : f32
    %188 = vector.broadcast %cst_67 : f32 to vector<8x32xf32>
    %189 = arith.addf %188, %187 : vector<8x32xf32>
    %190 = arith.divf %188, %189 : vector<8x32xf32>
    %191 = vector.extract_strided_slice %153 {offsets = [0, 64], sizes = [8, 32], strides = [1, 1]} : vector<8x128xf32> to vector<8x32xf32>
    %192 = math.tanh %191 : vector<8x32xf32>
    %193 = vector.extract_strided_slice %153 {offsets = [0, 96], sizes = [8, 32], strides = [1, 1]} : vector<8x128xf32> to vector<8x32xf32>
    %194 = arith.negf %193 : vector<8x32xf32>
    %195 = math.exp %194 : vector<8x32xf32>
    %cst_68 = arith.constant 1.000000e+00 : f32
    %196 = vector.broadcast %cst_68 : f32 to vector<8x32xf32>
    %197 = arith.addf %196, %195 : vector<8x32xf32>
    %198 = arith.divf %196, %197 : vector<8x32xf32>
    %199 = arith.mulf %190, %137 : vector<8x32xf32>
    %200 = arith.mulf %184, %192 : vector<8x32xf32>
    %201 = arith.addf %199, %200 : vector<8x32xf32>
    %202 = math.tanh %201 : vector<8x32xf32>
    %203 = arith.mulf %198, %202 : vector<8x32xf32>
    %c2_69 = arith.constant 2 : index
    %c0_70 = arith.constant 0 : index
    %c0_71 = arith.constant 0 : index
    %204 = vector.load %arg17[%c2_69, %c0_70, %c0_71] : memref<8x8x32xf32, #tpu.memory_space<vmem>>, vector<1x8x32xf32>
    %205 = vector.shape_cast %204 : vector<1x8x32xf32> to vector<8x32xf32>
    %206 = vector.shape_cast %178 : vector<8x32xf32> to vector<1x8x32xf32>
    tpu.vector_store %arg17[%c2_69, %c0_70, %c0_71], %206 {strides = array<i32>} : memref<8x8x32xf32, #tpu.memory_space<vmem>>, vector<1x8x32xf32>,
    %c5_72 = arith.constant 5 : index
    %c0_73 = arith.constant 0 : index
    %c0_74 = arith.constant 0 : index
    %207 = vector.load %arg18[%c5_72, %c0_73, %c0_74] : memref<8x8x32xf32, #tpu.memory_space<vmem>>, vector<1x8x32xf32>
    %208 = vector.shape_cast %207 : vector<1x8x32xf32> to vector<8x32xf32>
    %209 = vector.shape_cast %203 : vector<8x32xf32> to vector<1x8x32xf32>
    tpu.vector_store %arg18[%c5_72, %c0_73, %c0_74], %209 {strides = array<i32>} : memref<8x8x32xf32, #tpu.memory_space<vmem>>, vector<1x8x32xf32>,
    %c3 = arith.constant 3 : index
    %c0_75 = arith.constant 0 : index
    %c0_76 = arith.constant 0 : index
    %210 = vector.load %arg15[%c3, %c0_75, %c0_76] : memref<8x8x128xf32, #tpu.memory_space<vmem>>, vector<1x8x128xf32>
    %211 = vector.shape_cast %210 : vector<1x8x128xf32> to vector<8x128xf32>
    %cst_77 = arith.constant dense<0.000000e+00> : vector<8x128xf32>
    %212 = tpu.matmul %178, %12, %cst_77 {dimension_numbers = #tpu.dot_dimension_numbers<[1], [0], [0], [1], [0, 0, 1, 1], [], []>} : vector<8x32xf32>, vector<32x128xf32>, vector<8x128xf32> -> vector<8x128xf32>
    %213 = arith.addf %211, %212 : vector<8x128xf32>
    %c4 = arith.constant 4 : index
    %c0_78 = arith.constant 0 : index
    %c0_79 = arith.constant 0 : index
    %214 = vector.load %arg16[%c4, %c0_78, %c0_79] : memref<8x8x128xf32, #tpu.memory_space<vmem>>, vector<1x8x128xf32>
    %215 = vector.shape_cast %214 : vector<1x8x128xf32> to vector<8x128xf32>
    %cst_80 = arith.constant dense<0.000000e+00> : vector<8x128xf32>
    %216 = tpu.matmul %203, %13, %cst_80 {dimension_numbers = #tpu.dot_dimension_numbers<[1], [0], [0], [1], [0, 0, 1, 1], [], []>} : vector<8x32xf32>, vector<32x128xf32>, vector<8x128xf32> -> vector<8x128xf32>
    %217 = arith.addf %215, %216 : vector<8x128xf32>
    %218 = vector.extract_strided_slice %213 {offsets = [0, 0], sizes = [8, 32], strides = [1, 1]} : vector<8x128xf32> to vector<8x32xf32>
    %219 = arith.negf %218 : vector<8x32xf32>
    %220 = math.exp %219 : vector<8x32xf32>
    %cst_81 = arith.constant 1.000000e+00 : f32
    %221 = vector.broadcast %cst_81 : f32 to vector<8x32xf32>
    %222 = arith.addf %221, %220 : vector<8x32xf32>
    %223 = arith.divf %221, %222 : vector<8x32xf32>
    %224 = vector.extract_strided_slice %213 {offsets = [0, 32], sizes = [8, 32], strides = [1, 1]} : vector<8x128xf32> to vector<8x32xf32>
    %225 = arith.negf %224 : vector<8x32xf32>
    %226 = math.exp %225 : vector<8x32xf32>
    %cst_82 = arith.constant 1.000000e+00 : f32
    %227 = vector.broadcast %cst_82 : f32 to vector<8x32xf32>
    %228 = arith.addf %227, %226 : vector<8x32xf32>
    %229 = arith.divf %227, %228 : vector<8x32xf32>
    %230 = vector.extract_strided_slice %213 {offsets = [0, 64], sizes = [8, 32], strides = [1, 1]} : vector<8x128xf32> to vector<8x32xf32>
    %231 = math.tanh %230 : vector<8x32xf32>
    %232 = vector.extract_strided_slice %213 {offsets = [0, 96], sizes = [8, 32], strides = [1, 1]} : vector<8x128xf32> to vector<8x32xf32>
    %233 = arith.negf %232 : vector<8x32xf32>
    %234 = math.exp %233 : vector<8x32xf32>
    %cst_83 = arith.constant 1.000000e+00 : f32
    %235 = vector.broadcast %cst_83 : f32 to vector<8x32xf32>
    %236 = arith.addf %235, %234 : vector<8x32xf32>
    %237 = arith.divf %235, %236 : vector<8x32xf32>
    %238 = arith.mulf %229, %176 : vector<8x32xf32>
    %239 = arith.mulf %223, %231 : vector<8x32xf32>
    %240 = arith.addf %238, %239 : vector<8x32xf32>
    %241 = math.tanh %240 : vector<8x32xf32>
    %242 = arith.mulf %237, %241 : vector<8x32xf32>
    %243 = vector.extract_strided_slice %217 {offsets = [0, 0], sizes = [8, 32], strides = [1, 1]} : vector<8x128xf32> to vector<8x32xf32>
    %244 = arith.negf %243 : vector<8x32xf32>
    %245 = math.exp %244 : vector<8x32xf32>
    %cst_84 = arith.constant 1.000000e+00 : f32
    %246 = vector.broadcast %cst_84 : f32 to vector<8x32xf32>
    %247 = arith.addf %246, %245 : vector<8x32xf32>
    %248 = arith.divf %246, %247 : vector<8x32xf32>
    %249 = vector.extract_strided_slice %217 {offsets = [0, 32], sizes = [8, 32], strides = [1, 1]} : vector<8x128xf32> to vector<8x32xf32>
    %250 = arith.negf %249 : vector<8x32xf32>
    %251 = math.exp %250 : vector<8x32xf32>
    %cst_85 = arith.constant 1.000000e+00 : f32
    %252 = vector.broadcast %cst_85 : f32 to vector<8x32xf32>
    %253 = arith.addf %252, %251 : vector<8x32xf32>
    %254 = arith.divf %252, %253 : vector<8x32xf32>
    %255 = vector.extract_strided_slice %217 {offsets = [0, 64], sizes = [8, 32], strides = [1, 1]} : vector<8x128xf32> to vector<8x32xf32>
    %256 = math.tanh %255 : vector<8x32xf32>
    %257 = vector.extract_strided_slice %217 {offsets = [0, 96], sizes = [8, 32], strides = [1, 1]} : vector<8x128xf32> to vector<8x32xf32>
    %258 = arith.negf %257 : vector<8x32xf32>
    %259 = math.exp %258 : vector<8x32xf32>
    %cst_86 = arith.constant 1.000000e+00 : f32
    %260 = vector.broadcast %cst_86 : f32 to vector<8x32xf32>
    %261 = arith.addf %260, %259 : vector<8x32xf32>
    %262 = arith.divf %260, %261 : vector<8x32xf32>
    %263 = arith.mulf %254, %201 : vector<8x32xf32>
    %264 = arith.mulf %248, %256 : vector<8x32xf32>
    %265 = arith.addf %263, %264 : vector<8x32xf32>
    %266 = math.tanh %265 : vector<8x32xf32>
    %267 = arith.mulf %262, %266 : vector<8x32xf32>
    %c3_87 = arith.constant 3 : index
    %c0_88 = arith.constant 0 : index
    %c0_89 = arith.constant 0 : index
    %268 = vector.load %arg17[%c3_87, %c0_88, %c0_89] : memref<8x8x32xf32, #tpu.memory_space<vmem>>, vector<1x8x32xf32>
    %269 = vector.shape_cast %268 : vector<1x8x32xf32> to vector<8x32xf32>
    %270 = vector.shape_cast %242 : vector<8x32xf32> to vector<1x8x32xf32>
    tpu.vector_store %arg17[%c3_87, %c0_88, %c0_89], %270 {strides = array<i32>} : memref<8x8x32xf32, #tpu.memory_space<vmem>>, vector<1x8x32xf32>,
    %c4_90 = arith.constant 4 : index
    %c0_91 = arith.constant 0 : index
    %c0_92 = arith.constant 0 : index
    %271 = vector.load %arg18[%c4_90, %c0_91, %c0_92] : memref<8x8x32xf32, #tpu.memory_space<vmem>>, vector<1x8x32xf32>
    %272 = vector.shape_cast %271 : vector<1x8x32xf32> to vector<8x32xf32>
    %273 = vector.shape_cast %267 : vector<8x32xf32> to vector<1x8x32xf32>
    tpu.vector_store %arg18[%c4_90, %c0_91, %c0_92], %273 {strides = array<i32>} : memref<8x8x32xf32, #tpu.memory_space<vmem>>, vector<1x8x32xf32>,
    %c4_93 = arith.constant 4 : index
    %c0_94 = arith.constant 0 : index
    %c0_95 = arith.constant 0 : index
    %274 = vector.load %arg15[%c4_93, %c0_94, %c0_95] : memref<8x8x128xf32, #tpu.memory_space<vmem>>, vector<1x8x128xf32>
    %275 = vector.shape_cast %274 : vector<1x8x128xf32> to vector<8x128xf32>
    %cst_96 = arith.constant dense<0.000000e+00> : vector<8x128xf32>
    %276 = tpu.matmul %242, %12, %cst_96 {dimension_numbers = #tpu.dot_dimension_numbers<[1], [0], [0], [1], [0, 0, 1, 1], [], []>} : vector<8x32xf32>, vector<32x128xf32>, vector<8x128xf32> -> vector<8x128xf32>
    %277 = arith.addf %275, %276 : vector<8x128xf32>
    %c3_97 = arith.constant 3 : index
    %c0_98 = arith.constant 0 : index
    %c0_99 = arith.constant 0 : index
    %278 = vector.load %arg16[%c3_97, %c0_98, %c0_99] : memref<8x8x128xf32, #tpu.memory_space<vmem>>, vector<1x8x128xf32>
    %279 = vector.shape_cast %278 : vector<1x8x128xf32> to vector<8x128xf32>
    %cst_100 = arith.constant dense<0.000000e+00> : vector<8x128xf32>
    %280 = tpu.matmul %267, %13, %cst_100 {dimension_numbers = #tpu.dot_dimension_numbers<[1], [0], [0], [1], [0, 0, 1, 1], [], []>} : vector<8x32xf32>, vector<32x128xf32>, vector<8x128xf32> -> vector<8x128xf32>
    %281 = arith.addf %279, %280 : vector<8x128xf32>
    %282 = vector.extract_strided_slice %277 {offsets = [0, 0], sizes = [8, 32], strides = [1, 1]} : vector<8x128xf32> to vector<8x32xf32>
    %283 = arith.negf %282 : vector<8x32xf32>
    %284 = math.exp %283 : vector<8x32xf32>
    %cst_101 = arith.constant 1.000000e+00 : f32
    %285 = vector.broadcast %cst_101 : f32 to vector<8x32xf32>
    %286 = arith.addf %285, %284 : vector<8x32xf32>
    %287 = arith.divf %285, %286 : vector<8x32xf32>
    %288 = vector.extract_strided_slice %277 {offsets = [0, 32], sizes = [8, 32], strides = [1, 1]} : vector<8x128xf32> to vector<8x32xf32>
    %289 = arith.negf %288 : vector<8x32xf32>
    %290 = math.exp %289 : vector<8x32xf32>
    %cst_102 = arith.constant 1.000000e+00 : f32
    %291 = vector.broadcast %cst_102 : f32 to vector<8x32xf32>
    %292 = arith.addf %291, %290 : vector<8x32xf32>
    %293 = arith.divf %291, %292 : vector<8x32xf32>
    %294 = vector.extract_strided_slice %277 {offsets = [0, 64], sizes = [8, 32], strides = [1, 1]} : vector<8x128xf32> to vector<8x32xf32>
    %295 = math.tanh %294 : vector<8x32xf32>
    %296 = vector.extract_strided_slice %277 {offsets = [0, 96], sizes = [8, 32], strides = [1, 1]} : vector<8x128xf32> to vector<8x32xf32>
    %297 = arith.negf %296 : vector<8x32xf32>
    %298 = math.exp %297 : vector<8x32xf32>
    %cst_103 = arith.constant 1.000000e+00 : f32
    %299 = vector.broadcast %cst_103 : f32 to vector<8x32xf32>
    %300 = arith.addf %299, %298 : vector<8x32xf32>
    %301 = arith.divf %299, %300 : vector<8x32xf32>
    %302 = arith.mulf %293, %240 : vector<8x32xf32>
    %303 = arith.mulf %287, %295 : vector<8x32xf32>
    %304 = arith.addf %302, %303 : vector<8x32xf32>
    %305 = math.tanh %304 : vector<8x32xf32>
    %306 = arith.mulf %301, %305 : vector<8x32xf32>
    %307 = vector.extract_strided_slice %281 {offsets = [0, 0], sizes = [8, 32], strides = [1, 1]} : vector<8x128xf32> to vector<8x32xf32>
    %308 = arith.negf %307 : vector<8x32xf32>
    %309 = math.exp %308 : vector<8x32xf32>
    %cst_104 = arith.constant 1.000000e+00 : f32
    %310 = vector.broadcast %cst_104 : f32 to vector<8x32xf32>
    %311 = arith.addf %310, %309 : vector<8x32xf32>
    %312 = arith.divf %310, %311 : vector<8x32xf32>
    %313 = vector.extract_strided_slice %281 {offsets = [0, 32], sizes = [8, 32], strides = [1, 1]} : vector<8x128xf32> to vector<8x32xf32>
    %314 = arith.negf %313 : vector<8x32xf32>
    %315 = math.exp %314 : vector<8x32xf32>
    %cst_105 = arith.constant 1.000000e+00 : f32
    %316 = vector.broadcast %cst_105 : f32 to vector<8x32xf32>
    %317 = arith.addf %316, %315 : vector<8x32xf32>
    %318 = arith.divf %316, %317 : vector<8x32xf32>
    %319 = vector.extract_strided_slice %281 {offsets = [0, 64], sizes = [8, 32], strides = [1, 1]} : vector<8x128xf32> to vector<8x32xf32>
    %320 = math.tanh %319 : vector<8x32xf32>
    %321 = vector.extract_strided_slice %281 {offsets = [0, 96], sizes = [8, 32], strides = [1, 1]} : vector<8x128xf32> to vector<8x32xf32>
    %322 = arith.negf %321 : vector<8x32xf32>
    %323 = math.exp %322 : vector<8x32xf32>
    %cst_106 = arith.constant 1.000000e+00 : f32
    %324 = vector.broadcast %cst_106 : f32 to vector<8x32xf32>
    %325 = arith.addf %324, %323 : vector<8x32xf32>
    %326 = arith.divf %324, %325 : vector<8x32xf32>
    %327 = arith.mulf %318, %265 : vector<8x32xf32>
    %328 = arith.mulf %312, %320 : vector<8x32xf32>
    %329 = arith.addf %327, %328 : vector<8x32xf32>
    %330 = math.tanh %329 : vector<8x32xf32>
    %331 = arith.mulf %326, %330 : vector<8x32xf32>
    %c4_107 = arith.constant 4 : index
    %c0_108 = arith.constant 0 : index
    %c0_109 = arith.constant 0 : index
    %332 = vector.load %arg17[%c4_107, %c0_108, %c0_109] : memref<8x8x32xf32, #tpu.memory_space<vmem>>, vector<1x8x32xf32>
    %333 = vector.shape_cast %332 : vector<1x8x32xf32> to vector<8x32xf32>
    %334 = vector.shape_cast %306 : vector<8x32xf32> to vector<1x8x32xf32>
    tpu.vector_store %arg17[%c4_107, %c0_108, %c0_109], %334 {strides = array<i32>} : memref<8x8x32xf32, #tpu.memory_space<vmem>>, vector<1x8x32xf32>,
    %c3_110 = arith.constant 3 : index
    %c0_111 = arith.constant 0 : index
    %c0_112 = arith.constant 0 : index
    %335 = vector.load %arg18[%c3_110, %c0_111, %c0_112] : memref<8x8x32xf32, #tpu.memory_space<vmem>>, vector<1x8x32xf32>
    %336 = vector.shape_cast %335 : vector<1x8x32xf32> to vector<8x32xf32>
    %337 = vector.shape_cast %331 : vector<8x32xf32> to vector<1x8x32xf32>
    tpu.vector_store %arg18[%c3_110, %c0_111, %c0_112], %337 {strides = array<i32>} : memref<8x8x32xf32, #tpu.memory_space<vmem>>, vector<1x8x32xf32>,
    %c5_113 = arith.constant 5 : index
    %c0_114 = arith.constant 0 : index
    %c0_115 = arith.constant 0 : index
    %338 = vector.load %arg15[%c5_113, %c0_114, %c0_115] : memref<8x8x128xf32, #tpu.memory_space<vmem>>, vector<1x8x128xf32>
    %339 = vector.shape_cast %338 : vector<1x8x128xf32> to vector<8x128xf32>
    %cst_116 = arith.constant dense<0.000000e+00> : vector<8x128xf32>
    %340 = tpu.matmul %306, %12, %cst_116 {dimension_numbers = #tpu.dot_dimension_numbers<[1], [0], [0], [1], [0, 0, 1, 1], [], []>} : vector<8x32xf32>, vector<32x128xf32>, vector<8x128xf32> -> vector<8x128xf32>
    %341 = arith.addf %339, %340 : vector<8x128xf32>
    %c2_117 = arith.constant 2 : index
    %c0_118 = arith.constant 0 : index
    %c0_119 = arith.constant 0 : index
    %342 = vector.load %arg16[%c2_117, %c0_118, %c0_119] : memref<8x8x128xf32, #tpu.memory_space<vmem>>, vector<1x8x128xf32>
    %343 = vector.shape_cast %342 : vector<1x8x128xf32> to vector<8x128xf32>
    %cst_120 = arith.constant dense<0.000000e+00> : vector<8x128xf32>
    %344 = tpu.matmul %331, %13, %cst_120 {dimension_numbers = #tpu.dot_dimension_numbers<[1], [0], [0], [1], [0, 0, 1, 1], [], []>} : vector<8x32xf32>, vector<32x128xf32>, vector<8x128xf32> -> vector<8x128xf32>
    %345 = arith.addf %343, %344 : vector<8x128xf32>
    %346 = vector.extract_strided_slice %341 {offsets = [0, 0], sizes = [8, 32], strides = [1, 1]} : vector<8x128xf32> to vector<8x32xf32>
    %347 = arith.negf %346 : vector<8x32xf32>
    %348 = math.exp %347 : vector<8x32xf32>
    %cst_121 = arith.constant 1.000000e+00 : f32
    %349 = vector.broadcast %cst_121 : f32 to vector<8x32xf32>
    %350 = arith.addf %349, %348 : vector<8x32xf32>
    %351 = arith.divf %349, %350 : vector<8x32xf32>
    %352 = vector.extract_strided_slice %341 {offsets = [0, 32], sizes = [8, 32], strides = [1, 1]} : vector<8x128xf32> to vector<8x32xf32>
    %353 = arith.negf %352 : vector<8x32xf32>
    %354 = math.exp %353 : vector<8x32xf32>
    %cst_122 = arith.constant 1.000000e+00 : f32
    %355 = vector.broadcast %cst_122 : f32 to vector<8x32xf32>
    %356 = arith.addf %355, %354 : vector<8x32xf32>
    %357 = arith.divf %355, %356 : vector<8x32xf32>
    %358 = vector.extract_strided_slice %341 {offsets = [0, 64], sizes = [8, 32], strides = [1, 1]} : vector<8x128xf32> to vector<8x32xf32>
    %359 = math.tanh %358 : vector<8x32xf32>
    %360 = vector.extract_strided_slice %341 {offsets = [0, 96], sizes = [8, 32], strides = [1, 1]} : vector<8x128xf32> to vector<8x32xf32>
    %361 = arith.negf %360 : vector<8x32xf32>
    %362 = math.exp %361 : vector<8x32xf32>
    %cst_123 = arith.constant 1.000000e+00 : f32
    %363 = vector.broadcast %cst_123 : f32 to vector<8x32xf32>
    %364 = arith.addf %363, %362 : vector<8x32xf32>
    %365 = arith.divf %363, %364 : vector<8x32xf32>
    %366 = arith.mulf %357, %304 : vector<8x32xf32>
    %367 = arith.mulf %351, %359 : vector<8x32xf32>
    %368 = arith.addf %366, %367 : vector<8x32xf32>
    %369 = math.tanh %368 : vector<8x32xf32>
    %370 = arith.mulf %365, %369 : vector<8x32xf32>
    %371 = vector.extract_strided_slice %345 {offsets = [0, 0], sizes = [8, 32], strides = [1, 1]} : vector<8x128xf32> to vector<8x32xf32>
    %372 = arith.negf %371 : vector<8x32xf32>
    %373 = math.exp %372 : vector<8x32xf32>
    %cst_124 = arith.constant 1.000000e+00 : f32
    %374 = vector.broadcast %cst_124 : f32 to vector<8x32xf32>
    %375 = arith.addf %374, %373 : vector<8x32xf32>
    %376 = arith.divf %374, %375 : vector<8x32xf32>
    %377 = vector.extract_strided_slice %345 {offsets = [0, 32], sizes = [8, 32], strides = [1, 1]} : vector<8x128xf32> to vector<8x32xf32>
    %378 = arith.negf %377 : vector<8x32xf32>
    %379 = math.exp %378 : vector<8x32xf32>
    %cst_125 = arith.constant 1.000000e+00 : f32
    %380 = vector.broadcast %cst_125 : f32 to vector<8x32xf32>
    %381 = arith.addf %380, %379 : vector<8x32xf32>
    %382 = arith.divf %380, %381 : vector<8x32xf32>
    %383 = vector.extract_strided_slice %345 {offsets = [0, 64], sizes = [8, 32], strides = [1, 1]} : vector<8x128xf32> to vector<8x32xf32>
    %384 = math.tanh %383 : vector<8x32xf32>
    %385 = vector.extract_strided_slice %345 {offsets = [0, 96], sizes = [8, 32], strides = [1, 1]} : vector<8x128xf32> to vector<8x32xf32>
    %386 = arith.negf %385 : vector<8x32xf32>
    %387 = math.exp %386 : vector<8x32xf32>
    %cst_126 = arith.constant 1.000000e+00 : f32
    %388 = vector.broadcast %cst_126 : f32 to vector<8x32xf32>
    %389 = arith.addf %388, %387 : vector<8x32xf32>
    %390 = arith.divf %388, %389 : vector<8x32xf32>
    %391 = arith.mulf %382, %329 : vector<8x32xf32>
    %392 = arith.mulf %376, %384 : vector<8x32xf32>
    %393 = arith.addf %391, %392 : vector<8x32xf32>
    %394 = math.tanh %393 : vector<8x32xf32>
    %395 = arith.mulf %390, %394 : vector<8x32xf32>
    %c5_127 = arith.constant 5 : index
    %c0_128 = arith.constant 0 : index
    %c0_129 = arith.constant 0 : index
    %396 = vector.load %arg17[%c5_127, %c0_128, %c0_129] : memref<8x8x32xf32, #tpu.memory_space<vmem>>, vector<1x8x32xf32>
    %397 = vector.shape_cast %396 : vector<1x8x32xf32> to vector<8x32xf32>
    %398 = vector.shape_cast %370 : vector<8x32xf32> to vector<1x8x32xf32>
    tpu.vector_store %arg17[%c5_127, %c0_128, %c0_129], %398 {strides = array<i32>} : memref<8x8x32xf32, #tpu.memory_space<vmem>>, vector<1x8x32xf32>,
    %c2_130 = arith.constant 2 : index
    %c0_131 = arith.constant 0 : index
    %c0_132 = arith.constant 0 : index
    %399 = vector.load %arg18[%c2_130, %c0_131, %c0_132] : memref<8x8x32xf32, #tpu.memory_space<vmem>>, vector<1x8x32xf32>
    %400 = vector.shape_cast %399 : vector<1x8x32xf32> to vector<8x32xf32>
    %401 = vector.shape_cast %395 : vector<8x32xf32> to vector<1x8x32xf32>
    tpu.vector_store %arg18[%c2_130, %c0_131, %c0_132], %401 {strides = array<i32>} : memref<8x8x32xf32, #tpu.memory_space<vmem>>, vector<1x8x32xf32>,
    %c6_133 = arith.constant 6 : index
    %c0_134 = arith.constant 0 : index
    %c0_135 = arith.constant 0 : index
    %402 = vector.load %arg15[%c6_133, %c0_134, %c0_135] : memref<8x8x128xf32, #tpu.memory_space<vmem>>, vector<1x8x128xf32>
    %403 = vector.shape_cast %402 : vector<1x8x128xf32> to vector<8x128xf32>
    %cst_136 = arith.constant dense<0.000000e+00> : vector<8x128xf32>
    %404 = tpu.matmul %370, %12, %cst_136 {dimension_numbers = #tpu.dot_dimension_numbers<[1], [0], [0], [1], [0, 0, 1, 1], [], []>} : vector<8x32xf32>, vector<32x128xf32>, vector<8x128xf32> -> vector<8x128xf32>
    %405 = arith.addf %403, %404 : vector<8x128xf32>
    %c1_137 = arith.constant 1 : index
    %c0_138 = arith.constant 0 : index
    %c0_139 = arith.constant 0 : index
    %406 = vector.load %arg16[%c1_137, %c0_138, %c0_139] : memref<8x8x128xf32, #tpu.memory_space<vmem>>, vector<1x8x128xf32>
    %407 = vector.shape_cast %406 : vector<1x8x128xf32> to vector<8x128xf32>
    %cst_140 = arith.constant dense<0.000000e+00> : vector<8x128xf32>
    %408 = tpu.matmul %395, %13, %cst_140 {dimension_numbers = #tpu.dot_dimension_numbers<[1], [0], [0], [1], [0, 0, 1, 1], [], []>} : vector<8x32xf32>, vector<32x128xf32>, vector<8x128xf32> -> vector<8x128xf32>
    %409 = arith.addf %407, %408 : vector<8x128xf32>
    %410 = vector.extract_strided_slice %405 {offsets = [0, 0], sizes = [8, 32], strides = [1, 1]} : vector<8x128xf32> to vector<8x32xf32>
    %411 = arith.negf %410 : vector<8x32xf32>
    %412 = math.exp %411 : vector<8x32xf32>
    %cst_141 = arith.constant 1.000000e+00 : f32
    %413 = vector.broadcast %cst_141 : f32 to vector<8x32xf32>
    %414 = arith.addf %413, %412 : vector<8x32xf32>
    %415 = arith.divf %413, %414 : vector<8x32xf32>
    %416 = vector.extract_strided_slice %405 {offsets = [0, 32], sizes = [8, 32], strides = [1, 1]} : vector<8x128xf32> to vector<8x32xf32>
    %417 = arith.negf %416 : vector<8x32xf32>
    %418 = math.exp %417 : vector<8x32xf32>
    %cst_142 = arith.constant 1.000000e+00 : f32
    %419 = vector.broadcast %cst_142 : f32 to vector<8x32xf32>
    %420 = arith.addf %419, %418 : vector<8x32xf32>
    %421 = arith.divf %419, %420 : vector<8x32xf32>
    %422 = vector.extract_strided_slice %405 {offsets = [0, 64], sizes = [8, 32], strides = [1, 1]} : vector<8x128xf32> to vector<8x32xf32>
    %423 = math.tanh %422 : vector<8x32xf32>
    %424 = vector.extract_strided_slice %405 {offsets = [0, 96], sizes = [8, 32], strides = [1, 1]} : vector<8x128xf32> to vector<8x32xf32>
    %425 = arith.negf %424 : vector<8x32xf32>
    %426 = math.exp %425 : vector<8x32xf32>
    %cst_143 = arith.constant 1.000000e+00 : f32
    %427 = vector.broadcast %cst_143 : f32 to vector<8x32xf32>
    %428 = arith.addf %427, %426 : vector<8x32xf32>
    %429 = arith.divf %427, %428 : vector<8x32xf32>
    %430 = arith.mulf %421, %368 : vector<8x32xf32>
    %431 = arith.mulf %415, %423 : vector<8x32xf32>
    %432 = arith.addf %430, %431 : vector<8x32xf32>
    %433 = math.tanh %432 : vector<8x32xf32>
    %434 = arith.mulf %429, %433 : vector<8x32xf32>
    %435 = vector.extract_strided_slice %409 {offsets = [0, 0], sizes = [8, 32], strides = [1, 1]} : vector<8x128xf32> to vector<8x32xf32>
    %436 = arith.negf %435 : vector<8x32xf32>
    %437 = math.exp %436 : vector<8x32xf32>
    %cst_144 = arith.constant 1.000000e+00 : f32
    %438 = vector.broadcast %cst_144 : f32 to vector<8x32xf32>
    %439 = arith.addf %438, %437 : vector<8x32xf32>
    %440 = arith.divf %438, %439 : vector<8x32xf32>
    %441 = vector.extract_strided_slice %409 {offsets = [0, 32], sizes = [8, 32], strides = [1, 1]} : vector<8x128xf32> to vector<8x32xf32>
    %442 = arith.negf %441 : vector<8x32xf32>
    %443 = math.exp %442 : vector<8x32xf32>
    %cst_145 = arith.constant 1.000000e+00 : f32
    %444 = vector.broadcast %cst_145 : f32 to vector<8x32xf32>
    %445 = arith.addf %444, %443 : vector<8x32xf32>
    %446 = arith.divf %444, %445 : vector<8x32xf32>
    %447 = vector.extract_strided_slice %409 {offsets = [0, 64], sizes = [8, 32], strides = [1, 1]} : vector<8x128xf32> to vector<8x32xf32>
    %448 = math.tanh %447 : vector<8x32xf32>
    %449 = vector.extract_strided_slice %409 {offsets = [0, 96], sizes = [8, 32], strides = [1, 1]} : vector<8x128xf32> to vector<8x32xf32>
    %450 = arith.negf %449 : vector<8x32xf32>
    %451 = math.exp %450 : vector<8x32xf32>
    %cst_146 = arith.constant 1.000000e+00 : f32
    %452 = vector.broadcast %cst_146 : f32 to vector<8x32xf32>
    %453 = arith.addf %452, %451 : vector<8x32xf32>
    %454 = arith.divf %452, %453 : vector<8x32xf32>
    %455 = arith.mulf %446, %393 : vector<8x32xf32>
    %456 = arith.mulf %440, %448 : vector<8x32xf32>
    %457 = arith.addf %455, %456 : vector<8x32xf32>
    %458 = math.tanh %457 : vector<8x32xf32>
    %459 = arith.mulf %454, %458 : vector<8x32xf32>
    %c6_147 = arith.constant 6 : index
    %c0_148 = arith.constant 0 : index
    %c0_149 = arith.constant 0 : index
    %460 = vector.load %arg17[%c6_147, %c0_148, %c0_149] : memref<8x8x32xf32, #tpu.memory_space<vmem>>, vector<1x8x32xf32>
    %461 = vector.shape_cast %460 : vector<1x8x32xf32> to vector<8x32xf32>
    %462 = vector.shape_cast %434 : vector<8x32xf32> to vector<1x8x32xf32>
    tpu.vector_store %arg17[%c6_147, %c0_148, %c0_149], %462 {strides = array<i32>} : memref<8x8x32xf32, #tpu.memory_space<vmem>>, vector<1x8x32xf32>,
    %c1_150 = arith.constant 1 : index
    %c0_151 = arith.constant 0 : index
    %c0_152 = arith.constant 0 : index
    %463 = vector.load %arg18[%c1_150, %c0_151, %c0_152] : memref<8x8x32xf32, #tpu.memory_space<vmem>>, vector<1x8x32xf32>
    %464 = vector.shape_cast %463 : vector<1x8x32xf32> to vector<8x32xf32>
    %465 = vector.shape_cast %459 : vector<8x32xf32> to vector<1x8x32xf32>
    tpu.vector_store %arg18[%c1_150, %c0_151, %c0_152], %465 {strides = array<i32>} : memref<8x8x32xf32, #tpu.memory_space<vmem>>, vector<1x8x32xf32>,
    %c7_153 = arith.constant 7 : index
    %c0_154 = arith.constant 0 : index
    %c0_155 = arith.constant 0 : index
    %466 = vector.load %arg15[%c7_153, %c0_154, %c0_155] : memref<8x8x128xf32, #tpu.memory_space<vmem>>, vector<1x8x128xf32>
    %467 = vector.shape_cast %466 : vector<1x8x128xf32> to vector<8x128xf32>
    %cst_156 = arith.constant dense<0.000000e+00> : vector<8x128xf32>
    %468 = tpu.matmul %434, %12, %cst_156 {dimension_numbers = #tpu.dot_dimension_numbers<[1], [0], [0], [1], [0, 0, 1, 1], [], []>} : vector<8x32xf32>, vector<32x128xf32>, vector<8x128xf32> -> vector<8x128xf32>
    %469 = arith.addf %467, %468 : vector<8x128xf32>
    %c0_157 = arith.constant 0 : index
    %c0_158 = arith.constant 0 : index
    %c0_159 = arith.constant 0 : index
    %470 = vector.load %arg16[%c0_157, %c0_158, %c0_159] : memref<8x8x128xf32, #tpu.memory_space<vmem>>, vector<1x8x128xf32>
    %471 = vector.shape_cast %470 : vector<1x8x128xf32> to vector<8x128xf32>
    %cst_160 = arith.constant dense<0.000000e+00> : vector<8x128xf32>
    %472 = tpu.matmul %459, %13, %cst_160 {dimension_numbers = #tpu.dot_dimension_numbers<[1], [0], [0], [1], [0, 0, 1, 1], [], []>} : vector<8x32xf32>, vector<32x128xf32>, vector<8x128xf32> -> vector<8x128xf32>
    %473 = arith.addf %471, %472 : vector<8x128xf32>
    %474 = vector.extract_strided_slice %469 {offsets = [0, 0], sizes = [8, 32], strides = [1, 1]} : vector<8x128xf32> to vector<8x32xf32>
    %475 = arith.negf %474 : vector<8x32xf32>
    %476 = math.exp %475 : vector<8x32xf32>
    %cst_161 = arith.constant 1.000000e+00 : f32
    %477 = vector.broadcast %cst_161 : f32 to vector<8x32xf32>
    %478 = arith.addf %477, %476 : vector<8x32xf32>
    %479 = arith.divf %477, %478 : vector<8x32xf32>
    %480 = vector.extract_strided_slice %469 {offsets = [0, 32], sizes = [8, 32], strides = [1, 1]} : vector<8x128xf32> to vector<8x32xf32>
    %481 = arith.negf %480 : vector<8x32xf32>
    %482 = math.exp %481 : vector<8x32xf32>
    %cst_162 = arith.constant 1.000000e+00 : f32
    %483 = vector.broadcast %cst_162 : f32 to vector<8x32xf32>
    %484 = arith.addf %483, %482 : vector<8x32xf32>
    %485 = arith.divf %483, %484 : vector<8x32xf32>
    %486 = vector.extract_strided_slice %469 {offsets = [0, 64], sizes = [8, 32], strides = [1, 1]} : vector<8x128xf32> to vector<8x32xf32>
    %487 = math.tanh %486 : vector<8x32xf32>
    %488 = vector.extract_strided_slice %469 {offsets = [0, 96], sizes = [8, 32], strides = [1, 1]} : vector<8x128xf32> to vector<8x32xf32>
    %489 = arith.negf %488 : vector<8x32xf32>
    %490 = math.exp %489 : vector<8x32xf32>
    %cst_163 = arith.constant 1.000000e+00 : f32
    %491 = vector.broadcast %cst_163 : f32 to vector<8x32xf32>
    %492 = arith.addf %491, %490 : vector<8x32xf32>
    %493 = arith.divf %491, %492 : vector<8x32xf32>
    %494 = arith.mulf %485, %432 : vector<8x32xf32>
    %495 = arith.mulf %479, %487 : vector<8x32xf32>
    %496 = arith.addf %494, %495 : vector<8x32xf32>
    %497 = math.tanh %496 : vector<8x32xf32>
    %498 = arith.mulf %493, %497 : vector<8x32xf32>
    %499 = vector.extract_strided_slice %473 {offsets = [0, 0], sizes = [8, 32], strides = [1, 1]} : vector<8x128xf32> to vector<8x32xf32>
    %500 = arith.negf %499 : vector<8x32xf32>
    %501 = math.exp %500 : vector<8x32xf32>
    %cst_164 = arith.constant 1.000000e+00 : f32
    %502 = vector.broadcast %cst_164 : f32 to vector<8x32xf32>
    %503 = arith.addf %502, %501 : vector<8x32xf32>
    %504 = arith.divf %502, %503 : vector<8x32xf32>
    %505 = vector.extract_strided_slice %473 {offsets = [0, 32], sizes = [8, 32], strides = [1, 1]} : vector<8x128xf32> to vector<8x32xf32>
    %506 = arith.negf %505 : vector<8x32xf32>
    %507 = math.exp %506 : vector<8x32xf32>
    %cst_165 = arith.constant 1.000000e+00 : f32
    %508 = vector.broadcast %cst_165 : f32 to vector<8x32xf32>
    %509 = arith.addf %508, %507 : vector<8x32xf32>
    %510 = arith.divf %508, %509 : vector<8x32xf32>
    %511 = vector.extract_strided_slice %473 {offsets = [0, 64], sizes = [8, 32], strides = [1, 1]} : vector<8x128xf32> to vector<8x32xf32>
    %512 = math.tanh %511 : vector<8x32xf32>
    %513 = vector.extract_strided_slice %473 {offsets = [0, 96], sizes = [8, 32], strides = [1, 1]} : vector<8x128xf32> to vector<8x32xf32>
    %514 = arith.negf %513 : vector<8x32xf32>
    %515 = math.exp %514 : vector<8x32xf32>
    %cst_166 = arith.constant 1.000000e+00 : f32
    %516 = vector.broadcast %cst_166 : f32 to vector<8x32xf32>
    %517 = arith.addf %516, %515 : vector<8x32xf32>
    %518 = arith.divf %516, %517 : vector<8x32xf32>
    %519 = arith.mulf %510, %457 : vector<8x32xf32>
    %520 = arith.mulf %504, %512 : vector<8x32xf32>
    %521 = arith.addf %519, %520 : vector<8x32xf32>
    %522 = math.tanh %521 : vector<8x32xf32>
    %523 = arith.mulf %518, %522 : vector<8x32xf32>
    %c7_167 = arith.constant 7 : index
    %c0_168 = arith.constant 0 : index
    %c0_169 = arith.constant 0 : index
    %524 = vector.load %arg17[%c7_167, %c0_168, %c0_169] : memref<8x8x32xf32, #tpu.memory_space<vmem>>, vector<1x8x32xf32>
    %525 = vector.shape_cast %524 : vector<1x8x32xf32> to vector<8x32xf32>
    %526 = vector.shape_cast %498 : vector<8x32xf32> to vector<1x8x32xf32>
    tpu.vector_store %arg17[%c7_167, %c0_168, %c0_169], %526 {strides = array<i32>} : memref<8x8x32xf32, #tpu.memory_space<vmem>>, vector<1x8x32xf32>,
    %c0_170 = arith.constant 0 : index
    %c0_171 = arith.constant 0 : index
    %c0_172 = arith.constant 0 : index
    %527 = vector.load %arg18[%c0_170, %c0_171, %c0_172] : memref<8x8x32xf32, #tpu.memory_space<vmem>>, vector<1x8x32xf32>
    %528 = vector.shape_cast %527 : vector<1x8x32xf32> to vector<8x32xf32>
    %529 = vector.shape_cast %523 : vector<8x32xf32> to vector<1x8x32xf32>
    tpu.vector_store %arg18[%c0_170, %c0_171, %c0_172], %529 {strides = array<i32>} : memref<8x8x32xf32, #tpu.memory_space<vmem>>, vector<1x8x32xf32>,
    %c0_173 = arith.constant 0 : index
    %c0_174 = arith.constant 0 : index
    %530 = vector.load %arg6[%c0_173, %c0_174] : memref<64x256xf32, #tpu.memory_space<vmem>>, vector<64x256xf32>
    %c0_175 = arith.constant 0 : index
    %c0_176 = arith.constant 0 : index
    %c0_177 = arith.constant 0 : index
    %531 = vector.load %arg17[%c0_175, %c0_176, %c0_177] : memref<8x8x32xf32, #tpu.memory_space<vmem>>, vector<8x8x32xf32>
    %532 = vector.shape_cast %531 : vector<8x8x32xf32> to vector<64x32xf32>
    %c0_178 = arith.constant 0 : index
    %c0_179 = arith.constant 0 : index
    %c0_180 = arith.constant 0 : index
    %533 = vector.load %arg18[%c0_178, %c0_179, %c0_180] : memref<8x8x32xf32, #tpu.memory_space<vmem>>, vector<8x8x32xf32>
    %534 = vector.shape_cast %533 : vector<8x8x32xf32> to vector<64x32xf32>
    %535 = vector.extract_strided_slice %530 {offsets = [0, 0], sizes = [32, 256], strides = [1, 1]} : vector<64x256xf32> to vector<32x256xf32>
    %cst_181 = arith.constant dense<0.000000e+00> : vector<64x256xf32>
    %536 = tpu.matmul %532, %535, %cst_181 {dimension_numbers = #tpu.dot_dimension_numbers<[1], [0], [0], [1], [0, 0, 1, 1], [], []>} : vector<64x32xf32>, vector<32x256xf32>, vector<64x256xf32> -> vector<64x256xf32>
    %537 = vector.extract_strided_slice %530 {offsets = [32, 0], sizes = [32, 256], strides = [1, 1]} : vector<64x256xf32> to vector<32x256xf32>
    %cst_182 = arith.constant dense<0.000000e+00> : vector<64x256xf32>
    %538 = tpu.matmul %534, %537, %cst_182 {dimension_numbers = #tpu.dot_dimension_numbers<[1], [0], [0], [1], [0, 0, 1, 1], [], []>} : vector<64x32xf32>, vector<32x256xf32>, vector<64x256xf32> -> vector<64x256xf32>
    %539 = arith.addf %536, %538 : vector<64x256xf32>
    %c0_183 = arith.constant 0 : index
    %c0_184 = arith.constant 0 : index
    %540 = vector.load %arg9[%c0_183, %c0_184] : memref<1x256xf32, #tpu.memory_space<vmem>>, vector<1x256xf32>
    %541 = vector.broadcast %540 : vector<1x256xf32> to vector<64x256xf32>
    %542 = arith.addf %539, %541 : vector<64x256xf32>
    %543 = vector.shape_cast %542 : vector<64x256xf32> to vector<8x8x256xf32>
    %544 = vector.extract_strided_slice %543 {offsets = [0, 0, 0], sizes = [8, 8, 128], strides = [1, 1, 1]} : vector<8x8x256xf32> to vector<8x8x128xf32>
    %c0_185 = arith.constant 0 : index
    %c0_186 = arith.constant 0 : index
    %c0_187 = arith.constant 0 : index
    %545 = vector.load %arg15[%c0_185, %c0_186, %c0_187] : memref<8x8x128xf32, #tpu.memory_space<vmem>>, vector<8x8x128xf32>
    tpu.vector_store %arg15[%c0_185, %c0_186, %c0_187], %544 {strides = array<i32>} : memref<8x8x128xf32, #tpu.memory_space<vmem>>, vector<8x8x128xf32>,
    %546 = vector.extract_strided_slice %543 {offsets = [0, 0, 128], sizes = [8, 8, 128], strides = [1, 1, 1]} : vector<8x8x256xf32> to vector<8x8x128xf32>
    %c0_188 = arith.constant 0 : index
    %c0_189 = arith.constant 0 : index
    %c0_190 = arith.constant 0 : index
    %547 = vector.load %arg16[%c0_188, %c0_189, %c0_190] : memref<8x8x128xf32, #tpu.memory_space<vmem>>, vector<8x8x128xf32>
    tpu.vector_store %arg16[%c0_188, %c0_189, %c0_190], %546 {strides = array<i32>} : memref<8x8x128xf32, #tpu.memory_space<vmem>>, vector<8x8x128xf32>,
    %c0_191 = arith.constant 0 : index
    %c0_192 = arith.constant 0 : index
    %548 = vector.load %arg7[%c0_191, %c0_192] : memref<32x128xf32, #tpu.memory_space<vmem>>, vector<32x128xf32>
    %c0_193 = arith.constant 0 : index
    %c0_194 = arith.constant 0 : index
    %549 = vector.load %arg8[%c0_193, %c0_194] : memref<32x128xf32, #tpu.memory_space<vmem>>, vector<32x128xf32>
    %cst_195 = arith.constant 0.000000e+00 : f32
    %550 = vector.broadcast %cst_195 : f32 to vector<8x32xf32>
    %cst_196 = arith.constant 0.000000e+00 : f32
    %551 = vector.broadcast %cst_196 : f32 to vector<8x32xf32>
    %cst_197 = arith.constant 0.000000e+00 : f32
    %552 = vector.broadcast %cst_197 : f32 to vector<8x32xf32>
    %cst_198 = arith.constant 0.000000e+00 : f32
    %553 = vector.broadcast %cst_198 : f32 to vector<8x32xf32>
    %c0_199 = arith.constant 0 : index
    %c0_200 = arith.constant 0 : index
    %c0_201 = arith.constant 0 : index
    %554 = vector.load %arg15[%c0_199, %c0_200, %c0_201] : memref<8x8x128xf32, #tpu.memory_space<vmem>>, vector<1x8x128xf32>
    %555 = vector.shape_cast %554 : vector<1x8x128xf32> to vector<8x128xf32>
    %cst_202 = arith.constant dense<0.000000e+00> : vector<8x128xf32>
    %556 = tpu.matmul %550, %548, %cst_202 {dimension_numbers = #tpu.dot_dimension_numbers<[1], [0], [0], [1], [0, 0, 1, 1], [], []>} : vector<8x32xf32>, vector<32x128xf32>, vector<8x128xf32> -> vector<8x128xf32>
    %557 = arith.addf %555, %556 : vector<8x128xf32>
    %c7_203 = arith.constant 7 : index
    %c0_204 = arith.constant 0 : index
    %c0_205 = arith.constant 0 : index
    %558 = vector.load %arg16[%c7_203, %c0_204, %c0_205] : memref<8x8x128xf32, #tpu.memory_space<vmem>>, vector<1x8x128xf32>
    %559 = vector.shape_cast %558 : vector<1x8x128xf32> to vector<8x128xf32>
    %cst_206 = arith.constant dense<0.000000e+00> : vector<8x128xf32>
    %560 = tpu.matmul %552, %549, %cst_206 {dimension_numbers = #tpu.dot_dimension_numbers<[1], [0], [0], [1], [0, 0, 1, 1], [], []>} : vector<8x32xf32>, vector<32x128xf32>, vector<8x128xf32> -> vector<8x128xf32>
    %561 = arith.addf %559, %560 : vector<8x128xf32>
    %562 = vector.extract_strided_slice %557 {offsets = [0, 0], sizes = [8, 32], strides = [1, 1]} : vector<8x128xf32> to vector<8x32xf32>
    %563 = arith.negf %562 : vector<8x32xf32>
    %564 = math.exp %563 : vector<8x32xf32>
    %cst_207 = arith.constant 1.000000e+00 : f32
    %565 = vector.broadcast %cst_207 : f32 to vector<8x32xf32>
    %566 = arith.addf %565, %564 : vector<8x32xf32>
    %567 = arith.divf %565, %566 : vector<8x32xf32>
    %568 = vector.extract_strided_slice %557 {offsets = [0, 32], sizes = [8, 32], strides = [1, 1]} : vector<8x128xf32> to vector<8x32xf32>
    %569 = arith.negf %568 : vector<8x32xf32>
    %570 = math.exp %569 : vector<8x32xf32>
    %cst_208 = arith.constant 1.000000e+00 : f32
    %571 = vector.broadcast %cst_208 : f32 to vector<8x32xf32>
    %572 = arith.addf %571, %570 : vector<8x32xf32>
    %573 = arith.divf %571, %572 : vector<8x32xf32>
    %574 = vector.extract_strided_slice %557 {offsets = [0, 64], sizes = [8, 32], strides = [1, 1]} : vector<8x128xf32> to vector<8x32xf32>
    %575 = math.tanh %574 : vector<8x32xf32>
    %576 = vector.extract_strided_slice %557 {offsets = [0, 96], sizes = [8, 32], strides = [1, 1]} : vector<8x128xf32> to vector<8x32xf32>
    %577 = arith.negf %576 : vector<8x32xf32>
    %578 = math.exp %577 : vector<8x32xf32>
    %cst_209 = arith.constant 1.000000e+00 : f32
    %579 = vector.broadcast %cst_209 : f32 to vector<8x32xf32>
    %580 = arith.addf %579, %578 : vector<8x32xf32>
    %581 = arith.divf %579, %580 : vector<8x32xf32>
    %582 = arith.mulf %573, %551 : vector<8x32xf32>
    %583 = arith.mulf %567, %575 : vector<8x32xf32>
    %584 = arith.addf %582, %583 : vector<8x32xf32>
    %585 = math.tanh %584 : vector<8x32xf32>
    %586 = arith.mulf %581, %585 : vector<8x32xf32>
    %587 = vector.extract_strided_slice %561 {offsets = [0, 0], sizes = [8, 32], strides = [1, 1]} : vector<8x128xf32> to vector<8x32xf32>
    %588 = arith.negf %587 : vector<8x32xf32>
    %589 = math.exp %588 : vector<8x32xf32>
    %cst_210 = arith.constant 1.000000e+00 : f32
    %590 = vector.broadcast %cst_210 : f32 to vector<8x32xf32>
    %591 = arith.addf %590, %589 : vector<8x32xf32>
    %592 = arith.divf %590, %591 : vector<8x32xf32>
    %593 = vector.extract_strided_slice %561 {offsets = [0, 32], sizes = [8, 32], strides = [1, 1]} : vector<8x128xf32> to vector<8x32xf32>
    %594 = arith.negf %593 : vector<8x32xf32>
    %595 = math.exp %594 : vector<8x32xf32>
    %cst_211 = arith.constant 1.000000e+00 : f32
    %596 = vector.broadcast %cst_211 : f32 to vector<8x32xf32>
    %597 = arith.addf %596, %595 : vector<8x32xf32>
    %598 = arith.divf %596, %597 : vector<8x32xf32>
    %599 = vector.extract_strided_slice %561 {offsets = [0, 64], sizes = [8, 32], strides = [1, 1]} : vector<8x128xf32> to vector<8x32xf32>
    %600 = math.tanh %599 : vector<8x32xf32>
    %601 = vector.extract_strided_slice %561 {offsets = [0, 96], sizes = [8, 32], strides = [1, 1]} : vector<8x128xf32> to vector<8x32xf32>
    %602 = arith.negf %601 : vector<8x32xf32>
    %603 = math.exp %602 : vector<8x32xf32>
    %cst_212 = arith.constant 1.000000e+00 : f32
    %604 = vector.broadcast %cst_212 : f32 to vector<8x32xf32>
    %605 = arith.addf %604, %603 : vector<8x32xf32>
    %606 = arith.divf %604, %605 : vector<8x32xf32>
    %607 = arith.mulf %598, %553 : vector<8x32xf32>
    %608 = arith.mulf %592, %600 : vector<8x32xf32>
    %609 = arith.addf %607, %608 : vector<8x32xf32>
    %610 = math.tanh %609 : vector<8x32xf32>
    %611 = arith.mulf %606, %610 : vector<8x32xf32>
    %c0_213 = arith.constant 0 : index
    %c0_214 = arith.constant 0 : index
    %c0_215 = arith.constant 0 : index
    %612 = vector.load %arg17[%c0_213, %c0_214, %c0_215] : memref<8x8x32xf32, #tpu.memory_space<vmem>>, vector<1x8x32xf32>
    %613 = vector.shape_cast %612 : vector<1x8x32xf32> to vector<8x32xf32>
    %614 = vector.shape_cast %586 : vector<8x32xf32> to vector<1x8x32xf32>
    tpu.vector_store %arg17[%c0_213, %c0_214, %c0_215], %614 {strides = array<i32>} : memref<8x8x32xf32, #tpu.memory_space<vmem>>, vector<1x8x32xf32>,
    %c7_216 = arith.constant 7 : index
    %c0_217 = arith.constant 0 : index
    %c0_218 = arith.constant 0 : index
    %615 = vector.load %arg18[%c7_216, %c0_217, %c0_218] : memref<8x8x32xf32, #tpu.memory_space<vmem>>, vector<1x8x32xf32>
    %616 = vector.shape_cast %615 : vector<1x8x32xf32> to vector<8x32xf32>
    %617 = vector.shape_cast %611 : vector<8x32xf32> to vector<1x8x32xf32>
    tpu.vector_store %arg18[%c7_216, %c0_217, %c0_218], %617 {strides = array<i32>} : memref<8x8x32xf32, #tpu.memory_space<vmem>>, vector<1x8x32xf32>,
    %c1_219 = arith.constant 1 : index
    %c0_220 = arith.constant 0 : index
    %c0_221 = arith.constant 0 : index
    %618 = vector.load %arg15[%c1_219, %c0_220, %c0_221] : memref<8x8x128xf32, #tpu.memory_space<vmem>>, vector<1x8x128xf32>
    %619 = vector.shape_cast %618 : vector<1x8x128xf32> to vector<8x128xf32>
    %cst_222 = arith.constant dense<0.000000e+00> : vector<8x128xf32>
    %620 = tpu.matmul %586, %548, %cst_222 {dimension_numbers = #tpu.dot_dimension_numbers<[1], [0], [0], [1], [0, 0, 1, 1], [], []>} : vector<8x32xf32>, vector<32x128xf32>, vector<8x128xf32> -> vector<8x128xf32>
    %621 = arith.addf %619, %620 : vector<8x128xf32>
    %c6_223 = arith.constant 6 : index
    %c0_224 = arith.constant 0 : index
    %c0_225 = arith.constant 0 : index
    %622 = vector.load %arg16[%c6_223, %c0_224, %c0_225] : memref<8x8x128xf32, #tpu.memory_space<vmem>>, vector<1x8x128xf32>
    %623 = vector.shape_cast %622 : vector<1x8x128xf32> to vector<8x128xf32>
    %cst_226 = arith.constant dense<0.000000e+00> : vector<8x128xf32>
    %624 = tpu.matmul %611, %549, %cst_226 {dimension_numbers = #tpu.dot_dimension_numbers<[1], [0], [0], [1], [0, 0, 1, 1], [], []>} : vector<8x32xf32>, vector<32x128xf32>, vector<8x128xf32> -> vector<8x128xf32>
    %625 = arith.addf %623, %624 : vector<8x128xf32>
    %626 = vector.extract_strided_slice %621 {offsets = [0, 0], sizes = [8, 32], strides = [1, 1]} : vector<8x128xf32> to vector<8x32xf32>
    %627 = arith.negf %626 : vector<8x32xf32>
    %628 = math.exp %627 : vector<8x32xf32>
    %cst_227 = arith.constant 1.000000e+00 : f32
    %629 = vector.broadcast %cst_227 : f32 to vector<8x32xf32>
    %630 = arith.addf %629, %628 : vector<8x32xf32>
    %631 = arith.divf %629, %630 : vector<8x32xf32>
    %632 = vector.extract_strided_slice %621 {offsets = [0, 32], sizes = [8, 32], strides = [1, 1]} : vector<8x128xf32> to vector<8x32xf32>
    %633 = arith.negf %632 : vector<8x32xf32>
    %634 = math.exp %633 : vector<8x32xf32>
    %cst_228 = arith.constant 1.000000e+00 : f32
    %635 = vector.broadcast %cst_228 : f32 to vector<8x32xf32>
    %636 = arith.addf %635, %634 : vector<8x32xf32>
    %637 = arith.divf %635, %636 : vector<8x32xf32>
    %638 = vector.extract_strided_slice %621 {offsets = [0, 64], sizes = [8, 32], strides = [1, 1]} : vector<8x128xf32> to vector<8x32xf32>
    %639 = math.tanh %638 : vector<8x32xf32>
    %640 = vector.extract_strided_slice %621 {offsets = [0, 96], sizes = [8, 32], strides = [1, 1]} : vector<8x128xf32> to vector<8x32xf32>
    %641 = arith.negf %640 : vector<8x32xf32>
    %642 = math.exp %641 : vector<8x32xf32>
    %cst_229 = arith.constant 1.000000e+00 : f32
    %643 = vector.broadcast %cst_229 : f32 to vector<8x32xf32>
    %644 = arith.addf %643, %642 : vector<8x32xf32>
    %645 = arith.divf %643, %644 : vector<8x32xf32>
    %646 = arith.mulf %637, %584 : vector<8x32xf32>
    %647 = arith.mulf %631, %639 : vector<8x32xf32>
    %648 = arith.addf %646, %647 : vector<8x32xf32>
    %649 = math.tanh %648 : vector<8x32xf32>
    %650 = arith.mulf %645, %649 : vector<8x32xf32>
    %651 = vector.extract_strided_slice %625 {offsets = [0, 0], sizes = [8, 32], strides = [1, 1]} : vector<8x128xf32> to vector<8x32xf32>
    %652 = arith.negf %651 : vector<8x32xf32>
    %653 = math.exp %652 : vector<8x32xf32>
    %cst_230 = arith.constant 1.000000e+00 : f32
    %654 = vector.broadcast %cst_230 : f32 to vector<8x32xf32>
    %655 = arith.addf %654, %653 : vector<8x32xf32>
    %656 = arith.divf %654, %655 : vector<8x32xf32>
    %657 = vector.extract_strided_slice %625 {offsets = [0, 32], sizes = [8, 32], strides = [1, 1]} : vector<8x128xf32> to vector<8x32xf32>
    %658 = arith.negf %657 : vector<8x32xf32>
    %659 = math.exp %658 : vector<8x32xf32>
    %cst_231 = arith.constant 1.000000e+00 : f32
    %660 = vector.broadcast %cst_231 : f32 to vector<8x32xf32>
    %661 = arith.addf %660, %659 : vector<8x32xf32>
    %662 = arith.divf %660, %661 : vector<8x32xf32>
    %663 = vector.extract_strided_slice %625 {offsets = [0, 64], sizes = [8, 32], strides = [1, 1]} : vector<8x128xf32> to vector<8x32xf32>
    %664 = math.tanh %663 : vector<8x32xf32>
    %665 = vector.extract_strided_slice %625 {offsets = [0, 96], sizes = [8, 32], strides = [1, 1]} : vector<8x128xf32> to vector<8x32xf32>
    %666 = arith.negf %665 : vector<8x32xf32>
    %667 = math.exp %666 : vector<8x32xf32>
    %cst_232 = arith.constant 1.000000e+00 : f32
    %668 = vector.broadcast %cst_232 : f32 to vector<8x32xf32>
    %669 = arith.addf %668, %667 : vector<8x32xf32>
    %670 = arith.divf %668, %669 : vector<8x32xf32>
    %671 = arith.mulf %662, %609 : vector<8x32xf32>
    %672 = arith.mulf %656, %664 : vector<8x32xf32>
    %673 = arith.addf %671, %672 : vector<8x32xf32>
    %674 = math.tanh %673 : vector<8x32xf32>
    %675 = arith.mulf %670, %674 : vector<8x32xf32>
    %c1_233 = arith.constant 1 : index
    %c0_234 = arith.constant 0 : index
    %c0_235 = arith.constant 0 : index
    %676 = vector.load %arg17[%c1_233, %c0_234, %c0_235] : memref<8x8x32xf32, #tpu.memory_space<vmem>>, vector<1x8x32xf32>
    %677 = vector.shape_cast %676 : vector<1x8x32xf32> to vector<8x32xf32>
    %678 = vector.shape_cast %650 : vector<8x32xf32> to vector<1x8x32xf32>
    tpu.vector_store %arg17[%c1_233, %c0_234, %c0_235], %678 {strides = array<i32>} : memref<8x8x32xf32, #tpu.memory_space<vmem>>, vector<1x8x32xf32>,
    %c6_236 = arith.constant 6 : index
    %c0_237 = arith.constant 0 : index
    %c0_238 = arith.constant 0 : index
    %679 = vector.load %arg18[%c6_236, %c0_237, %c0_238] : memref<8x8x32xf32, #tpu.memory_space<vmem>>, vector<1x8x32xf32>
    %680 = vector.shape_cast %679 : vector<1x8x32xf32> to vector<8x32xf32>
    %681 = vector.shape_cast %675 : vector<8x32xf32> to vector<1x8x32xf32>
    tpu.vector_store %arg18[%c6_236, %c0_237, %c0_238], %681 {strides = array<i32>} : memref<8x8x32xf32, #tpu.memory_space<vmem>>, vector<1x8x32xf32>,
    %c2_239 = arith.constant 2 : index
    %c0_240 = arith.constant 0 : index
    %c0_241 = arith.constant 0 : index
    %682 = vector.load %arg15[%c2_239, %c0_240, %c0_241] : memref<8x8x128xf32, #tpu.memory_space<vmem>>, vector<1x8x128xf32>
    %683 = vector.shape_cast %682 : vector<1x8x128xf32> to vector<8x128xf32>
    %cst_242 = arith.constant dense<0.000000e+00> : vector<8x128xf32>
    %684 = tpu.matmul %650, %548, %cst_242 {dimension_numbers = #tpu.dot_dimension_numbers<[1], [0], [0], [1], [0, 0, 1, 1], [], []>} : vector<8x32xf32>, vector<32x128xf32>, vector<8x128xf32> -> vector<8x128xf32>
    %685 = arith.addf %683, %684 : vector<8x128xf32>
    %c5_243 = arith.constant 5 : index
    %c0_244 = arith.constant 0 : index
    %c0_245 = arith.constant 0 : index
    %686 = vector.load %arg16[%c5_243, %c0_244, %c0_245] : memref<8x8x128xf32, #tpu.memory_space<vmem>>, vector<1x8x128xf32>
    %687 = vector.shape_cast %686 : vector<1x8x128xf32> to vector<8x128xf32>
    %cst_246 = arith.constant dense<0.000000e+00> : vector<8x128xf32>
    %688 = tpu.matmul %675, %549, %cst_246 {dimension_numbers = #tpu.dot_dimension_numbers<[1], [0], [0], [1], [0, 0, 1, 1], [], []>} : vector<8x32xf32>, vector<32x128xf32>, vector<8x128xf32> -> vector<8x128xf32>
    %689 = arith.addf %687, %688 : vector<8x128xf32>
    %690 = vector.extract_strided_slice %685 {offsets = [0, 0], sizes = [8, 32], strides = [1, 1]} : vector<8x128xf32> to vector<8x32xf32>
    %691 = arith.negf %690 : vector<8x32xf32>
    %692 = math.exp %691 : vector<8x32xf32>
    %cst_247 = arith.constant 1.000000e+00 : f32
    %693 = vector.broadcast %cst_247 : f32 to vector<8x32xf32>
    %694 = arith.addf %693, %692 : vector<8x32xf32>
    %695 = arith.divf %693, %694 : vector<8x32xf32>
    %696 = vector.extract_strided_slice %685 {offsets = [0, 32], sizes = [8, 32], strides = [1, 1]} : vector<8x128xf32> to vector<8x32xf32>
    %697 = arith.negf %696 : vector<8x32xf32>
    %698 = math.exp %697 : vector<8x32xf32>
    %cst_248 = arith.constant 1.000000e+00 : f32
    %699 = vector.broadcast %cst_248 : f32 to vector<8x32xf32>
    %700 = arith.addf %699, %698 : vector<8x32xf32>
    %701 = arith.divf %699, %700 : vector<8x32xf32>
    %702 = vector.extract_strided_slice %685 {offsets = [0, 64], sizes = [8, 32], strides = [1, 1]} : vector<8x128xf32> to vector<8x32xf32>
    %703 = math.tanh %702 : vector<8x32xf32>
    %704 = vector.extract_strided_slice %685 {offsets = [0, 96], sizes = [8, 32], strides = [1, 1]} : vector<8x128xf32> to vector<8x32xf32>
    %705 = arith.negf %704 : vector<8x32xf32>
    %706 = math.exp %705 : vector<8x32xf32>
    %cst_249 = arith.constant 1.000000e+00 : f32
    %707 = vector.broadcast %cst_249 : f32 to vector<8x32xf32>
    %708 = arith.addf %707, %706 : vector<8x32xf32>
    %709 = arith.divf %707, %708 : vector<8x32xf32>
    %710 = arith.mulf %701, %648 : vector<8x32xf32>
    %711 = arith.mulf %695, %703 : vector<8x32xf32>
    %712 = arith.addf %710, %711 : vector<8x32xf32>
    %713 = math.tanh %712 : vector<8x32xf32>
    %714 = arith.mulf %709, %713 : vector<8x32xf32>
    %715 = vector.extract_strided_slice %689 {offsets = [0, 0], sizes = [8, 32], strides = [1, 1]} : vector<8x128xf32> to vector<8x32xf32>
    %716 = arith.negf %715 : vector<8x32xf32>
    %717 = math.exp %716 : vector<8x32xf32>
    %cst_250 = arith.constant 1.000000e+00 : f32
    %718 = vector.broadcast %cst_250 : f32 to vector<8x32xf32>
    %719 = arith.addf %718, %717 : vector<8x32xf32>
    %720 = arith.divf %718, %719 : vector<8x32xf32>
    %721 = vector.extract_strided_slice %689 {offsets = [0, 32], sizes = [8, 32], strides = [1, 1]} : vector<8x128xf32> to vector<8x32xf32>
    %722 = arith.negf %721 : vector<8x32xf32>
    %723 = math.exp %722 : vector<8x32xf32>
    %cst_251 = arith.constant 1.000000e+00 : f32
    %724 = vector.broadcast %cst_251 : f32 to vector<8x32xf32>
    %725 = arith.addf %724, %723 : vector<8x32xf32>
    %726 = arith.divf %724, %725 : vector<8x32xf32>
    %727 = vector.extract_strided_slice %689 {offsets = [0, 64], sizes = [8, 32], strides = [1, 1]} : vector<8x128xf32> to vector<8x32xf32>
    %728 = math.tanh %727 : vector<8x32xf32>
    %729 = vector.extract_strided_slice %689 {offsets = [0, 96], sizes = [8, 32], strides = [1, 1]} : vector<8x128xf32> to vector<8x32xf32>
    %730 = arith.negf %729 : vector<8x32xf32>
    %731 = math.exp %730 : vector<8x32xf32>
    %cst_252 = arith.constant 1.000000e+00 : f32
    %732 = vector.broadcast %cst_252 : f32 to vector<8x32xf32>
    %733 = arith.addf %732, %731 : vector<8x32xf32>
    %734 = arith.divf %732, %733 : vector<8x32xf32>
    %735 = arith.mulf %726, %673 : vector<8x32xf32>
    %736 = arith.mulf %720, %728 : vector<8x32xf32>
    %737 = arith.addf %735, %736 : vector<8x32xf32>
    %738 = math.tanh %737 : vector<8x32xf32>
    %739 = arith.mulf %734, %738 : vector<8x32xf32>
    %c2_253 = arith.constant 2 : index
    %c0_254 = arith.constant 0 : index
    %c0_255 = arith.constant 0 : index
    %740 = vector.load %arg17[%c2_253, %c0_254, %c0_255] : memref<8x8x32xf32, #tpu.memory_space<vmem>>, vector<1x8x32xf32>
    %741 = vector.shape_cast %740 : vector<1x8x32xf32> to vector<8x32xf32>
    %742 = vector.shape_cast %714 : vector<8x32xf32> to vector<1x8x32xf32>
    tpu.vector_store %arg17[%c2_253, %c0_254, %c0_255], %742 {strides = array<i32>} : memref<8x8x32xf32, #tpu.memory_space<vmem>>, vector<1x8x32xf32>,
    %c5_256 = arith.constant 5 : index
    %c0_257 = arith.constant 0 : index
    %c0_258 = arith.constant 0 : index
    %743 = vector.load %arg18[%c5_256, %c0_257, %c0_258] : memref<8x8x32xf32, #tpu.memory_space<vmem>>, vector<1x8x32xf32>
    %744 = vector.shape_cast %743 : vector<1x8x32xf32> to vector<8x32xf32>
    %745 = vector.shape_cast %739 : vector<8x32xf32> to vector<1x8x32xf32>
    tpu.vector_store %arg18[%c5_256, %c0_257, %c0_258], %745 {strides = array<i32>} : memref<8x8x32xf32, #tpu.memory_space<vmem>>, vector<1x8x32xf32>,
    %c3_259 = arith.constant 3 : index
    %c0_260 = arith.constant 0 : index
    %c0_261 = arith.constant 0 : index
    %746 = vector.load %arg15[%c3_259, %c0_260, %c0_261] : memref<8x8x128xf32, #tpu.memory_space<vmem>>, vector<1x8x128xf32>
    %747 = vector.shape_cast %746 : vector<1x8x128xf32> to vector<8x128xf32>
    %cst_262 = arith.constant dense<0.000000e+00> : vector<8x128xf32>
    %748 = tpu.matmul %714, %548, %cst_262 {dimension_numbers = #tpu.dot_dimension_numbers<[1], [0], [0], [1], [0, 0, 1, 1], [], []>} : vector<8x32xf32>, vector<32x128xf32>, vector<8x128xf32> -> vector<8x128xf32>
    %749 = arith.addf %747, %748 : vector<8x128xf32>
    %c4_263 = arith.constant 4 : index
    %c0_264 = arith.constant 0 : index
    %c0_265 = arith.constant 0 : index
    %750 = vector.load %arg16[%c4_263, %c0_264, %c0_265] : memref<8x8x128xf32, #tpu.memory_space<vmem>>, vector<1x8x128xf32>
    %751 = vector.shape_cast %750 : vector<1x8x128xf32> to vector<8x128xf32>
    %cst_266 = arith.constant dense<0.000000e+00> : vector<8x128xf32>
    %752 = tpu.matmul %739, %549, %cst_266 {dimension_numbers = #tpu.dot_dimension_numbers<[1], [0], [0], [1], [0, 0, 1, 1], [], []>} : vector<8x32xf32>, vector<32x128xf32>, vector<8x128xf32> -> vector<8x128xf32>
    %753 = arith.addf %751, %752 : vector<8x128xf32>
    %754 = vector.extract_strided_slice %749 {offsets = [0, 0], sizes = [8, 32], strides = [1, 1]} : vector<8x128xf32> to vector<8x32xf32>
    %755 = arith.negf %754 : vector<8x32xf32>
    %756 = math.exp %755 : vector<8x32xf32>
    %cst_267 = arith.constant 1.000000e+00 : f32
    %757 = vector.broadcast %cst_267 : f32 to vector<8x32xf32>
    %758 = arith.addf %757, %756 : vector<8x32xf32>
    %759 = arith.divf %757, %758 : vector<8x32xf32>
    %760 = vector.extract_strided_slice %749 {offsets = [0, 32], sizes = [8, 32], strides = [1, 1]} : vector<8x128xf32> to vector<8x32xf32>
    %761 = arith.negf %760 : vector<8x32xf32>
    %762 = math.exp %761 : vector<8x32xf32>
    %cst_268 = arith.constant 1.000000e+00 : f32
    %763 = vector.broadcast %cst_268 : f32 to vector<8x32xf32>
    %764 = arith.addf %763, %762 : vector<8x32xf32>
    %765 = arith.divf %763, %764 : vector<8x32xf32>
    %766 = vector.extract_strided_slice %749 {offsets = [0, 64], sizes = [8, 32], strides = [1, 1]} : vector<8x128xf32> to vector<8x32xf32>
    %767 = math.tanh %766 : vector<8x32xf32>
    %768 = vector.extract_strided_slice %749 {offsets = [0, 96], sizes = [8, 32], strides = [1, 1]} : vector<8x128xf32> to vector<8x32xf32>
    %769 = arith.negf %768 : vector<8x32xf32>
    %770 = math.exp %769 : vector<8x32xf32>
    %cst_269 = arith.constant 1.000000e+00 : f32
    %771 = vector.broadcast %cst_269 : f32 to vector<8x32xf32>
    %772 = arith.addf %771, %770 : vector<8x32xf32>
    %773 = arith.divf %771, %772 : vector<8x32xf32>
    %774 = arith.mulf %765, %712 : vector<8x32xf32>
    %775 = arith.mulf %759, %767 : vector<8x32xf32>
    %776 = arith.addf %774, %775 : vector<8x32xf32>
    %777 = math.tanh %776 : vector<8x32xf32>
    %778 = arith.mulf %773, %777 : vector<8x32xf32>
    %779 = vector.extract_strided_slice %753 {offsets = [0, 0], sizes = [8, 32], strides = [1, 1]} : vector<8x128xf32> to vector<8x32xf32>
    %780 = arith.negf %779 : vector<8x32xf32>
    %781 = math.exp %780 : vector<8x32xf32>
    %cst_270 = arith.constant 1.000000e+00 : f32
    %782 = vector.broadcast %cst_270 : f32 to vector<8x32xf32>
    %783 = arith.addf %782, %781 : vector<8x32xf32>
    %784 = arith.divf %782, %783 : vector<8x32xf32>
    %785 = vector.extract_strided_slice %753 {offsets = [0, 32], sizes = [8, 32], strides = [1, 1]} : vector<8x128xf32> to vector<8x32xf32>
    %786 = arith.negf %785 : vector<8x32xf32>
    %787 = math.exp %786 : vector<8x32xf32>
    %cst_271 = arith.constant 1.000000e+00 : f32
    %788 = vector.broadcast %cst_271 : f32 to vector<8x32xf32>
    %789 = arith.addf %788, %787 : vector<8x32xf32>
    %790 = arith.divf %788, %789 : vector<8x32xf32>
    %791 = vector.extract_strided_slice %753 {offsets = [0, 64], sizes = [8, 32], strides = [1, 1]} : vector<8x128xf32> to vector<8x32xf32>
    %792 = math.tanh %791 : vector<8x32xf32>
    %793 = vector.extract_strided_slice %753 {offsets = [0, 96], sizes = [8, 32], strides = [1, 1]} : vector<8x128xf32> to vector<8x32xf32>
    %794 = arith.negf %793 : vector<8x32xf32>
    %795 = math.exp %794 : vector<8x32xf32>
    %cst_272 = arith.constant 1.000000e+00 : f32
    %796 = vector.broadcast %cst_272 : f32 to vector<8x32xf32>
    %797 = arith.addf %796, %795 : vector<8x32xf32>
    %798 = arith.divf %796, %797 : vector<8x32xf32>
    %799 = arith.mulf %790, %737 : vector<8x32xf32>
    %800 = arith.mulf %784, %792 : vector<8x32xf32>
    %801 = arith.addf %799, %800 : vector<8x32xf32>
    %802 = math.tanh %801 : vector<8x32xf32>
    %803 = arith.mulf %798, %802 : vector<8x32xf32>
    %c3_273 = arith.constant 3 : index
    %c0_274 = arith.constant 0 : index
    %c0_275 = arith.constant 0 : index
    %804 = vector.load %arg17[%c3_273, %c0_274, %c0_275] : memref<8x8x32xf32, #tpu.memory_space<vmem>>, vector<1x8x32xf32>
    %805 = vector.shape_cast %804 : vector<1x8x32xf32> to vector<8x32xf32>
    %806 = vector.shape_cast %778 : vector<8x32xf32> to vector<1x8x32xf32>
    tpu.vector_store %arg17[%c3_273, %c0_274, %c0_275], %806 {strides = array<i32>} : memref<8x8x32xf32, #tpu.memory_space<vmem>>, vector<1x8x32xf32>,
    %c4_276 = arith.constant 4 : index
    %c0_277 = arith.constant 0 : index
    %c0_278 = arith.constant 0 : index
    %807 = vector.load %arg18[%c4_276, %c0_277, %c0_278] : memref<8x8x32xf32, #tpu.memory_space<vmem>>, vector<1x8x32xf32>
    %808 = vector.shape_cast %807 : vector<1x8x32xf32> to vector<8x32xf32>
    %809 = vector.shape_cast %803 : vector<8x32xf32> to vector<1x8x32xf32>
    tpu.vector_store %arg18[%c4_276, %c0_277, %c0_278], %809 {strides = array<i32>} : memref<8x8x32xf32, #tpu.memory_space<vmem>>, vector<1x8x32xf32>,
    %c4_279 = arith.constant 4 : index
    %c0_280 = arith.constant 0 : index
    %c0_281 = arith.constant 0 : index
    %810 = vector.load %arg15[%c4_279, %c0_280, %c0_281] : memref<8x8x128xf32, #tpu.memory_space<vmem>>, vector<1x8x128xf32>
    %811 = vector.shape_cast %810 : vector<1x8x128xf32> to vector<8x128xf32>
    %cst_282 = arith.constant dense<0.000000e+00> : vector<8x128xf32>
    %812 = tpu.matmul %778, %548, %cst_282 {dimension_numbers = #tpu.dot_dimension_numbers<[1], [0], [0], [1], [0, 0, 1, 1], [], []>} : vector<8x32xf32>, vector<32x128xf32>, vector<8x128xf32> -> vector<8x128xf32>
    %813 = arith.addf %811, %812 : vector<8x128xf32>
    %c3_283 = arith.constant 3 : index
    %c0_284 = arith.constant 0 : index
    %c0_285 = arith.constant 0 : index
    %814 = vector.load %arg16[%c3_283, %c0_284, %c0_285] : memref<8x8x128xf32, #tpu.memory_space<vmem>>, vector<1x8x128xf32>
    %815 = vector.shape_cast %814 : vector<1x8x128xf32> to vector<8x128xf32>
    %cst_286 = arith.constant dense<0.000000e+00> : vector<8x128xf32>
    %816 = tpu.matmul %803, %549, %cst_286 {dimension_numbers = #tpu.dot_dimension_numbers<[1], [0], [0], [1], [0, 0, 1, 1], [], []>} : vector<8x32xf32>, vector<32x128xf32>, vector<8x128xf32> -> vector<8x128xf32>
    %817 = arith.addf %815, %816 : vector<8x128xf32>
    %818 = vector.extract_strided_slice %813 {offsets = [0, 0], sizes = [8, 32], strides = [1, 1]} : vector<8x128xf32> to vector<8x32xf32>
    %819 = arith.negf %818 : vector<8x32xf32>
    %820 = math.exp %819 : vector<8x32xf32>
    %cst_287 = arith.constant 1.000000e+00 : f32
    %821 = vector.broadcast %cst_287 : f32 to vector<8x32xf32>
    %822 = arith.addf %821, %820 : vector<8x32xf32>
    %823 = arith.divf %821, %822 : vector<8x32xf32>
    %824 = vector.extract_strided_slice %813 {offsets = [0, 32], sizes = [8, 32], strides = [1, 1]} : vector<8x128xf32> to vector<8x32xf32>
    %825 = arith.negf %824 : vector<8x32xf32>
    %826 = math.exp %825 : vector<8x32xf32>
    %cst_288 = arith.constant 1.000000e+00 : f32
    %827 = vector.broadcast %cst_288 : f32 to vector<8x32xf32>
    %828 = arith.addf %827, %826 : vector<8x32xf32>
    %829 = arith.divf %827, %828 : vector<8x32xf32>
    %830 = vector.extract_strided_slice %813 {offsets = [0, 64], sizes = [8, 32], strides = [1, 1]} : vector<8x128xf32> to vector<8x32xf32>
    %831 = math.tanh %830 : vector<8x32xf32>
    %832 = vector.extract_strided_slice %813 {offsets = [0, 96], sizes = [8, 32], strides = [1, 1]} : vector<8x128xf32> to vector<8x32xf32>
    %833 = arith.negf %832 : vector<8x32xf32>
    %834 = math.exp %833 : vector<8x32xf32>
    %cst_289 = arith.constant 1.000000e+00 : f32
    %835 = vector.broadcast %cst_289 : f32 to vector<8x32xf32>
    %836 = arith.addf %835, %834 : vector<8x32xf32>
    %837 = arith.divf %835, %836 : vector<8x32xf32>
    %838 = arith.mulf %829, %776 : vector<8x32xf32>
    %839 = arith.mulf %823, %831 : vector<8x32xf32>
    %840 = arith.addf %838, %839 : vector<8x32xf32>
    %841 = math.tanh %840 : vector<8x32xf32>
    %842 = arith.mulf %837, %841 : vector<8x32xf32>
    %843 = vector.extract_strided_slice %817 {offsets = [0, 0], sizes = [8, 32], strides = [1, 1]} : vector<8x128xf32> to vector<8x32xf32>
    %844 = arith.negf %843 : vector<8x32xf32>
    %845 = math.exp %844 : vector<8x32xf32>
    %cst_290 = arith.constant 1.000000e+00 : f32
    %846 = vector.broadcast %cst_290 : f32 to vector<8x32xf32>
    %847 = arith.addf %846, %845 : vector<8x32xf32>
    %848 = arith.divf %846, %847 : vector<8x32xf32>
    %849 = vector.extract_strided_slice %817 {offsets = [0, 32], sizes = [8, 32], strides = [1, 1]} : vector<8x128xf32> to vector<8x32xf32>
    %850 = arith.negf %849 : vector<8x32xf32>
    %851 = math.exp %850 : vector<8x32xf32>
    %cst_291 = arith.constant 1.000000e+00 : f32
    %852 = vector.broadcast %cst_291 : f32 to vector<8x32xf32>
    %853 = arith.addf %852, %851 : vector<8x32xf32>
    %854 = arith.divf %852, %853 : vector<8x32xf32>
    %855 = vector.extract_strided_slice %817 {offsets = [0, 64], sizes = [8, 32], strides = [1, 1]} : vector<8x128xf32> to vector<8x32xf32>
    %856 = math.tanh %855 : vector<8x32xf32>
    %857 = vector.extract_strided_slice %817 {offsets = [0, 96], sizes = [8, 32], strides = [1, 1]} : vector<8x128xf32> to vector<8x32xf32>
    %858 = arith.negf %857 : vector<8x32xf32>
    %859 = math.exp %858 : vector<8x32xf32>
    %cst_292 = arith.constant 1.000000e+00 : f32
    %860 = vector.broadcast %cst_292 : f32 to vector<8x32xf32>
    %861 = arith.addf %860, %859 : vector<8x32xf32>
    %862 = arith.divf %860, %861 : vector<8x32xf32>
    %863 = arith.mulf %854, %801 : vector<8x32xf32>
    %864 = arith.mulf %848, %856 : vector<8x32xf32>
    %865 = arith.addf %863, %864 : vector<8x32xf32>
    %866 = math.tanh %865 : vector<8x32xf32>
    %867 = arith.mulf %862, %866 : vector<8x32xf32>
    %c4_293 = arith.constant 4 : index
    %c0_294 = arith.constant 0 : index
    %c0_295 = arith.constant 0 : index
    %868 = vector.load %arg17[%c4_293, %c0_294, %c0_295] : memref<8x8x32xf32, #tpu.memory_space<vmem>>, vector<1x8x32xf32>
    %869 = vector.shape_cast %868 : vector<1x8x32xf32> to vector<8x32xf32>
    %870 = vector.shape_cast %842 : vector<8x32xf32> to vector<1x8x32xf32>
    tpu.vector_store %arg17[%c4_293, %c0_294, %c0_295], %870 {strides = array<i32>} : memref<8x8x32xf32, #tpu.memory_space<vmem>>, vector<1x8x32xf32>,
    %c3_296 = arith.constant 3 : index
    %c0_297 = arith.constant 0 : index
    %c0_298 = arith.constant 0 : index
    %871 = vector.load %arg18[%c3_296, %c0_297, %c0_298] : memref<8x8x32xf32, #tpu.memory_space<vmem>>, vector<1x8x32xf32>
    %872 = vector.shape_cast %871 : vector<1x8x32xf32> to vector<8x32xf32>
    %873 = vector.shape_cast %867 : vector<8x32xf32> to vector<1x8x32xf32>
    tpu.vector_store %arg18[%c3_296, %c0_297, %c0_298], %873 {strides = array<i32>} : memref<8x8x32xf32, #tpu.memory_space<vmem>>, vector<1x8x32xf32>,
    %c5_299 = arith.constant 5 : index
    %c0_300 = arith.constant 0 : index
    %c0_301 = arith.constant 0 : index
    %874 = vector.load %arg15[%c5_299, %c0_300, %c0_301] : memref<8x8x128xf32, #tpu.memory_space<vmem>>, vector<1x8x128xf32>
    %875 = vector.shape_cast %874 : vector<1x8x128xf32> to vector<8x128xf32>
    %cst_302 = arith.constant dense<0.000000e+00> : vector<8x128xf32>
    %876 = tpu.matmul %842, %548, %cst_302 {dimension_numbers = #tpu.dot_dimension_numbers<[1], [0], [0], [1], [0, 0, 1, 1], [], []>} : vector<8x32xf32>, vector<32x128xf32>, vector<8x128xf32> -> vector<8x128xf32>
    %877 = arith.addf %875, %876 : vector<8x128xf32>
    %c2_303 = arith.constant 2 : index
    %c0_304 = arith.constant 0 : index
    %c0_305 = arith.constant 0 : index
    %878 = vector.load %arg16[%c2_303, %c0_304, %c0_305] : memref<8x8x128xf32, #tpu.memory_space<vmem>>, vector<1x8x128xf32>
    %879 = vector.shape_cast %878 : vector<1x8x128xf32> to vector<8x128xf32>
    %cst_306 = arith.constant dense<0.000000e+00> : vector<8x128xf32>
    %880 = tpu.matmul %867, %549, %cst_306 {dimension_numbers = #tpu.dot_dimension_numbers<[1], [0], [0], [1], [0, 0, 1, 1], [], []>} : vector<8x32xf32>, vector<32x128xf32>, vector<8x128xf32> -> vector<8x128xf32>
    %881 = arith.addf %879, %880 : vector<8x128xf32>
    %882 = vector.extract_strided_slice %877 {offsets = [0, 0], sizes = [8, 32], strides = [1, 1]} : vector<8x128xf32> to vector<8x32xf32>
    %883 = arith.negf %882 : vector<8x32xf32>
    %884 = math.exp %883 : vector<8x32xf32>
    %cst_307 = arith.constant 1.000000e+00 : f32
    %885 = vector.broadcast %cst_307 : f32 to vector<8x32xf32>
    %886 = arith.addf %885, %884 : vector<8x32xf32>
    %887 = arith.divf %885, %886 : vector<8x32xf32>
    %888 = vector.extract_strided_slice %877 {offsets = [0, 32], sizes = [8, 32], strides = [1, 1]} : vector<8x128xf32> to vector<8x32xf32>
    %889 = arith.negf %888 : vector<8x32xf32>
    %890 = math.exp %889 : vector<8x32xf32>
    %cst_308 = arith.constant 1.000000e+00 : f32
    %891 = vector.broadcast %cst_308 : f32 to vector<8x32xf32>
    %892 = arith.addf %891, %890 : vector<8x32xf32>
    %893 = arith.divf %891, %892 : vector<8x32xf32>
    %894 = vector.extract_strided_slice %877 {offsets = [0, 64], sizes = [8, 32], strides = [1, 1]} : vector<8x128xf32> to vector<8x32xf32>
    %895 = math.tanh %894 : vector<8x32xf32>
    %896 = vector.extract_strided_slice %877 {offsets = [0, 96], sizes = [8, 32], strides = [1, 1]} : vector<8x128xf32> to vector<8x32xf32>
    %897 = arith.negf %896 : vector<8x32xf32>
    %898 = math.exp %897 : vector<8x32xf32>
    %cst_309 = arith.constant 1.000000e+00 : f32
    %899 = vector.broadcast %cst_309 : f32 to vector<8x32xf32>
    %900 = arith.addf %899, %898 : vector<8x32xf32>
    %901 = arith.divf %899, %900 : vector<8x32xf32>
    %902 = arith.mulf %893, %840 : vector<8x32xf32>
    %903 = arith.mulf %887, %895 : vector<8x32xf32>
    %904 = arith.addf %902, %903 : vector<8x32xf32>
    %905 = math.tanh %904 : vector<8x32xf32>
    %906 = arith.mulf %901, %905 : vector<8x32xf32>
    %907 = vector.extract_strided_slice %881 {offsets = [0, 0], sizes = [8, 32], strides = [1, 1]} : vector<8x128xf32> to vector<8x32xf32>
    %908 = arith.negf %907 : vector<8x32xf32>
    %909 = math.exp %908 : vector<8x32xf32>
    %cst_310 = arith.constant 1.000000e+00 : f32
    %910 = vector.broadcast %cst_310 : f32 to vector<8x32xf32>
    %911 = arith.addf %910, %909 : vector<8x32xf32>
    %912 = arith.divf %910, %911 : vector<8x32xf32>
    %913 = vector.extract_strided_slice %881 {offsets = [0, 32], sizes = [8, 32], strides = [1, 1]} : vector<8x128xf32> to vector<8x32xf32>
    %914 = arith.negf %913 : vector<8x32xf32>
    %915 = math.exp %914 : vector<8x32xf32>
    %cst_311 = arith.constant 1.000000e+00 : f32
    %916 = vector.broadcast %cst_311 : f32 to vector<8x32xf32>
    %917 = arith.addf %916, %915 : vector<8x32xf32>
    %918 = arith.divf %916, %917 : vector<8x32xf32>
    %919 = vector.extract_strided_slice %881 {offsets = [0, 64], sizes = [8, 32], strides = [1, 1]} : vector<8x128xf32> to vector<8x32xf32>
    %920 = math.tanh %919 : vector<8x32xf32>
    %921 = vector.extract_strided_slice %881 {offsets = [0, 96], sizes = [8, 32], strides = [1, 1]} : vector<8x128xf32> to vector<8x32xf32>
    %922 = arith.negf %921 : vector<8x32xf32>
    %923 = math.exp %922 : vector<8x32xf32>
    %cst_312 = arith.constant 1.000000e+00 : f32
    %924 = vector.broadcast %cst_312 : f32 to vector<8x32xf32>
    %925 = arith.addf %924, %923 : vector<8x32xf32>
    %926 = arith.divf %924, %925 : vector<8x32xf32>
    %927 = arith.mulf %918, %865 : vector<8x32xf32>
    %928 = arith.mulf %912, %920 : vector<8x32xf32>
    %929 = arith.addf %927, %928 : vector<8x32xf32>
    %930 = math.tanh %929 : vector<8x32xf32>
    %931 = arith.mulf %926, %930 : vector<8x32xf32>
    %c5_313 = arith.constant 5 : index
    %c0_314 = arith.constant 0 : index
    %c0_315 = arith.constant 0 : index
    %932 = vector.load %arg17[%c5_313, %c0_314, %c0_315] : memref<8x8x32xf32, #tpu.memory_space<vmem>>, vector<1x8x32xf32>
    %933 = vector.shape_cast %932 : vector<1x8x32xf32> to vector<8x32xf32>
    %934 = vector.shape_cast %906 : vector<8x32xf32> to vector<1x8x32xf32>
    tpu.vector_store %arg17[%c5_313, %c0_314, %c0_315], %934 {strides = array<i32>} : memref<8x8x32xf32, #tpu.memory_space<vmem>>, vector<1x8x32xf32>,
    %c2_316 = arith.constant 2 : index
    %c0_317 = arith.constant 0 : index
    %c0_318 = arith.constant 0 : index
    %935 = vector.load %arg18[%c2_316, %c0_317, %c0_318] : memref<8x8x32xf32, #tpu.memory_space<vmem>>, vector<1x8x32xf32>
    %936 = vector.shape_cast %935 : vector<1x8x32xf32> to vector<8x32xf32>
    %937 = vector.shape_cast %931 : vector<8x32xf32> to vector<1x8x32xf32>
    tpu.vector_store %arg18[%c2_316, %c0_317, %c0_318], %937 {strides = array<i32>} : memref<8x8x32xf32, #tpu.memory_space<vmem>>, vector<1x8x32xf32>,
    %c6_319 = arith.constant 6 : index
    %c0_320 = arith.constant 0 : index
    %c0_321 = arith.constant 0 : index
    %938 = vector.load %arg15[%c6_319, %c0_320, %c0_321] : memref<8x8x128xf32, #tpu.memory_space<vmem>>, vector<1x8x128xf32>
    %939 = vector.shape_cast %938 : vector<1x8x128xf32> to vector<8x128xf32>
    %cst_322 = arith.constant dense<0.000000e+00> : vector<8x128xf32>
    %940 = tpu.matmul %906, %548, %cst_322 {dimension_numbers = #tpu.dot_dimension_numbers<[1], [0], [0], [1], [0, 0, 1, 1], [], []>} : vector<8x32xf32>, vector<32x128xf32>, vector<8x128xf32> -> vector<8x128xf32>
    %941 = arith.addf %939, %940 : vector<8x128xf32>
    %c1_323 = arith.constant 1 : index
    %c0_324 = arith.constant 0 : index
    %c0_325 = arith.constant 0 : index
    %942 = vector.load %arg16[%c1_323, %c0_324, %c0_325] : memref<8x8x128xf32, #tpu.memory_space<vmem>>, vector<1x8x128xf32>
    %943 = vector.shape_cast %942 : vector<1x8x128xf32> to vector<8x128xf32>
    %cst_326 = arith.constant dense<0.000000e+00> : vector<8x128xf32>
    %944 = tpu.matmul %931, %549, %cst_326 {dimension_numbers = #tpu.dot_dimension_numbers<[1], [0], [0], [1], [0, 0, 1, 1], [], []>} : vector<8x32xf32>, vector<32x128xf32>, vector<8x128xf32> -> vector<8x128xf32>
    %945 = arith.addf %943, %944 : vector<8x128xf32>
    %946 = vector.extract_strided_slice %941 {offsets = [0, 0], sizes = [8, 32], strides = [1, 1]} : vector<8x128xf32> to vector<8x32xf32>
    %947 = arith.negf %946 : vector<8x32xf32>
    %948 = math.exp %947 : vector<8x32xf32>
    %cst_327 = arith.constant 1.000000e+00 : f32
    %949 = vector.broadcast %cst_327 : f32 to vector<8x32xf32>
    %950 = arith.addf %949, %948 : vector<8x32xf32>
    %951 = arith.divf %949, %950 : vector<8x32xf32>
    %952 = vector.extract_strided_slice %941 {offsets = [0, 32], sizes = [8, 32], strides = [1, 1]} : vector<8x128xf32> to vector<8x32xf32>
    %953 = arith.negf %952 : vector<8x32xf32>
    %954 = math.exp %953 : vector<8x32xf32>
    %cst_328 = arith.constant 1.000000e+00 : f32
    %955 = vector.broadcast %cst_328 : f32 to vector<8x32xf32>
    %956 = arith.addf %955, %954 : vector<8x32xf32>
    %957 = arith.divf %955, %956 : vector<8x32xf32>
    %958 = vector.extract_strided_slice %941 {offsets = [0, 64], sizes = [8, 32], strides = [1, 1]} : vector<8x128xf32> to vector<8x32xf32>
    %959 = math.tanh %958 : vector<8x32xf32>
    %960 = vector.extract_strided_slice %941 {offsets = [0, 96], sizes = [8, 32], strides = [1, 1]} : vector<8x128xf32> to vector<8x32xf32>
    %961 = arith.negf %960 : vector<8x32xf32>
    %962 = math.exp %961 : vector<8x32xf32>
    %cst_329 = arith.constant 1.000000e+00 : f32
    %963 = vector.broadcast %cst_329 : f32 to vector<8x32xf32>
    %964 = arith.addf %963, %962 : vector<8x32xf32>
    %965 = arith.divf %963, %964 : vector<8x32xf32>
    %966 = arith.mulf %957, %904 : vector<8x32xf32>
    %967 = arith.mulf %951, %959 : vector<8x32xf32>
    %968 = arith.addf %966, %967 : vector<8x32xf32>
    %969 = math.tanh %968 : vector<8x32xf32>
    %970 = arith.mulf %965, %969 : vector<8x32xf32>
    %971 = vector.extract_strided_slice %945 {offsets = [0, 0], sizes = [8, 32], strides = [1, 1]} : vector<8x128xf32> to vector<8x32xf32>
    %972 = arith.negf %971 : vector<8x32xf32>
    %973 = math.exp %972 : vector<8x32xf32>
    %cst_330 = arith.constant 1.000000e+00 : f32
    %974 = vector.broadcast %cst_330 : f32 to vector<8x32xf32>
    %975 = arith.addf %974, %973 : vector<8x32xf32>
    %976 = arith.divf %974, %975 : vector<8x32xf32>
    %977 = vector.extract_strided_slice %945 {offsets = [0, 32], sizes = [8, 32], strides = [1, 1]} : vector<8x128xf32> to vector<8x32xf32>
    %978 = arith.negf %977 : vector<8x32xf32>
    %979 = math.exp %978 : vector<8x32xf32>
    %cst_331 = arith.constant 1.000000e+00 : f32
    %980 = vector.broadcast %cst_331 : f32 to vector<8x32xf32>
    %981 = arith.addf %980, %979 : vector<8x32xf32>
    %982 = arith.divf %980, %981 : vector<8x32xf32>
    %983 = vector.extract_strided_slice %945 {offsets = [0, 64], sizes = [8, 32], strides = [1, 1]} : vector<8x128xf32> to vector<8x32xf32>
    %984 = math.tanh %983 : vector<8x32xf32>
    %985 = vector.extract_strided_slice %945 {offsets = [0, 96], sizes = [8, 32], strides = [1, 1]} : vector<8x128xf32> to vector<8x32xf32>
    %986 = arith.negf %985 : vector<8x32xf32>
    %987 = math.exp %986 : vector<8x32xf32>
    %cst_332 = arith.constant 1.000000e+00 : f32
    %988 = vector.broadcast %cst_332 : f32 to vector<8x32xf32>
    %989 = arith.addf %988, %987 : vector<8x32xf32>
    %990 = arith.divf %988, %989 : vector<8x32xf32>
    %991 = arith.mulf %982, %929 : vector<8x32xf32>
    %992 = arith.mulf %976, %984 : vector<8x32xf32>
    %993 = arith.addf %991, %992 : vector<8x32xf32>
    %994 = math.tanh %993 : vector<8x32xf32>
    %995 = arith.mulf %990, %994 : vector<8x32xf32>
    %c6_333 = arith.constant 6 : index
    %c0_334 = arith.constant 0 : index
    %c0_335 = arith.constant 0 : index
    %996 = vector.load %arg17[%c6_333, %c0_334, %c0_335] : memref<8x8x32xf32, #tpu.memory_space<vmem>>, vector<1x8x32xf32>
    %997 = vector.shape_cast %996 : vector<1x8x32xf32> to vector<8x32xf32>
    %998 = vector.shape_cast %970 : vector<8x32xf32> to vector<1x8x32xf32>
    tpu.vector_store %arg17[%c6_333, %c0_334, %c0_335], %998 {strides = array<i32>} : memref<8x8x32xf32, #tpu.memory_space<vmem>>, vector<1x8x32xf32>,
    %c1_336 = arith.constant 1 : index
    %c0_337 = arith.constant 0 : index
    %c0_338 = arith.constant 0 : index
    %999 = vector.load %arg18[%c1_336, %c0_337, %c0_338] : memref<8x8x32xf32, #tpu.memory_space<vmem>>, vector<1x8x32xf32>
    %1000 = vector.shape_cast %999 : vector<1x8x32xf32> to vector<8x32xf32>
    %1001 = vector.shape_cast %995 : vector<8x32xf32> to vector<1x8x32xf32>
    tpu.vector_store %arg18[%c1_336, %c0_337, %c0_338], %1001 {strides = array<i32>} : memref<8x8x32xf32, #tpu.memory_space<vmem>>, vector<1x8x32xf32>,
    %c7_339 = arith.constant 7 : index
    %c0_340 = arith.constant 0 : index
    %c0_341 = arith.constant 0 : index
    %1002 = vector.load %arg15[%c7_339, %c0_340, %c0_341] : memref<8x8x128xf32, #tpu.memory_space<vmem>>, vector<1x8x128xf32>
    %1003 = vector.shape_cast %1002 : vector<1x8x128xf32> to vector<8x128xf32>
    %cst_342 = arith.constant dense<0.000000e+00> : vector<8x128xf32>
    %1004 = tpu.matmul %970, %548, %cst_342 {dimension_numbers = #tpu.dot_dimension_numbers<[1], [0], [0], [1], [0, 0, 1, 1], [], []>} : vector<8x32xf32>, vector<32x128xf32>, vector<8x128xf32> -> vector<8x128xf32>
    %1005 = arith.addf %1003, %1004 : vector<8x128xf32>
    %c0_343 = arith.constant 0 : index
    %c0_344 = arith.constant 0 : index
    %c0_345 = arith.constant 0 : index
    %1006 = vector.load %arg16[%c0_343, %c0_344, %c0_345] : memref<8x8x128xf32, #tpu.memory_space<vmem>>, vector<1x8x128xf32>
    %1007 = vector.shape_cast %1006 : vector<1x8x128xf32> to vector<8x128xf32>
    %cst_346 = arith.constant dense<0.000000e+00> : vector<8x128xf32>
    %1008 = tpu.matmul %995, %549, %cst_346 {dimension_numbers = #tpu.dot_dimension_numbers<[1], [0], [0], [1], [0, 0, 1, 1], [], []>} : vector<8x32xf32>, vector<32x128xf32>, vector<8x128xf32> -> vector<8x128xf32>
    %1009 = arith.addf %1007, %1008 : vector<8x128xf32>
    %1010 = vector.extract_strided_slice %1005 {offsets = [0, 0], sizes = [8, 32], strides = [1, 1]} : vector<8x128xf32> to vector<8x32xf32>
    %1011 = arith.negf %1010 : vector<8x32xf32>
    %1012 = math.exp %1011 : vector<8x32xf32>
    %cst_347 = arith.constant 1.000000e+00 : f32
    %1013 = vector.broadcast %cst_347 : f32 to vector<8x32xf32>
    %1014 = arith.addf %1013, %1012 : vector<8x32xf32>
    %1015 = arith.divf %1013, %1014 : vector<8x32xf32>
    %1016 = vector.extract_strided_slice %1005 {offsets = [0, 32], sizes = [8, 32], strides = [1, 1]} : vector<8x128xf32> to vector<8x32xf32>
    %1017 = arith.negf %1016 : vector<8x32xf32>
    %1018 = math.exp %1017 : vector<8x32xf32>
    %cst_348 = arith.constant 1.000000e+00 : f32
    %1019 = vector.broadcast %cst_348 : f32 to vector<8x32xf32>
    %1020 = arith.addf %1019, %1018 : vector<8x32xf32>
    %1021 = arith.divf %1019, %1020 : vector<8x32xf32>
    %1022 = vector.extract_strided_slice %1005 {offsets = [0, 64], sizes = [8, 32], strides = [1, 1]} : vector<8x128xf32> to vector<8x32xf32>
    %1023 = math.tanh %1022 : vector<8x32xf32>
    %1024 = vector.extract_strided_slice %1005 {offsets = [0, 96], sizes = [8, 32], strides = [1, 1]} : vector<8x128xf32> to vector<8x32xf32>
    %1025 = arith.negf %1024 : vector<8x32xf32>
    %1026 = math.exp %1025 : vector<8x32xf32>
    %cst_349 = arith.constant 1.000000e+00 : f32
    %1027 = vector.broadcast %cst_349 : f32 to vector<8x32xf32>
    %1028 = arith.addf %1027, %1026 : vector<8x32xf32>
    %1029 = arith.divf %1027, %1028 : vector<8x32xf32>
    %1030 = arith.mulf %1021, %968 : vector<8x32xf32>
    %1031 = arith.mulf %1015, %1023 : vector<8x32xf32>
    %1032 = arith.addf %1030, %1031 : vector<8x32xf32>
    %1033 = math.tanh %1032 : vector<8x32xf32>
    %1034 = arith.mulf %1029, %1033 : vector<8x32xf32>
    %1035 = vector.extract_strided_slice %1009 {offsets = [0, 0], sizes = [8, 32], strides = [1, 1]} : vector<8x128xf32> to vector<8x32xf32>
    %1036 = arith.negf %1035 : vector<8x32xf32>
    %1037 = math.exp %1036 : vector<8x32xf32>
    %cst_350 = arith.constant 1.000000e+00 : f32
    %1038 = vector.broadcast %cst_350 : f32 to vector<8x32xf32>
    %1039 = arith.addf %1038, %1037 : vector<8x32xf32>
    %1040 = arith.divf %1038, %1039 : vector<8x32xf32>
    %1041 = vector.extract_strided_slice %1009 {offsets = [0, 32], sizes = [8, 32], strides = [1, 1]} : vector<8x128xf32> to vector<8x32xf32>
    %1042 = arith.negf %1041 : vector<8x32xf32>
    %1043 = math.exp %1042 : vector<8x32xf32>
    %cst_351 = arith.constant 1.000000e+00 : f32
    %1044 = vector.broadcast %cst_351 : f32 to vector<8x32xf32>
    %1045 = arith.addf %1044, %1043 : vector<8x32xf32>
    %1046 = arith.divf %1044, %1045 : vector<8x32xf32>
    %1047 = vector.extract_strided_slice %1009 {offsets = [0, 64], sizes = [8, 32], strides = [1, 1]} : vector<8x128xf32> to vector<8x32xf32>
    %1048 = math.tanh %1047 : vector<8x32xf32>
    %1049 = vector.extract_strided_slice %1009 {offsets = [0, 96], sizes = [8, 32], strides = [1, 1]} : vector<8x128xf32> to vector<8x32xf32>
    %1050 = arith.negf %1049 : vector<8x32xf32>
    %1051 = math.exp %1050 : vector<8x32xf32>
    %cst_352 = arith.constant 1.000000e+00 : f32
    %1052 = vector.broadcast %cst_352 : f32 to vector<8x32xf32>
    %1053 = arith.addf %1052, %1051 : vector<8x32xf32>
    %1054 = arith.divf %1052, %1053 : vector<8x32xf32>
    %1055 = arith.mulf %1046, %993 : vector<8x32xf32>
    %1056 = arith.mulf %1040, %1048 : vector<8x32xf32>
    %1057 = arith.addf %1055, %1056 : vector<8x32xf32>
    %1058 = math.tanh %1057 : vector<8x32xf32>
    %1059 = arith.mulf %1054, %1058 : vector<8x32xf32>
    %c7_353 = arith.constant 7 : index
    %c0_354 = arith.constant 0 : index
    %c0_355 = arith.constant 0 : index
    %1060 = vector.load %arg17[%c7_353, %c0_354, %c0_355] : memref<8x8x32xf32, #tpu.memory_space<vmem>>, vector<1x8x32xf32>
    %1061 = vector.shape_cast %1060 : vector<1x8x32xf32> to vector<8x32xf32>
    %1062 = vector.shape_cast %1034 : vector<8x32xf32> to vector<1x8x32xf32>
    tpu.vector_store %arg17[%c7_353, %c0_354, %c0_355], %1062 {strides = array<i32>} : memref<8x8x32xf32, #tpu.memory_space<vmem>>, vector<1x8x32xf32>,
    %c0_356 = arith.constant 0 : index
    %c0_357 = arith.constant 0 : index
    %c0_358 = arith.constant 0 : index
    %1063 = vector.load %arg18[%c0_356, %c0_357, %c0_358] : memref<8x8x32xf32, #tpu.memory_space<vmem>>, vector<1x8x32xf32>
    %1064 = vector.shape_cast %1063 : vector<1x8x32xf32> to vector<8x32xf32>
    %1065 = vector.shape_cast %1059 : vector<8x32xf32> to vector<1x8x32xf32>
    tpu.vector_store %arg18[%c0_356, %c0_357, %c0_358], %1065 {strides = array<i32>} : memref<8x8x32xf32, #tpu.memory_space<vmem>>, vector<1x8x32xf32>,
    %c0_359 = arith.constant 0 : index
    %c0_360 = arith.constant 0 : index
    %c0_361 = arith.constant 0 : index
    %1066 = vector.load %arg17[%c0_359, %c0_360, %c0_361] : memref<8x8x32xf32, #tpu.memory_space<vmem>>, vector<8x8x32xf32>
    %cst_362 = arith.constant dense<0xFF800000> : vector<8x32xf32>
    %1067 = vector.multi_reduction <maximumf>, %1066, %cst_362 [0] : vector<8x8x32xf32> to vector<8x32xf32>
    %1068 = vector.shape_cast %1067 : vector<8x32xf32> to vector<1x8x32xf32>
    %1069 = vector.broadcast %1068 : vector<1x8x32xf32> to vector<8x8x32xf32>
    %1070 = arith.subf %1066, %1069 : vector<8x8x32xf32>
    %1071 = math.exp %1070 : vector<8x8x32xf32>
    %cst_363 = arith.constant dense<0.000000e+00> : vector<8x32xf32>
    %1072 = vector.multi_reduction <add>, %1071, %cst_363 [0] : vector<8x8x32xf32> to vector<8x32xf32>
    %1073 = arith.mulf %1071, %1066 : vector<8x8x32xf32>
    %cst_364 = arith.constant dense<0.000000e+00> : vector<8x32xf32>
    %1074 = vector.multi_reduction <add>, %1073, %cst_364 [0] : vector<8x8x32xf32> to vector<8x32xf32>
    %1075 = arith.divf %1074, %1072 : vector<8x32xf32>
    %c0_365 = arith.constant 0 : index
    %c0_366 = arith.constant 0 : index
    %c0_367 = arith.constant 0 : index
    %1076 = vector.load %arg18[%c0_365, %c0_366, %c0_367] : memref<8x8x32xf32, #tpu.memory_space<vmem>>, vector<8x8x32xf32>
    %cst_368 = arith.constant dense<0xFF800000> : vector<8x32xf32>
    %1077 = vector.multi_reduction <maximumf>, %1076, %cst_368 [0] : vector<8x8x32xf32> to vector<8x32xf32>
    %1078 = vector.shape_cast %1077 : vector<8x32xf32> to vector<1x8x32xf32>
    %1079 = vector.broadcast %1078 : vector<1x8x32xf32> to vector<8x8x32xf32>
    %1080 = arith.subf %1076, %1079 : vector<8x8x32xf32>
    %1081 = math.exp %1080 : vector<8x8x32xf32>
    %cst_369 = arith.constant dense<0.000000e+00> : vector<8x32xf32>
    %1082 = vector.multi_reduction <add>, %1081, %cst_369 [0] : vector<8x8x32xf32> to vector<8x32xf32>
    %1083 = arith.mulf %1081, %1076 : vector<8x8x32xf32>
    %cst_370 = arith.constant dense<0.000000e+00> : vector<8x32xf32>
    %1084 = vector.multi_reduction <add>, %1083, %cst_370 [0] : vector<8x8x32xf32> to vector<8x32xf32>
    %1085 = arith.divf %1084, %1082 : vector<8x32xf32>
    %c0_371 = arith.constant 0 : index
    %c0_372 = arith.constant 0 : index
    %1086 = vector.load %arg10[%c0_371, %c0_372] : memref<64x32xf32, #tpu.memory_space<vmem>>, vector<64x32xf32>
    %1087 = vector.extract_strided_slice %1086 {offsets = [0, 0], sizes = [32, 32], strides = [1, 1]} : vector<64x32xf32> to vector<32x32xf32>
    %cst_373 = arith.constant dense<0.000000e+00> : vector<8x32xf32>
    %1088 = tpu.matmul %1075, %1087, %cst_373 {dimension_numbers = #tpu.dot_dimension_numbers<[1], [0], [0], [1], [0, 0, 1, 1], [], []>} : vector<8x32xf32>, vector<32x32xf32>, vector<8x32xf32> -> vector<8x32xf32>
    %1089 = vector.extract_strided_slice %1086 {offsets = [32, 0], sizes = [32, 32], strides = [1, 1]} : vector<64x32xf32> to vector<32x32xf32>
    %cst_374 = arith.constant dense<0.000000e+00> : vector<8x32xf32>
    %1090 = tpu.matmul %1085, %1089, %cst_374 {dimension_numbers = #tpu.dot_dimension_numbers<[1], [0], [0], [1], [0, 0, 1, 1], [], []>} : vector<8x32xf32>, vector<32x32xf32>, vector<8x32xf32> -> vector<8x32xf32>
    %1091 = arith.addf %1088, %1090 : vector<8x32xf32>
    %c0_375 = arith.constant 0 : index
    %c0_376 = arith.constant 0 : index
    %1092 = vector.load %arg11[%c0_375, %c0_376] : memref<1x32xf32, #tpu.memory_space<vmem>>, vector<1x32xf32>
    %1093 = vector.broadcast %1092 : vector<1x32xf32> to vector<8x32xf32>
    %1094 = arith.addf %1091, %1093 : vector<8x32xf32>
    %cst_377 = arith.constant 0.000000e+00 : f32
    %1095 = vector.broadcast %cst_377 : f32 to vector<8x32xf32>
    %1096 = arith.maximumf %1094, %1095 : vector<8x32xf32>
    %c0_378 = arith.constant 0 : index
    %c0_379 = arith.constant 0 : index
    %1097 = vector.load %arg12[%c0_378, %c0_379] : memref<32x1xf32, #tpu.memory_space<vmem>>, vector<32x1xf32>
    %cst_380 = arith.constant dense<0.000000e+00> : vector<8x1xf32>
    %1098 = tpu.matmul %1096, %1097, %cst_380 {dimension_numbers = #tpu.dot_dimension_numbers<[1], [0], [0], [1], [0, 0, 1, 1], [], []>} : vector<8x32xf32>, vector<32x1xf32>, vector<8x1xf32> -> vector<8x1xf32>
    %c0_381 = arith.constant 0 : index
    %c0_382 = arith.constant 0 : index
    %1099 = vector.load %arg13[%c0_381, %c0_382] : memref<1x1xf32, #tpu.memory_space<vmem>>, vector<1x1xf32>
    %1100 = vector.broadcast %1099 : vector<1x1xf32> to vector<8x1xf32>
    %1101 = arith.addf %1098, %1100 : vector<8x1xf32>
    %1102 = arith.negf %1101 : vector<8x1xf32>
    %1103 = math.exp %1102 : vector<8x1xf32>
    %cst_383 = arith.constant 1.000000e+00 : f32
    %1104 = vector.broadcast %cst_383 : f32 to vector<8x1xf32>
    %1105 = arith.addf %1104, %1103 : vector<8x1xf32>
    %1106 = arith.divf %1104, %1105 : vector<8x1xf32>
    %c0_384 = arith.constant 0 : index
    %c0_385 = arith.constant 0 : index
    %1107 = vector.load %arg14[%c0_384, %c0_385] : memref<8x1xf32, #tpu.memory_space<vmem>>, vector<8x1xf32>
    tpu.vector_store %arg14[%c0_384, %c0_385], %1106 {strides = array<i32>} : memref<8x1xf32, #tpu.memory_space<vmem>>, vector<8x1xf32>,
    return
  }
  func.func @transform_0(%arg0: i32) -> (i32, i32, i32) {
    %c0_i32 = arith.constant 0 : i32
    %c0_i32_0 = arith.constant 0 : i32
    %c0_i32_1 = arith.constant 0 : i32
    %c0_i32_2 = arith.constant 0 : i32
    return %c0_i32, %c0_i32_0, %c0_i32_1 : i32, i32, i32
  }
  func.func @transform_1(%arg0: i32) -> (i32, i32) {
    %c0_i32 = arith.constant 0 : i32
    %c0_i32_0 = arith.constant 0 : i32
    %c0_i32_1 = arith.constant 0 : i32
    return %c0_i32, %c0_i32_0 : i32, i32
  }
  func.func @transform_2(%arg0: i32) -> (i32, i32) {
    %c0_i32 = arith.constant 0 : i32
    %c0_i32_0 = arith.constant 0 : i32
    %c0_i32_1 = arith.constant 0 : i32
    return %c0_i32, %c0_i32_0 : i32, i32
  }
  func.func @transform_3(%arg0: i32) -> (i32, i32) {
    %c0_i32 = arith.constant 0 : i32
    %c0_i32_0 = arith.constant 0 : i32
    %c0_i32_1 = arith.constant 0 : i32
    return %c0_i32, %c0_i32_0 : i32, i32
  }
  func.func @transform_4(%arg0: i32) -> (i32, i32) {
    %c0_i32 = arith.constant 0 : i32
    %c0_i32_0 = arith.constant 0 : i32
    %c0_i32_1 = arith.constant 0 : i32
    return %c0_i32, %c0_i32_0 : i32, i32
  }
  func.func @transform_5(%arg0: i32) -> (i32, i32) {
    %c0_i32 = arith.constant 0 : i32
    %c0_i32_0 = arith.constant 0 : i32
    %c0_i32_1 = arith.constant 0 : i32
    return %c0_i32, %c0_i32_0 : i32, i32
  }
  func.func @transform_6(%arg0: i32) -> (i32, i32) {
    %c0_i32 = arith.constant 0 : i32
    %c0_i32_0 = arith.constant 0 : i32
    %c0_i32_1 = arith.constant 0 : i32
    return %c0_i32, %c0_i32_0 : i32, i32
  }
  func.func @transform_7(%arg0: i32) -> (i32, i32) {
    %c0_i32 = arith.constant 0 : i32
    %c0_i32_0 = arith.constant 0 : i32
    %c0_i32_1 = arith.constant 0 : i32
    return %c0_i32, %c0_i32_0 : i32, i32
  }
  func.func @transform_8(%arg0: i32) -> (i32, i32) {
    %c0_i32 = arith.constant 0 : i32
    %c0_i32_0 = arith.constant 0 : i32
    %c0_i32_1 = arith.constant 0 : i32
    return %c0_i32, %c0_i32_0 : i32, i32
  }
  func.func @transform_9(%arg0: i32) -> (i32, i32) {
    %c0_i32 = arith.constant 0 : i32
    %c0_i32_0 = arith.constant 0 : i32
    %c0_i32_1 = arith.constant 0 : i32
    return %c0_i32, %c0_i32_0 : i32, i32
  }
  func.func @transform_10(%arg0: i32) -> (i32, i32) {
    %c0_i32 = arith.constant 0 : i32
    %c0_i32_0 = arith.constant 0 : i32
    %c0_i32_1 = arith.constant 0 : i32
    return %c0_i32, %c0_i32_0 : i32, i32
  }
  func.func @transform_11(%arg0: i32) -> (i32, i32) {
    %c0_i32 = arith.constant 0 : i32
    %c0_i32_0 = arith.constant 0 : i32
    %c0_i32_1 = arith.constant 0 : i32
    return %c0_i32, %c0_i32_0 : i32, i32
  }
  func.func @transform_12(%arg0: i32) -> (i32, i32) {
    %c0_i32 = arith.constant 0 : i32
    %c0_i32_0 = arith.constant 0 : i32
    %c0_i32_1 = arith.constant 0 : i32
    return %c0_i32, %c0_i32_0 : i32, i32
  }
  func.func @transform_13(%arg0: i32) -> (i32, i32) {
    %c0_i32 = arith.constant 0 : i32
    %c0_i32_0 = arith.constant 0 : i32
    %c0_i32_1 = arith.constant 0 : i32
    return %c0_i32, %c0_i32_0 : i32, i32
  }
}

</mosaic_0001>

<bundles_post_ra>
// kernel: tpu_custom_call.1
= control target key start
LH: loop header
LB: loop body
LE: loop exit
PB: predicated region body
PF: predicated region fallthrough
CT: control target
= control target key end

     0   :  { %s6771_s0 = inlined_call_operand.hbm [shape: f32[8,8,16], index: 0, kind: input, shape index: {}]   ;;  %s6772_s1 = inlined_call_operand.hbm [shape: f32[16,256], index: 1, kind: input, shape index: {}]   ;;  %s6773_s2 = inlined_call_operand.hbm [shape: f32[32,128], index: 2, kind: input, shape index: {}]   ;;  %s6774_s3 = inlined_call_operand.hbm [shape: f32[32,128], index: 3, kind: input, shape index: {}]   ;;  %s6775_s4 = inlined_call_operand.vmem [shape: f32[1,256], index: 4, kind: input, shape index: {}]   ;;  %s6776_s5 = inlined_call_operand.vmem [shape: f32[64,256], index: 5, kind: input, shape index: {}]   ;;  %s6777_s6 = inlined_call_operand.hbm [shape: f32[32,128], index: 6, kind: input, shape index: {}]   ;;  %s6778_s7 = inlined_call_operand.hbm [shape: f32[32,128], index: 7, kind: input, shape index: {}]   ;;  %s6779_s8 = inlined_call_operand.hbm [shape: f32[1,256], index: 8, kind: input, shape index: {}]   ;;  %s6780_s9 = inlined_call_operand.vmem [shape: f32[64,32], index: 9, kind: input, shape index: {}]   ;;  %s6781_s10 = inlined_call_operand.vmem [shape: f32[1,32], index: 10, kind: input, shape index: {}]   ;;  %s6782_s11 = inlined_call_operand.vmem [shape: f32[32,1], index: 11, kind: input, shape index: {}]   ;;  %s6783_s12 = inlined_call_operand.<no memory space> [shape: f32[1,1], index: 12, kind: input, shape index: {}]   ;;  %s6784_s13 = inlined_call_operand.vmem [shape: f32[8,1], index: 13, kind: output, shape index: {}]  }
   0x1   :  { %v18_v0 = vstv %s6783_s12 }
   0x2   :  { %19 = vst [vmem:[#allocation6] sm:$0x1] %v18_v0 }
   0x3   :  { %20 = vsyncpa [#allocation8], 0 }
   0x4   :  { %21 = vsyncpa [#allocation10], 0 }
   0x5   :  { %22 = vsyncpa [#allocation13], 0 }
   0x6   :  { %23 = vsyncpa [#allocation16], 0  ;;  %s5810_s27 = smov [#allocation9]   ;;  %s5648_s14 = scalar_lea.hbm %s6772_s1, 512 }
   0x7   :  { %s41_s28 = sshll.u32 %s5810_s27, 4  ;;  %p5649_p0 = scmp.ne.s32.totalorder %s6772_s1, %s5648_s14  ;;  %s42_s28 = int_to_ptr.vmem [resolvable:$true] %s41_s28 }
   0x8   :  { %p5652_p1 = scmp.lt.u32.totalorder %s5648_s14, %s6772_s1 }
   0xa   :  { %p5654_p2 = pnand %p5652_p1, %p5649_p0 }
   0xc   :  { %5657 = shalt.err (!%p5654_p2)
}
   0xd   :  { %s5658_s12 = scalar_lea.vmem %s42_s28, 512  ;;  %p5663_p4 = scmp.lt.s32.totalorder %s42_s28, %s42_s28 }
   0xe   :  { %p5659_p3 = scmp.ne.s32.totalorder %s42_s28, %s5658_s12  ;;  %p5664_p5 = scmp.lt.s32.totalorder %s5658_s12, %s5658_s12 }
  0x10   :  { %p5665_p6 = por %p5664_p5, %p5663_p4 }
  0x12   :  { %p5666_p7 = pnand %p5665_p6, %p5659_p3 }
  0x14   :  { %5669 = shalt.err (!%p5666_p7)
}
  0x15   :  { %s5811_s19 = smov 256   ;;  %s5812_s20 = smov 16  }
  0x16   :  { %47 = dma.hbm_to_vmem [thread:$0]  %s6772_s1, 512, %s42_s28, [#allocation10], %s5811_s19, %s5811_s19, %s5812_s20  }
  0x17   :  { %s5813_s23 = smov [#allocation12]   ;;  %s5814_s25 = smov [#allocation15]  }
  0x18   :  { %s65_s24 = sshll.u32 %s5813_s23, 4  ;;  %s93_s26 = sshll.u32 %s5814_s25, 4  ;;  %s66_s24 = int_to_ptr.vmem [resolvable:$true] %s65_s24  ;;  %s94_s26 = int_to_ptr.vmem [resolvable:$true] %s93_s26 }
  0x19   :  { %s5670_s30 = scalar_lea.hbm %s6774_s3, 512 }
  0x1a   :  { %p5671_p8 = scmp.ne.s32.totalorder %s6774_s3, %s5670_s30  ;;  %p5674_p9 = scmp.lt.u32.totalorder %s5670_s30, %s6774_s3 }
  0x1c   :  { %p5676_p10 = pnand %p5674_p9, %p5671_p8 }
  0x1e   :  { %5679 = shalt.err (!%p5676_p10)
}
  0x1f   :  { %s5680_s1 = scalar_lea.vmem %s66_s24, 512  ;;  %p5685_p12 = scmp.lt.s32.totalorder %s66_s24, %s66_s24 }
  0x20   :  { %p5681_p11 = scmp.ne.s32.totalorder %s66_s24, %s5680_s1  ;;  %p5686_p13 = scmp.lt.s32.totalorder %s5680_s1, %s5680_s1 }
  0x22   :  { %p5687_p0 = por %p5686_p13, %p5685_p12 }
  0x24   :  { %p5688_p1 = pnand %p5687_p0, %p5681_p11 }
  0x26   :  { %5691 = shalt.err (!%p5688_p1)
}
  0x27   :  { %s5815_s28 = smov 128   ;;  %s5816_s18 = smov 8  }
  0x28   :  { %71 = dma.hbm_to_vmem [thread:$0]  %s6774_s3, 512, %s66_s24, [#allocation13], %s5815_s28, %s5815_s28, %s5816_s18  }
  0x29   :  { %s5692_s22 = scalar_lea.hbm %s6778_s7, 512 }
  0x2a   :  { %p5693_p2 = scmp.ne.s32.totalorder %s6778_s7, %s5692_s22  ;;  %p5696_p3 = scmp.lt.u32.totalorder %s5692_s22, %s6778_s7 }
  0x2c   :  { %p5698_p4 = pnand %p5696_p3, %p5693_p2 }
  0x2e   :  { %5701 = shalt.err (!%p5698_p4)
}
  0x2f   :  { %s5702_s30 = scalar_lea.vmem %s94_s26, 512  ;;  %p5707_p6 = scmp.lt.s32.totalorder %s94_s26, %s94_s26 }
  0x30   :  { %p5703_p5 = scmp.ne.s32.totalorder %s94_s26, %s5702_s30  ;;  %p5708_p7 = scmp.lt.s32.totalorder %s5702_s30, %s5702_s30 }
  0x32   :  { %p5709_p8 = por %p5708_p7, %p5707_p6 }
  0x34   :  { %p5710_p9 = pnand %p5709_p8, %p5703_p5 }
  0x36   :  { %5713 = shalt.err (!%p5710_p9)
}
  0x37   :  { %99 = dma.hbm_to_vmem [thread:$0]  %s6778_s7, 512, %s94_s26, [#allocation16], %s5815_s28, %s5815_s28, %s5816_s18  }
  0x38   :  { %s5817_s14 = smov [#allocation7]   ;;  %s5818_s16 = smov [#allocation11]  }
  0x39   :  { %s29_s15 = sshll.u32 %s5817_s14, 4  ;;  %s53_s17 = sshll.u32 %s5818_s16, 4  ;;  %s30_s15 = int_to_ptr.vmem [resolvable:$true] %s29_s15  ;;  %s54_s17 = int_to_ptr.vmem [resolvable:$true] %s53_s17 }
  0x3a   :  { %s5714_s19 = scalar_lea.hbm %s6771_s0, 1024 }
  0x3b   :  { %p5715_p10 = scmp.ne.s32.totalorder %s6771_s0, %s5714_s19  ;;  %p5718_p11 = scmp.lt.u32.totalorder %s5714_s19, %s6771_s0 }
  0x3d   :  { %p5720_p12 = pnand %p5718_p11, %p5715_p10 }
  0x3f   :  { %5723 = shalt.err (!%p5720_p12)
}
  0x40   :  { %s5724_s7 = scalar_lea.vmem %s30_s15, 1024  ;;  %p5729_p0 = scmp.lt.s32.totalorder %s30_s15, %s30_s15 }
  0x41   :  { %p5725_p13 = scmp.ne.s32.totalorder %s30_s15, %s5724_s7  ;;  %p5730_p1 = scmp.lt.s32.totalorder %s5724_s7, %s5724_s7 }
  0x43   :  { %p5731_p2 = por %p5730_p1, %p5729_p0 }
  0x45   :  { %p5732_p3 = pnand %p5731_p2, %p5725_p13 }
  0x47   :  { %5735 = shalt.err (!%p5732_p3)
}
  0x48   :  { %35 = dma.hbm_to_vmem [thread:$0]  %s6771_s0, 1024, %s30_s15, [#allocation8], %s5815_s28, %s5815_s28, %s5816_s18  }
  0x49   :  { %s5736_s30 = scalar_lea.hbm %s6773_s2, 512 }
  0x4a   :  { %p5737_p4 = scmp.ne.s32.totalorder %s6773_s2, %s5736_s30  ;;  %p5740_p5 = scmp.lt.u32.totalorder %s5736_s30, %s6773_s2 }
  0x4c   :  { %p5742_p6 = pnand %p5740_p5, %p5737_p4 }
  0x4e   :  { %5745 = shalt.err (!%p5742_p6)
}
  0x4f   :  { %s5746_s1 = scalar_lea.vmem %s54_s17, 512  ;;  %p5751_p8 = scmp.lt.s32.totalorder %s54_s17, %s54_s17 }
  0x50   :  { %p5747_p7 = scmp.ne.s32.totalorder %s54_s17, %s5746_s1  ;;  %p5752_p9 = scmp.lt.s32.totalorder %s5746_s1, %s5746_s1 }
  0x52   :  { %p5753_p10 = por %p5752_p9, %p5751_p8 }
  0x54   :  { %p5754_p11 = pnand %p5753_p10, %p5747_p7 }
  0x56   :  { %5757 = shalt.err (!%p5754_p11)
}
  0x57   :  { %59 = dma.hbm_to_vmem [thread:$0]  %s6773_s2, 512, %s54_s17, [#allocation10], %s5815_s28, %s5815_s28, %s5816_s18  }
  0x58   :  { %s5819_s12 = smov [#allocation14]   ;;  %s5820_s20 = smov [#allocation17]  }
  0x59   :  { %s81_s19 = sshll.u32 %s5819_s12, 4  ;;  %s106_s21 = sshll.u32 %s5820_s20, 4  ;;  %s82_s19 = int_to_ptr.vmem [resolvable:$true] %s81_s19  ;;  %s107_s21 = int_to_ptr.vmem [resolvable:$true] %s106_s21 }
  0x5a   :  { %s5758_s7 = scalar_lea.hbm %s6777_s6, 512 }
  0x5b   :  { %p5759_p12 = scmp.ne.s32.totalorder %s6777_s6, %s5758_s7  ;;  %p5762_p13 = scmp.lt.u32.totalorder %s5758_s7, %s6777_s6 }
  0x5d   :  { %p5764_p0 = pnand %p5762_p13, %p5759_p12 }
  0x5f   :  { %5767 = shalt.err (!%p5764_p0)
}
  0x60   :  { %s5768_s2 = scalar_lea.vmem %s82_s19, 512  ;;  %p5773_p2 = scmp.lt.s32.totalorder %s82_s19, %s82_s19 }
  0x61   :  { %p5769_p1 = scmp.ne.s32.totalorder %s82_s19, %s5768_s2  ;;  %p5774_p3 = scmp.lt.s32.totalorder %s5768_s2, %s5768_s2 }
  0x63   :  { %p5775_p4 = por %p5774_p3, %p5773_p2 }
  0x65   :  { %p5776_p5 = pnand %p5775_p4, %p5769_p1 }
  0x67   :  { %5779 = shalt.err (!%p5776_p5)
}
  0x68   :  { %87 = dma.hbm_to_vmem [thread:$0]  %s6777_s6, 512, %s82_s19, [#allocation13], %s5815_s28, %s5815_s28, %s5816_s18  }
  0x69   :  { %s5780_s14 = scalar_lea.hbm %s6779_s8, 32 }
  0x6a   :  { %p5781_p6 = scmp.ne.s32.totalorder %s6779_s8, %s5780_s14  ;;  %p5784_p7 = scmp.lt.u32.totalorder %s5780_s14, %s6779_s8 }
  0x6c   :  { %p5786_p8 = pnand %p5784_p7, %p5781_p6 }
  0x6e   :  { %5789 = shalt.err (!%p5786_p8)
}
  0x6f   :  { %s5790_s12 = scalar_lea.vmem %s107_s21, 32  ;;  %p5795_p10 = scmp.lt.s32.totalorder %s107_s21, %s107_s21 }
  0x70   :  { %p5791_p9 = scmp.ne.s32.totalorder %s107_s21, %s5790_s12  ;;  %p5796_p11 = scmp.lt.s32.totalorder %s5790_s12, %s5790_s12 }
  0x72   :  { %p5797_p12 = por %p5796_p11, %p5795_p10 }
  0x74   :  { %p5798_p13 = pnand %p5797_p12, %p5791_p9 }
  0x76   :  { %5801 = shalt.err (!%p5798_p13)
}
  0x77   :  { %109 = dma.hbm_to_vmem [thread:$0]  %s6779_s8, 32, %s107_s21, [#allocation16]  }
  0x78   :  { %5802 = dma.done.wait [#allocation8], 1024  }
  0x79   :  { %5803 = vsyncadd [#allocation8], 4294966272 }
  0x7a   :  { %5804 = dma.done.wait [#allocation10], 1024  }
  0x7b   :  { %5805 = vsyncadd [#allocation10], 4294966272 }
  0x7c   :  { %5806 = dma.done.wait [#allocation13], 1024  }
  0x7d   :  { %5807 = vsyncadd [#allocation13], 4294966272 }
  0x7e   :  { %5808 = dma.done.wait [#allocation16], 544  }
  0x7f   :  { %5809 = vsyncadd [#allocation16], 4294966752  ;;  %v5821_v1 = vmov 0.0|0.0   ;;  %v5822_v2 = vmov 0.0   ;;  %vm5823_vm0 = vmmov 0   ;;  %v140_v3 = vld [vmem:[#allocation9 + $0x8] sm:$0xff]  ;;  %v153_v29 = vlaneseq }
  0x80   :  { %5094 = vmatprep.subr.bf16.mxu1 %v5821_v1  ;;  %252 = vmatprep.mubr.f32.mxu0 %v5822_v2  ;;  %v142_v4 = vld [vmem:[#allocation9 + $0x18] sm:$0xff]  ;;  %v317_v5 = vld [vmem:[#allocation11] sm:$0xff]  ;;  %v318_v7 = vld [vmem:[#allocation11 + $0x8] sm:$0xff]  ;;  %vm163_vm1 = vcmask 130048   ;;  %s5825_s19 = smov 32   ;;  %vm326_vm2 = vcmask 261120  }
  0x81   :  { %4713 = vmatprep.mubr.msk.f32.mxu1 %vm5823_vm0, %v5822_v2  ;;  %v5090_v6 = vpack.c.bf16 %v142_v4, %v140_v3  ;;  %v139_v8 = vld [vmem:[#allocation9] sm:$0xff]  ;;  %v141_v9 = vld [vmem:[#allocation9 + $0x10] sm:$0xff]  ;;  %v6002_v10 = vpack.c.bf16 %v318_v7, %v317_v5  ;;  %v320_v13 = vld [vmem:[#allocation11 + $0x18] sm:$0xff]  ;;  %v6050_v30 = vshrl.u32 %v153_v29, 7  ;;  %vm4430_vm3 = vcmask 7168  }
  0x82   :  { %v5092_v11 = vpack.c.bf16 %v141_v9, %v139_v8  ;;  %v319_v12 = vld [vmem:[#allocation11 + $0x10] sm:$0xff]  ;;  %v143_v14 = vld [vmem:[#allocation7] sm:$0xff]  ;;  %v322_v17 = vld [vmem:[#allocation12 + $0x8] sm:$0xff] }
  0x83   :  { %5091 = vmatprep.subr.bf16.mxu0 %v5090_v6  ;;  %5096 = vmatpush3.bf16.msra.mxu1 %v6002_v10  ;;  %v6005_v15 = vpack.c.bf16 %v320_v13, %v319_v12  ;;  %v321_v16 = vld [vmem:[#allocation12] sm:$0xff]  ;;  %v144_v18 = vld [vmem:[#allocation7 + $0x8] sm:$0xff]  ;;  %v323_v20 = vld [vmem:[#allocation12 + $0x10] sm:$0xff]  ;;  %v155_v31 = vsub.s32 0, %v6050_v30  ;;  %v159_v33 = vsub.s32 1, %v6050_v30 }
  0x84   :  { %5093 = vmatpush1.bf16.msra.mxu0 %v5092_v11  ;;  %5097 = vmatprep.subr.bf16.mxu1 %v5821_v1  ;;  %v6012_v19 = vpack.c.bf16 %v322_v17, %v321_v16  ;;  %v324_v21 = vld [vmem:[#allocation12 + $0x18] sm:$0xff]  ;;  %v145_v22 = vld [vmem:[#allocation7 + $0x10] sm:$0xff]  ;;  %v147_v25 = vld [vmem:[#allocation7 + $0x20] sm:$0xff] }
  0x85   :  { %5118 = vmatprep.subr.bf16.mxu0 %v5821_v1  ;;  %v6021_v23 = vpack.c.bf16 %v324_v21, %v323_v20  ;;  %v146_v24 = vld [vmem:[#allocation7 + $0x18] sm:$0xff]  ;;  %v148_v26 = vld [vmem:[#allocation7 + $0x28] sm:$0xff]  ;;  %v149_v27 = vld [vmem:[#allocation7 + $0x30] sm:$0xff] }
  0x86   :  { %v150_v28 = vld [vmem:[#allocation7 + $0x38] sm:$0xff] }
  0x87   :  { %4440 = vmatmul.mubr.msk.f32.vlgmr.msra.gmra.mrb[0].mxu0 %vm163_vm1, %v143_v14  ;;  %5099 = vmatpush3.bf16.msra.mxu1 %v6005_v15  ;;  %v151_v32 = vld [vmem:[%s6775_s4] sm:$0x3]  ;;  %s5824_s4 = smov 64  }
  0x88   :  { %258 = vmatprep.mubr.f32.mxu0 %v5822_v2  ;;  %5100 = vmatprep.subr.bf16.mxu1 %v5821_v1  ;;  %v156_v34 = vrot.slane %v151_v32, %v155_v31  ;;  %v160_v35 = vrot.slane %v151_v32, %v159_v33 }
  0x89   :  { %5120 = vmatpush3.bf16.msra.mxu0 %v6002_v10 }
  0x8a   :  { %5121 = vmatprep.subr.bf16.mxu0 %v5821_v1  ;;  %4714 = vmatmul.mubr.f32.vlgmr.msra.gmra.mrb[0].mxu1 %v5822_v2 }
  0x8b   :  { %4441 = vmatmul.mubr.msk.f32.gmra.mrb[2].mxu0 %vm163_vm1, %v144_v18  ;;  %5102 = vmatpush3.bf16.msra.mxu1 %v6012_v19 }
  0x8c   :  { %264 = vmatprep.mubr.f32.mxu0 %v5822_v2  ;;  %5103 = vmatprep.subr.bf16.mxu1 %v5821_v1 }
  0x8d   :  { %4724 = vmatprep.mubr.msk.f32.mxu1 %vm5823_vm0, %v5822_v2  ;;  %5123 = vmatpush3.bf16.msra.mxu0 %v6005_v15 }
  0x8e   :  { %5130 = vmatprep.subr.bf16.mxu0 %v5821_v1 }
  0x8f   :  { %4442 = vmatmul.mubr.msk.f32.gmra.mrb[4].mxu0 %vm163_vm1, %v145_v22  ;;  %5105 = vmatpush3.bf16.msra.mxu1 %v6021_v23 }
  0x90   :  { %270 = vmatprep.mubr.f32.mxu0 %v5822_v2  ;;  %5106 = vmatprep.subr.bf16.mxu1 %v5821_v1 }
  0x92   :  { %4725 = vmatmul.mubr.f32.vlgmr.msra.gmra.mrb[2].mxu1 %v5822_v2 }
  0x93   :  { %4443 = vmatmul.mubr.msk.f32.gmra.mrb[6].mxu0 %vm163_vm1, %v146_v24  ;;  %5108 = vmatpush3.bf16.msra.mxu1 %v6002_v10 }
  0x94   :  { %276 = vmatprep.mubr.f32.mxu0 %v5822_v2  ;;  %5109 = vmatprep.subr.bf16.mxu1 %v5821_v1 }
  0x95   :  { %4735 = vmatprep.mubr.msk.f32.mxu1 %vm5823_vm0, %v5822_v2 }
  0x97   :  { %4444 = vmatmul.mubr.msk.f32.gmra.mrb[8].mxu0 %vm163_vm1, %v147_v25  ;;  %5111 = vmatpush3.bf16.msra.mxu1 %v6005_v15 }
  0x98   :  { %282 = vmatprep.mubr.f32.mxu0 %v5822_v2  ;;  %5112 = vmatprep.subr.bf16.mxu1 %v5821_v1 }
  0x9b   :  { %4445 = vmatmul.mubr.msk.f32.gmra.mrb[10].mxu0 %vm163_vm1, %v148_v26 }
  0x9c   :  { %288 = vmatprep.mubr.f32.mxu0 %v5822_v2 }
  0x9f   :  { %4446 = vmatmul.mubr.msk.f32.gmra.mrb[12].mxu0 %vm163_vm1, %v149_v27 }
  0xa0   :  { %294 = vmatprep.mubr.f32.mxu0 %v5822_v2 }
  0xa3   :  { %4447 = vmatmul.mubr.msk.f32.gmra.mrb[14].mxu0 %vm163_vm1, %v150_v28 }
  0xa4   :  { %4757 = vmatprep.mubr.msk.f32.mxu0 %vm5823_vm0, %v5822_v2 }
 0x15a   :  { %v254_v36 = vpop.f32.mrb[0].mxu0 }
 0x15b   :  { %v255_v37 = vadd.f32 %v254_v36, %v156_v34  ;;  %v256_v38 = vpop.f32.mrb[1].mxu0 }
 0x15c   :  { %v6061_v39 = vadd.f32 %v256_v38, %v160_v35 }
 0x15d   :  { %v396_v40 = vpop.f32.mrb[0].mxu1 }
 0x15e   :  { %v260_v41 = vpop.f32.mrb[2].mxu0  ;;  %v400_v42 = vadd.f32 %v396_v40, %v255_v37  ;;  %v4715_v45 = vpop.f32.mrb[1].mxu1 }
 0x15f   :  { %v6063_v43 = vadd.f32 %v260_v41, %v156_v34  ;;  %v262_v44 = vpop.f32.mrb[3].mxu0 }
 0x160   :  { %v6065_v46 = vadd.f32 %v262_v44, %v160_v35  ;;  %5352 = vtanh.f32 %v400_v42  ;;  %v4448_v16 = vmul.f32 -1.442695, %v400_v42 }
 0x162   :  { %v266_v47 = vpop.f32.mrb[4].mxu0 }
 0x163   :  { %v6067_v48 = vadd.f32 %v266_v47, %v156_v34  ;;  %v268_v49 = vpop.f32.mrb[5].mxu0 }
 0x164   :  { %v6069_v50 = vadd.f32 %v268_v49, %v160_v35 }
 0x165   :  { %v469_v52 = vpop.f32.mrb[2].mxu1 }
 0x166   :  { %v272_v51 = vpop.f32.mrb[6].mxu0  ;;  %v4726_v55 = vpop.f32.mrb[3].mxu1 }
 0x167   :  { %v6071_v53 = vadd.f32 %v272_v51, %v156_v34  ;;  %v274_v54 = vpop.f32.mrb[7].mxu0 }
 0x168   :  { %v6073_v56 = vadd.f32 %v274_v54, %v160_v35 }
 0x16a   :  { %v278_v57 = vpop.f32.mrb[8].mxu0  ;;  %v5353_v58 = vpop.eup %5352 }
 0x16b   :  { %v6075_v59 = vadd.f32 %v278_v57, %v156_v34  ;;  %v280_v60 = vpop.f32.mrb[9].mxu0  ;;  %483 = vrot.lane.b32.xlu0 %v5353_v58, %s5824_s4 }
 0x16c   :  { %v6077_v61 = vadd.f32 %v280_v60, %v160_v35 }
 0x16e   :  { %v284_v62 = vpop.f32.mrb[10].mxu0 }
 0x16f   :  { %v6080_v63 = vadd.f32 %v284_v62, %v156_v34  ;;  %v286_v0 = vpop.f32.mrb[11].mxu0 }
 0x170   :  { %v6082_v3 = vadd.f32 %v286_v0, %v160_v35 }
 0x172   :  { %v290_v4 = vpop.f32.mrb[12].mxu0 }
 0x173   :  { %v6084_v5 = vadd.f32 %v290_v4, %v156_v34  ;;  %v292_v6 = vpop.f32.mrb[13].mxu0 }
 0x174   :  { %v6086_v7 = vadd.f32 %v292_v6, %v160_v35 }
 0x176   :  { %v296_v8 = vpop.f32.mrb[14].mxu0 }
 0x177   :  { %v6088_v9 = vadd.f32 %v296_v8, %v156_v34  ;;  %v298_v11 = vpop.f32.mrb[15].mxu0 }
 0x178   :  { %v299_v12 = vadd.f32 %v298_v11, %v160_v35 }
 0x17a   :  { %v473_v13 = vadd.f32 %v469_v52, %v299_v12 }
 0x17c   :  { %5354 = vtanh.f32 %v473_v13  ;;  %v4449_v20 = vmul.f32 -1.442695, %v473_v13 }
 0x17d   :  { %5356 = vpow2.f32 %v4448_v16 }
 0x186   :  { %v5355_v14 = vpop.eup %5354 }
 0x187   :  { %507 = vrot.lane.b32.xlu0 %v5355_v14, %s5824_s4  ;;  %v5357_v17 = vpop.eup %5356 }
 0x188   :  { %v477_v18 = vadd.f32 1.0, %v5357_v17 }
 0x18a   :  { %5358 = vrcp.f32 %v477_v18 }
 0x18b   :  { %5360 = vpow2.f32 %v4449_v20 }
 0x194   :  { %v5359_v21 = vpop.eup %5358 }
 0x195   :  { %v5361_v25 = vpop.eup %5360  ;;  %v481_v32 = vmul.f32 0.0, %v5359_v21 }
 0x196   :  { %v501_v26 = vadd.f32 1.0, %v5361_v25 }
 0x198   :  { %5362 = vrcp.f32 %v501_v26 }
 0x1a2   :  { %v5363_v27 = vpop.eup %5362 }
 0x1a3   :  { %v505_v37 = vmul.f32 0.0, %v5363_v27 }
 0x1dd   :  { %v484_v22 = vpop.permute.xlu0 %483 }
 0x1de   :  { %v486_v24 = vmul.f32 %v5359_v21, %v484_v22 }
 0x1e0   :  { %488 = vrot.lane.b32.xlu1 %v486_v24, %s5825_s19 }
 0x1f9   :  { %v508_v28 = vpop.permute.xlu0 %507 }
 0x1fa   :  { %v510_v29 = vmul.f32 %v5363_v27, %v508_v28 }
 0x1fc   :  { %512 = vrot.lane.b32.xlu1 %v510_v29, %s5825_s19 }
 0x252   :  { %v489_v34 = vpop.permute.xlu1 %488 }
 0x253   :  { %v6093_v35 = vadd.f32 %v489_v34, %v481_v32 }
 0x255   :  { %5364 = vtanh.f32 %v6093_v35 }
 0x25f   :  { %v5365_v36 = vpop.eup %5364 }
 0x260   :  { %494 = vrot.lane.b32.xlu0 %v5365_v36, %s5824_s4 }
 0x26e   :  { %v513_v38 = vpop.permute.xlu1 %512 }
 0x26f   :  { %v6097_v40 = vadd.f32 %v513_v38, %v505_v37 }
 0x271   :  { %5366 = vtanh.f32 %v6097_v40 }
 0x27b   :  { %v5367_v41 = vpop.eup %5366 }
 0x27c   :  { %518 = vrot.lane.b32.xlu1 %v5367_v41, %s5824_s4 }
 0x2d2   :  { %v495_v42 = vpop.permute.xlu0 %494 }
 0x2d3   :  { %v497_v44 = vmul.f32 %v5359_v21, %v495_v42 }
 0x2d5   :  { %523 = vrot.lane.b32.xlu0 %v497_v44, %s5825_s19 }
 0x2ee   :  { %v519_v45 = vpop.permute.xlu1 %518 }
 0x2ef   :  { %v521_v47 = vmul.f32 %v5363_v27, %v519_v45 }
 0x2f1   :  { %528 = vrot.lane.b32.xlu1 %v521_v47, %s5825_s19 }
 0x347   :  { %v524_v49 = vpop.permute.xlu0 %523 }
 0x348   :  { %526 = vst.msk [vmem:[#allocation4] sm:$0xff] %vm326_vm2, %v524_v49  ;;  %4736 = vmatmul.mubr.msk.f32.vlgmr.msra.gmra.mrb[4].mxu1 %vm326_vm2, %v524_v49 }
 0x349   :  { %5114 = vmatpush3.bf16.msra.mxu1 %v6012_v19  ;;  %4746 = vmatprep.mubr.msk.f32.mxu1 %vm5823_vm0, %v5822_v2 }
 0x34a   :  { %5115 = vmatprep.subr.bf16.mxu1 %v5821_v1 }
 0x34d   :  { %5117 = vmatpush3.bf16.msra.mxu1 %v6021_v23 }
 0x34e   :  { %5124 = vmatprep.subr.bf16.mxu1 %v5821_v1 }
 0x363   :  { %v529_v51 = vpop.permute.xlu1 %528 }
 0x364   :  { %532 = vst.msk [vmem:[#allocation5 + $0x38] sm:$0xff] %vm326_vm2, %v529_v51  ;;  %4747 = vmatmul.mubr.msk.f32.vlgmr.msra.gmra.mrb[6].mxu1 %vm326_vm2, %v529_v51 }
 0x365   :  { %5126 = vmatpush3.bf16.msra.mxu1 %v6012_v19  ;;  %4768 = vmatprep.mubr.msk.f32.mxu1 %vm5823_vm0, %v5822_v2 }
 0x366   :  { %5127 = vmatprep.subr.bf16.mxu1 %v5821_v1 }
 0x369   :  { %5129 = vmatpush3.bf16.msra.mxu1 %v6021_v23 }
 0x36a   :  { %5136 = vmatprep.subr.bf16.mxu1 %v5821_v1 }
 0x41b   :  { %v603_v52 = vpop.f32.mrb[4].mxu1 }
 0x41c   :  { %v607_v54 = vadd.f32 %v603_v52, %v6063_v43  ;;  %v4737_v55 = vpop.f32.mrb[5].mxu1 }
 0x41e   :  { %5368 = vtanh.f32 %v607_v54  ;;  %v4452_v4 = vmul.f32 -1.442695, %v607_v54 }
 0x428   :  { %v5369_v57 = vpop.eup %5368 }
 0x429   :  { %692 = vrot.lane.b32.xlu1 %v5369_v57, %s5824_s4 }
 0x437   :  { %v678_v58 = vpop.f32.mrb[6].mxu1 }
 0x438   :  { %v682_v60 = vadd.f32 %v678_v58, %v6086_v7  ;;  %v4748_v62 = vpop.f32.mrb[7].mxu1 }
 0x43a   :  { %5370 = vtanh.f32 %v682_v60  ;;  %v4453_v11 = vmul.f32 -1.442695, %v682_v60 }
 0x43b   :  { %5372 = vpow2.f32 %v4452_v4 }
 0x444   :  { %v5371_v0 = vpop.eup %5370 }
 0x445   :  { %716 = vrot.lane.b32.xlu0 %v5371_v0, %s5824_s4  ;;  %v5373_v6 = vpop.eup %5372 }
 0x446   :  { %v686_v8 = vadd.f32 1.0, %v5373_v6 }
 0x448   :  { %5374 = vrcp.f32 %v686_v8 }
 0x449   :  { %5376 = vpow2.f32 %v4453_v11 }
 0x452   :  { %v5375_v43 = vpop.eup %5374 }
 0x453   :  { %v5377_v14 = vpop.eup %5376  ;;  %v690_v20 = vmul.f32 %v5375_v43, %v6093_v35 }
 0x454   :  { %v710_v16 = vadd.f32 1.0, %v5377_v14 }
 0x456   :  { %5378 = vrcp.f32 %v710_v16 }
 0x460   :  { %v5379_v7 = vpop.eup %5378 }
 0x461   :  { %v714_v25 = vmul.f32 %v5379_v7, %v6097_v40 }
 0x49b   :  { %v693_v12 = vpop.permute.xlu1 %692 }
 0x49c   :  { %v695_v13 = vmul.f32 %v5375_v43, %v693_v12 }
 0x49e   :  { %697 = vrot.lane.b32.xlu1 %v695_v13, %s5825_s19 }
 0x4b7   :  { %v717_v17 = vpop.permute.xlu0 %716 }
 0x4b8   :  { %v719_v18 = vmul.f32 %v5379_v7, %v717_v17 }
 0x4ba   :  { %721 = vrot.lane.b32.xlu0 %v719_v18, %s5825_s19 }
 0x510   :  { %v698_v21 = vpop.permute.xlu1 %697 }
 0x511   :  { %v700_v22 = vadd.f32 %v698_v21, %v690_v20 }
 0x513   :  { %5380 = vtanh.f32 %v700_v22 }
 0x51d   :  { %v5381_v24 = vpop.eup %5380 }
 0x51e   :  { %703 = vrot.lane.b32.xlu1 %v5381_v24, %s5824_s4 }
 0x52c   :  { %v722_v26 = vpop.permute.xlu0 %721 }
 0x52d   :  { %v724_v27 = vadd.f32 %v722_v26, %v714_v25 }
 0x52f   :  { %5382 = vtanh.f32 %v724_v27 }
 0x539   :  { %v5383_v28 = vpop.eup %5382 }
 0x53a   :  { %727 = vrot.lane.b32.xlu0 %v5383_v28, %s5824_s4 }
 0x590   :  { %v704_v29 = vpop.permute.xlu1 %703 }
 0x591   :  { %v706_v32 = vmul.f32 %v5375_v43, %v704_v29 }
 0x593   :  { %732 = vrot.lane.b32.xlu1 %v706_v32, %s5825_s19 }
 0x5ac   :  { %v728_v34 = vpop.permute.xlu0 %727 }
 0x5ad   :  { %v730_v35 = vmul.f32 %v5379_v7, %v728_v34 }
 0x5af   :  { %738 = vrot.lane.b32.xlu0 %v730_v35, %s5825_s19 }
 0x605   :  { %v733_v36 = vpop.permute.xlu1 %732 }
 0x606   :  { %736 = vst.msk [vmem:[#allocation4 + $0x8] sm:$0xff] %vm326_vm2, %v733_v36  ;;  %4758 = vmatmul.mubr.msk.f32.vlgmr.msra.gmra.mrb[16].mxu0 %vm326_vm2, %v733_v36 }
 0x607   :  { %5132 = vmatpush3.bf16.msra.mxu0 %v6002_v10  ;;  %4779 = vmatprep.mubr.msk.f32.mxu0 %vm5823_vm0, %v5822_v2 }
 0x608   :  { %5133 = vmatprep.subr.bf16.mxu0 %v5821_v1 }
 0x60b   :  { %5135 = vmatpush3.bf16.msra.mxu0 %v6005_v15 }
 0x60c   :  { %5142 = vmatprep.subr.bf16.mxu0 %v5821_v1 }
 0x621   :  { %v739_v37 = vpop.permute.xlu0 %738 }
 0x622   :  { %742 = vst.msk [vmem:[#allocation5 + $0x30] sm:$0xff] %vm326_vm2, %v739_v37  ;;  %4769 = vmatmul.mubr.msk.f32.vlgmr.msra.gmra.mrb[8].mxu1 %vm326_vm2, %v739_v37 }
 0x623   :  { %5138 = vmatpush3.bf16.msra.mxu1 %v6012_v19  ;;  %4790 = vmatprep.mubr.msk.f32.mxu1 %vm5823_vm0, %v5822_v2 }
 0x624   :  { %5139 = vmatprep.subr.bf16.mxu1 %v5821_v1 }
 0x627   :  { %5141 = vmatpush3.bf16.msra.mxu1 %v6021_v23 }
 0x628   :  { %5148 = vmatprep.subr.bf16.mxu1 %v5821_v1 }
 0x6d9   :  { %v813_v38 = vpop.f32.mrb[16].mxu0 }
 0x6da   :  { %v817_v40 = vadd.f32 %v813_v38, %v6067_v48  ;;  %v4759_v41 = vpop.f32.mrb[17].mxu0 }
 0x6dc   :  { %5384 = vtanh.f32 %v817_v40  ;;  %v4456_v51 = vmul.f32 -1.442695, %v817_v40 }
 0x6e6   :  { %v5385_v42 = vpop.eup %5384 }
 0x6e7   :  { %902 = vrot.lane.b32.xlu1 %v5385_v42, %s5824_s4 }
 0x6f5   :  { %v888_v44 = vpop.f32.mrb[8].mxu1 }
 0x6f6   :  { %v892_v45 = vadd.f32 %v888_v44, %v6082_v3  ;;  %v4770_v47 = vpop.f32.mrb[9].mxu1 }
 0x6f8   :  { %5386 = vtanh.f32 %v892_v45  ;;  %v4457_v55 = vmul.f32 -1.442695, %v892_v45 }
 0x6f9   :  { %5388 = vpow2.f32 %v4456_v51 }
 0x702   :  { %v5387_v49 = vpop.eup %5386 }
 0x703   :  { %926 = vrot.lane.b32.xlu0 %v5387_v49, %s5824_s4  ;;  %v5389_v52 = vpop.eup %5388 }
 0x704   :  { %v896_v54 = vadd.f32 1.0, %v5389_v52 }
 0x706   :  { %5390 = vrcp.f32 %v896_v54 }
 0x707   :  { %5392 = vpow2.f32 %v4457_v55 }
 0x710   :  { %v5391_v48 = vpop.eup %5390 }
 0x711   :  { %v5393_v60 = vpop.eup %5392  ;;  %v900_v6 = vmul.f32 %v5391_v48, %v700_v22 }
 0x712   :  { %v920_v62 = vadd.f32 1.0, %v5393_v60 }
 0x714   :  { %5394 = vrcp.f32 %v920_v62 }
 0x71e   :  { %v5395_v3 = vpop.eup %5394 }
 0x71f   :  { %v924_v12 = vmul.f32 %v5395_v3, %v724_v27 }
 0x759   :  { %v903_v57 = vpop.permute.xlu1 %902 }
 0x75a   :  { %v905_v58 = vmul.f32 %v5391_v48, %v903_v57 }
 0x75c   :  { %907 = vrot.lane.b32.xlu1 %v905_v58, %s5825_s19 }
 0x775   :  { %v927_v0 = vpop.permute.xlu0 %926 }
 0x776   :  { %v929_v4 = vmul.f32 %v5395_v3, %v927_v0 }
 0x778   :  { %931 = vrot.lane.b32.xlu0 %v929_v4, %s5825_s19 }
 0x7ce   :  { %v908_v8 = vpop.permute.xlu1 %907 }
 0x7cf   :  { %v910_v11 = vadd.f32 %v908_v8, %v900_v6 }
 0x7d1   :  { %5396 = vtanh.f32 %v910_v11 }
 0x7db   :  { %v5397_v43 = vpop.eup %5396 }
 0x7dc   :  { %913 = vrot.lane.b32.xlu1 %v5397_v43, %s5824_s4 }
 0x7ea   :  { %v932_v13 = vpop.permute.xlu0 %931 }
 0x7eb   :  { %v934_v14 = vadd.f32 %v932_v13, %v924_v12 }
 0x7ed   :  { %5398 = vtanh.f32 %v934_v14 }
 0x7f7   :  { %v5399_v16 = vpop.eup %5398 }
 0x7f8   :  { %937 = vrot.lane.b32.xlu0 %v5399_v16, %s5824_s4 }
 0x84e   :  { %v914_v7 = vpop.permute.xlu1 %913 }
 0x84f   :  { %v916_v17 = vmul.f32 %v5391_v48, %v914_v7 }
 0x851   :  { %942 = vrot.lane.b32.xlu1 %v916_v17, %s5825_s19 }
 0x86a   :  { %v938_v18 = vpop.permute.xlu0 %937 }
 0x86b   :  { %v940_v20 = vmul.f32 %v5395_v3, %v938_v18 }
 0x86d   :  { %948 = vrot.lane.b32.xlu0 %v940_v20, %s5825_s19 }
 0x8c3   :  { %v943_v21 = vpop.permute.xlu1 %942 }
 0x8c4   :  { %946 = vst.msk [vmem:[#allocation4 + $0x10] sm:$0xff] %vm326_vm2, %v943_v21  ;;  %4780 = vmatmul.mubr.msk.f32.vlgmr.msra.gmra.mrb[18].mxu0 %vm326_vm2, %v943_v21 }
 0x8c5   :  { %5144 = vmatpush3.bf16.msra.mxu0 %v6002_v10  ;;  %4801 = vmatprep.mubr.msk.f32.mxu0 %vm5823_vm0, %v5822_v2 }
 0x8c6   :  { %5145 = vmatprep.subr.bf16.mxu0 %v5821_v1 }
 0x8c9   :  { %5147 = vmatpush3.bf16.msra.mxu0 %v6005_v15 }
 0x8ca   :  { %5154 = vmatprep.subr.bf16.mxu0 %v5821_v1 }
 0x8df   :  { %v949_v22 = vpop.permute.xlu0 %948 }
 0x8e0   :  { %952 = vst.msk [vmem:[#allocation5 + $0x28] sm:$0xff] %vm326_vm2, %v949_v22  ;;  %4791 = vmatmul.mubr.msk.f32.vlgmr.msra.gmra.mrb[10].mxu1 %vm326_vm2, %v949_v22 }
 0x8e1   :  { %5150 = vmatpush3.bf16.msra.mxu1 %v6012_v19  ;;  %4812 = vmatprep.mubr.msk.f32.mxu1 %vm5823_vm0, %v5822_v2 }
 0x8e2   :  { %5151 = vmatprep.subr.bf16.mxu1 %v5821_v1 }
 0x8e5   :  { %5153 = vmatpush3.bf16.msra.mxu1 %v6021_v23 }
 0x8e6   :  { %5160 = vmatprep.subr.bf16.mxu1 %v5821_v1 }
 0x997   :  { %v1023_v24 = vpop.f32.mrb[18].mxu0 }
 0x998   :  { %v1027_v25 = vadd.f32 %v1023_v24, %v6071_v53  ;;  %v4781_v26 = vpop.f32.mrb[19].mxu0 }
 0x99a   :  { %5400 = vtanh.f32 %v1027_v25  ;;  %v4460_v35 = vmul.f32 -1.442695, %v1027_v25 }
 0x9a4   :  { %v5401_v27 = vpop.eup %5400 }
 0x9a5   :  { %1112 = vrot.lane.b32.xlu1 %v5401_v27, %s5824_s4 }
 0x9b3   :  { %v1098_v28 = vpop.f32.mrb[10].mxu1 }
 0x9b4   :  { %v1102_v29 = vadd.f32 %v1098_v28, %v6077_v61  ;;  %v4792_v32 = vpop.f32.mrb[11].mxu1 }
 0x9b6   :  { %5402 = vtanh.f32 %v1102_v29  ;;  %v4461_v38 = vmul.f32 -1.442695, %v1102_v29 }
 0x9b7   :  { %5404 = vpow2.f32 %v4460_v35 }
 0x9c0   :  { %v5403_v34 = vpop.eup %5402 }
 0x9c1   :  { %1136 = vrot.lane.b32.xlu0 %v5403_v34, %s5824_s4  ;;  %v5405_v36 = vpop.eup %5404 }
 0x9c2   :  { %v1106_v37 = vadd.f32 1.0, %v5405_v36 }
 0x9c4   :  { %5406 = vrcp.f32 %v1106_v37 }
 0x9c5   :  { %5408 = vpow2.f32 %v4461_v38 }
 0x9ce   :  { %v5407_v53 = vpop.eup %5406 }
 0x9cf   :  { %v5409_v42 = vpop.eup %5408  ;;  %v1110_v49 = vmul.f32 %v5407_v53, %v910_v11 }
 0x9d0   :  { %v1130_v44 = vadd.f32 1.0, %v5409_v42 }
 0x9d2   :  { %5410 = vrcp.f32 %v1130_v44 }
 0x9dc   :  { %v5411_v61 = vpop.eup %5410 }
 0x9dd   :  { %v1134_v55 = vmul.f32 %v5411_v61, %v934_v14 }
 0xa17   :  { %v1113_v40 = vpop.permute.xlu1 %1112 }
 0xa18   :  { %v1115_v41 = vmul.f32 %v5407_v53, %v1113_v40 }
 0xa1a   :  { %1117 = vrot.lane.b32.xlu1 %v1115_v41, %s5825_s19 }
 0xa33   :  { %v1137_v45 = vpop.permute.xlu0 %1136 }
 0xa34   :  { %v1139_v47 = vmul.f32 %v5411_v61, %v1137_v45 }
 0xa36   :  { %1141 = vrot.lane.b32.xlu0 %v1139_v47, %s5825_s19 }
 0xa8c   :  { %v1118_v51 = vpop.permute.xlu1 %1117 }
 0xa8d   :  { %v1120_v52 = vadd.f32 %v1118_v51, %v1110_v49 }
 0xa8f   :  { %5412 = vtanh.f32 %v1120_v52 }
 0xa99   :  { %v5413_v54 = vpop.eup %5412 }
 0xa9a   :  { %1123 = vrot.lane.b32.xlu1 %v5413_v54, %s5824_s4 }
 0xaa8   :  { %v1142_v48 = vpop.permute.xlu0 %1141 }
 0xaa9   :  { %v1144_v57 = vadd.f32 %v1142_v48, %v1134_v55 }
 0xaab   :  { %5414 = vtanh.f32 %v1144_v57 }
 0xab5   :  { %v5415_v58 = vpop.eup %5414 }
 0xab6   :  { %1147 = vrot.lane.b32.xlu0 %v5415_v58, %s5824_s4 }
 0xb0c   :  { %v1124_v60 = vpop.permute.xlu1 %1123 }
 0xb0d   :  { %v1126_v62 = vmul.f32 %v5407_v53, %v1124_v60 }
 0xb0f   :  { %1152 = vrot.lane.b32.xlu1 %v1126_v62, %s5825_s19 }
 0xb28   :  { %v1148_v3 = vpop.permute.xlu0 %1147 }
 0xb29   :  { %v1150_v0 = vmul.f32 %v5411_v61, %v1148_v3 }
 0xb2b   :  { %1158 = vrot.lane.b32.xlu0 %v1150_v0, %s5825_s19 }
 0xb81   :  { %v1153_v4 = vpop.permute.xlu1 %1152 }
 0xb82   :  { %1156 = vst.msk [vmem:[#allocation4 + $0x18] sm:$0xff] %vm326_vm2, %v1153_v4  ;;  %4802 = vmatmul.mubr.msk.f32.vlgmr.msra.gmra.mrb[20].mxu0 %vm326_vm2, %v1153_v4 }
 0xb83   :  { %5156 = vmatpush3.bf16.msra.mxu0 %v6002_v10  ;;  %4823 = vmatprep.mubr.msk.f32.mxu0 %vm5823_vm0, %v5822_v2 }
 0xb84   :  { %5157 = vmatprep.subr.bf16.mxu0 %v5821_v1 }
 0xb87   :  { %5159 = vmatpush3.bf16.msra.mxu0 %v6005_v15 }
 0xb88   :  { %5166 = vmatprep.subr.bf16.mxu0 %v5821_v1 }
 0xb9d   :  { %v1159_v6 = vpop.permute.xlu0 %1158 }
 0xb9e   :  { %1162 = vst.msk [vmem:[#allocation5 + $0x20] sm:$0xff] %vm326_vm2, %v1159_v6  ;;  %4813 = vmatmul.mubr.msk.f32.vlgmr.msra.gmra.mrb[12].mxu1 %vm326_vm2, %v1159_v6 }
 0xb9f   :  { %5162 = vmatpush3.bf16.msra.mxu1 %v6012_v19  ;;  %4834 = vmatprep.mubr.msk.f32.mxu1 %vm5823_vm0, %v5822_v2 }
 0xba0   :  { %5163 = vmatprep.subr.bf16.mxu1 %v5821_v1 }
 0xba3   :  { %5165 = vmatpush3.bf16.msra.mxu1 %v6021_v23 }
 0xba4   :  { %5172 = vmatprep.subr.bf16.mxu1 %v5821_v1 }
 0xc55   :  { %v1233_v8 = vpop.f32.mrb[20].mxu0 }
 0xc56   :  { %v1237_v11 = vadd.f32 %v1233_v8, %v6075_v59  ;;  %v4803_v43 = vpop.f32.mrb[21].mxu0 }
 0xc58   :  { %5416 = vtanh.f32 %v1237_v11  ;;  %v4464_v17 = vmul.f32 -1.442695, %v1237_v11 }
 0xc62   :  { %v5417_v12 = vpop.eup %5416 }
 0xc63   :  { %1322 = vrot.lane.b32.xlu1 %v5417_v12, %s5824_s4 }
 0xc71   :  { %v1308_v13 = vpop.f32.mrb[12].mxu1 }
 0xc72   :  { %v1312_v14 = vadd.f32 %v1308_v13, %v6073_v56  ;;  %v4814_v16 = vpop.f32.mrb[13].mxu1 }
 0xc74   :  { %5418 = vtanh.f32 %v1312_v14  ;;  %v4465_v21 = vmul.f32 -1.442695, %v1312_v14 }
 0xc75   :  { %5420 = vpow2.f32 %v4464_v17 }
 0xc7e   :  { %v5419_v7 = vpop.eup %5418 }
 0xc7f   :  { %1346 = vrot.lane.b32.xlu0 %v5419_v7, %s5824_s4  ;;  %v5421_v18 = vpop.eup %5420 }
 0xc80   :  { %v1316_v20 = vadd.f32 1.0, %v5421_v18 }
 0xc82   :  { %5422 = vrcp.f32 %v1316_v20 }
 0xc83   :  { %5424 = vpow2.f32 %v4465_v21 }
 0xc8c   :  { %v5423_v59 = vpop.eup %5422 }
 0xc8d   :  { %v5425_v25 = vpop.eup %5424  ;;  %v1320_v29 = vmul.f32 %v5423_v59, %v1120_v52 }
 0xc8e   :  { %v1340_v26 = vadd.f32 1.0, %v5425_v25 }
 0xc90   :  { %5426 = vrcp.f32 %v1340_v26 }
 0xc9a   :  { %v5427_v56 = vpop.eup %5426 }
 0xc9b   :  { %v1344_v36 = vmul.f32 %v5427_v56, %v1144_v57 }
 0xcd5   :  { %v1323_v22 = vpop.permute.xlu1 %1322 }
 0xcd6   :  { %v1325_v24 = vmul.f32 %v5423_v59, %v1323_v22 }
 0xcd8   :  { %1327 = vrot.lane.b32.xlu1 %v1325_v24, %s5825_s19 }
 0xcf1   :  { %v1347_v27 = vpop.permute.xlu0 %1346 }
 0xcf2   :  { %v1349_v28 = vmul.f32 %v5427_v56, %v1347_v27 }
 0xcf4   :  { %1351 = vrot.lane.b32.xlu0 %v1349_v28, %s5825_s19 }
 0xd4a   :  { %v1328_v32 = vpop.permute.xlu1 %1327 }
 0xd4b   :  { %v1330_v34 = vadd.f32 %v1328_v32, %v1320_v29 }
 0xd4d   :  { %5428 = vtanh.f32 %v1330_v34 }
 0xd57   :  { %v5429_v35 = vpop.eup %5428 }
 0xd58   :  { %1333 = vrot.lane.b32.xlu1 %v5429_v35, %s5824_s4 }
 0xd66   :  { %v1352_v37 = vpop.permute.xlu0 %1351 }
 0xd67   :  { %v1354_v38 = vadd.f32 %v1352_v37, %v1344_v36 }
 0xd69   :  { %5430 = vtanh.f32 %v1354_v38 }
 0xd73   :  { %v5431_v53 = vpop.eup %5430 }
 0xd74   :  { %1357 = vrot.lane.b32.xlu0 %v5431_v53, %s5824_s4 }
 0xdca   :  { %v1334_v40 = vpop.permute.xlu1 %1333 }
 0xdcb   :  { %v1336_v41 = vmul.f32 %v5423_v59, %v1334_v40 }
 0xdcd   :  { %1362 = vrot.lane.b32.xlu1 %v1336_v41, %s5825_s19 }
 0xde6   :  { %v1358_v42 = vpop.permute.xlu0 %1357 }
 0xde7   :  { %v1360_v44 = vmul.f32 %v5427_v56, %v1358_v42 }
 0xde9   :  { %1368 = vrot.lane.b32.xlu0 %v1360_v44, %s5825_s19 }
 0xe3f   :  { %v1363_v61 = vpop.permute.xlu1 %1362 }
 0xe40   :  { %1366 = vst.msk [vmem:[#allocation4 + $0x20] sm:$0xff] %vm326_vm2, %v1363_v61  ;;  %4824 = vmatmul.mubr.msk.f32.vlgmr.msra.gmra.mrb[22].mxu0 %vm326_vm2, %v1363_v61 }
 0xe41   :  { %5168 = vmatpush3.bf16.msra.mxu0 %v6002_v10  ;;  %4845 = vmatprep.mubr.msk.f32.mxu0 %vm5823_vm0, %v5822_v2 }
 0xe42   :  { %5169 = vmatprep.subr.bf16.mxu0 %v5821_v1 }
 0xe45   :  { %5171 = vmatpush3.bf16.msra.mxu0 %v6005_v15 }
 0xe46   :  { %5178 = vmatprep.subr.bf16.mxu0 %v5821_v1 }
 0xe5b   :  { %v1369_v45 = vpop.permute.xlu0 %1368 }
 0xe5c   :  { %1372 = vst.msk [vmem:[#allocation5 + $0x18] sm:$0xff] %vm326_vm2, %v1369_v45  ;;  %4835 = vmatmul.mubr.msk.f32.vlgmr.msra.gmra.mrb[14].mxu1 %vm326_vm2, %v1369_v45 }
 0xe5d   :  { %5174 = vmatpush3.bf16.msra.mxu1 %v6012_v19  ;;  %4856 = vmatprep.mubr.msk.f32.mxu1 %vm5823_vm0, %v5822_v2 }
 0xe5e   :  { %5175 = vmatprep.subr.bf16.mxu1 %v5821_v1 }
 0xe61   :  { %5177 = vmatpush3.bf16.msra.mxu1 %v6021_v23 }
 0xe62   :  { %5184 = vmatprep.subr.bf16.mxu1 %v5821_v1 }
 0xf13   :  { %v1443_v47 = vpop.f32.mrb[22].mxu0 }
 0xf14   :  { %v1447_v49 = vadd.f32 %v1443_v47, %v6080_v63  ;;  %v4825_v51 = vpop.f32.mrb[23].mxu0 }
 0xf16   :  { %5432 = vtanh.f32 %v1447_v49  ;;  %v4468_v58 = vmul.f32 -1.442695, %v1447_v49 }
 0xf20   :  { %v5433_v52 = vpop.eup %5432 }
 0xf21   :  { %1532 = vrot.lane.b32.xlu1 %v5433_v52, %s5824_s4 }
 0xf2f   :  { %v1518_v54 = vpop.f32.mrb[14].mxu1 }
 0xf30   :  { %v1522_v55 = vadd.f32 %v1518_v54, %v6069_v50  ;;  %v4836_v48 = vpop.f32.mrb[15].mxu1 }
 0xf32   :  { %5434 = vtanh.f32 %v1522_v55  ;;  %v4469_v3 = vmul.f32 -1.442695, %v1522_v55 }
 0xf33   :  { %5436 = vpow2.f32 %v4468_v58 }
 0xf3c   :  { %v5435_v57 = vpop.eup %5434 }
 0xf3d   :  { %1556 = vrot.lane.b32.xlu0 %v5435_v57, %s5824_s4  ;;  %v5437_v60 = vpop.eup %5436 }
 0xf3e   :  { %v1526_v62 = vadd.f32 1.0, %v5437_v60 }
 0xf40   :  { %5438 = vrcp.f32 %v1526_v62 }
 0xf41   :  { %5440 = vpow2.f32 %v4469_v3 }
 0xf4a   :  { %v5439_v63 = vpop.eup %5438 }
 0xf4b   :  { %v5441_v6 = vpop.eup %5440  ;;  %v1530_v12 = vmul.f32 %v5439_v63, %v1330_v34 }
 0xf4c   :  { %v1550_v8 = vadd.f32 1.0, %v5441_v6 }
 0xf4e   :  { %5442 = vrcp.f32 %v1550_v8 }
 0xf58   :  { %v5443_v50 = vpop.eup %5442 }
 0xf59   :  { %v1554_v7 = vmul.f32 %v5443_v50, %v1354_v38 }
 0xf93   :  { %v1533_v0 = vpop.permute.xlu1 %1532 }
 0xf94   :  { %v1535_v4 = vmul.f32 %v5439_v63, %v1533_v0 }
 0xf96   :  { %1537 = vrot.lane.b32.xlu1 %v1535_v4, %s5825_s19 }
 0xfaf   :  { %v1557_v11 = vpop.permute.xlu0 %1556 }
 0xfb0   :  { %v1559_v43 = vmul.f32 %v5443_v50, %v1557_v11 }
 0xfb2   :  { %1561 = vrot.lane.b32.xlu0 %v1559_v43, %s5825_s19 }
0x1008   :  { %v1538_v13 = vpop.permute.xlu1 %1537 }
0x1009   :  { %v1540_v14 = vadd.f32 %v1538_v13, %v1530_v12 }
0x100b   :  { %5444 = vtanh.f32 %v1540_v14 }
0x1015   :  { %v5445_v16 = vpop.eup %5444 }
0x1016   :  { %1543 = vrot.lane.b32.xlu1 %v5445_v16, %s5824_s4 }
0x1024   :  { %v1562_v17 = vpop.permute.xlu0 %1561 }
0x1025   :  { %v1564_v18 = vadd.f32 %v1562_v17, %v1554_v7 }
0x1027   :  { %5446 = vtanh.f32 %v1564_v18 }
0x1031   :  { %v5447_v20 = vpop.eup %5446 }
0x1032   :  { %1567 = vrot.lane.b32.xlu0 %v5447_v20, %s5824_s4 }
0x1088   :  { %v1544_v21 = vpop.permute.xlu1 %1543 }
0x1089   :  { %v1546_v59 = vmul.f32 %v5439_v63, %v1544_v21 }
0x108b   :  { %1572 = vrot.lane.b32.xlu1 %v1546_v59, %s5825_s19 }
0x10a4   :  { %v1568_v22 = vpop.permute.xlu0 %1567 }
0x10a5   :  { %v1570_v24 = vmul.f32 %v5443_v50, %v1568_v22 }
0x10a7   :  { %1578 = vrot.lane.b32.xlu0 %v1570_v24, %s5825_s19 }
0x10fd   :  { %v1573_v25 = vpop.permute.xlu1 %1572 }
0x10fe   :  { %1576 = vst.msk [vmem:[#allocation4 + $0x28] sm:$0xff] %vm326_vm2, %v1573_v25  ;;  %4846 = vmatmul.mubr.msk.f32.vlgmr.msra.gmra.mrb[24].mxu0 %vm326_vm2, %v1573_v25 }
0x10ff   :  { %5180 = vmatpush3.bf16.msra.mxu0 %v6002_v10  ;;  %4867 = vmatprep.mubr.msk.f32.mxu0 %vm5823_vm0, %v5822_v2 }
0x1100   :  { %5181 = vmatprep.subr.bf16.mxu0 %v5821_v1 }
0x1103   :  { %5183 = vmatpush3.bf16.msra.mxu0 %v6005_v15 }
0x1119   :  { %v1579_v26 = vpop.permute.xlu0 %1578 }
0x111a   :  { %1582 = vst.msk [vmem:[#allocation5 + $0x10] sm:$0xff] %vm326_vm2, %v1579_v26  ;;  %4857 = vmatmul.mubr.msk.f32.vlgmr.msra.gmra.mrb[16].mxu1 %vm326_vm2, %v1579_v26 }
0x111b   :  { %5186 = vmatpush3.bf16.msra.mxu1 %v6012_v19  ;;  %4878 = vmatprep.mubr.msk.f32.mxu1 %vm5823_vm0, %v5822_v2 }
0x111c   :  { %5187 = vmatprep.subr.bf16.mxu1 %v5821_v1 }
0x111f   :  { %5189 = vmatpush3.bf16.msra.mxu1 %v6021_v23 }
0x1120   :  { %5206 = vmatprep.subr.bf16.mxu1 %v5821_v1 }
0x11d1   :  { %v1653_v10 = vpop.f32.mrb[24].mxu0 }
0x11d2   :  { %v1657_v56 = vadd.f32 %v1653_v10, %v6084_v5  ;;  %v4847_v15 = vpop.f32.mrb[25].mxu0 }
0x11d4   :  { %5448 = vtanh.f32 %v1657_v56  ;;  %v4472_v34 = vmul.f32 -1.442695, %v1657_v56 }
0x11de   :  { %v5449_v27 = vpop.eup %5448 }
0x11df   :  { %1742 = vrot.lane.b32.xlu1 %v5449_v27, %s5824_s4  ;;  %v2010_v27 = vld [vmem:[%s6776_s5 + $0x48] sm:$0xff] }
0x11ed   :  { %v1728_v28 = vpop.f32.mrb[16].mxu1 }
0x11ee   :  { %v1732_v19 = vadd.f32 %v1728_v28, %v6065_v46  ;;  %v4858_v29 = vpop.f32.mrb[17].mxu1  ;;  %v2012_v28 = vld [vmem:[%s6776_s5 + $0x58] sm:$0xff] }
0x11f0   :  { %5450 = vtanh.f32 %v1732_v19  ;;  %v4473_v36 = vmul.f32 -1.442695, %v1732_v19  ;;  %v5190_v19 = vpack.c.bf16 %v2012_v28, %v2010_v27 }
0x11f1   :  { %5452 = vpow2.f32 %v4472_v34  ;;  %v2009_v34 = vld [vmem:[%s6776_s5 + $0x40] sm:$0xff] }
0x11f2   :  { %5191 = vmatprep.subr.bf16.mxu0 %v5190_v19 }
0x11fa   :  { %v5451_v32 = vpop.eup %5450 }
0x11fb   :  { %1766 = vrot.lane.b32.xlu0 %v5451_v32, %s5824_s4  ;;  %v5453_v23 = vpop.eup %5452 }
0x11fc   :  { %v1736_v35 = vadd.f32 1.0, %v5453_v23  ;;  %v2011_v23 = vld [vmem:[%s6776_s5 + $0x50] sm:$0xff] }
0x11fe   :  { %5454 = vrcp.f32 %v1736_v35  ;;  %v5192_v35 = vpack.c.bf16 %v2011_v23, %v2009_v34 }
0x11ff   :  { %5456 = vpow2.f32 %v4473_v36  ;;  %v2014_v36 = vld [vmem:[%s6776_s5 + $0x68] sm:$0xff] }
0x1208   :  { %v5455_v5 = vpop.eup %5454 }
0x1209   :  { %v5457_v53 = vpop.eup %5456  ;;  %v1740_v44 = vmul.f32 %v5455_v5, %v1540_v14 }
0x120a   :  { %v1760_v40 = vadd.f32 1.0, %v5457_v53  ;;  %v2015_v53 = vld [vmem:[%s6776_s5 + $0x70] sm:$0xff] }
0x120c   :  { %5458 = vrcp.f32 %v1760_v40  ;;  %v2002_v40 = vld [vmem:[%s6776_s5 + $0x8] sm:$0xff] }
0x1216   :  { %v5459_v46 = vpop.eup %5458 }
0x1217   :  { %v1764_v49 = vmul.f32 %v5459_v46, %v1564_v18 }
0x1251   :  { %v1743_v37 = vpop.permute.xlu1 %1742 }
0x1252   :  { %v1745_v38 = vmul.f32 %v5455_v5, %v1743_v37  ;;  %v2013_v37 = vld [vmem:[%s6776_s5 + $0x60] sm:$0xff] }
0x1254   :  { %1747 = vrot.lane.b32.xlu1 %v1745_v38, %s5825_s19 }
0x126d   :  { %v1767_v41 = vpop.permute.xlu0 %1766 }
0x126e   :  { %v1769_v42 = vmul.f32 %v5459_v46, %v1767_v41  ;;  %v5196_v41 = vpack.c.bf16 %v2015_v53, %v2013_v37 }
0x1270   :  { %1771 = vrot.lane.b32.xlu0 %v1769_v42, %s5825_s19 }
0x12c6   :  { %v1748_v61 = vpop.permute.xlu1 %1747 }
0x12c7   :  { %v1750_v45 = vadd.f32 %v1748_v61, %v1740_v44 }
0x12c9   :  { %5460 = vtanh.f32 %v1750_v45 }
0x12d3   :  { %v5461_v47 = vpop.eup %5460 }
0x12d4   :  { %1753 = vrot.lane.b32.xlu1 %v5461_v47, %s5824_s4  ;;  %v2352_v47 = vld [vmem:[#allocation14 + $0x8] sm:$0xff] }
0x12e2   :  { %v1772_v51 = vpop.permute.xlu0 %1771 }
0x12e3   :  { %v1774_v52 = vadd.f32 %v1772_v51, %v1764_v49  ;;  %v2353_v51 = vld [vmem:[#allocation14 + $0x10] sm:$0xff] }
0x12e5   :  { %5462 = vtanh.f32 %v1774_v52 }
0x12ef   :  { %v5463_v54 = vpop.eup %5462 }
0x12f0   :  { %1777 = vrot.lane.b32.xlu0 %v5463_v54, %s5824_s4 }
0x1346   :  { %v1754_v55 = vpop.permute.xlu1 %1753 }
0x1347   :  { %v1756_v48 = vmul.f32 %v5455_v5, %v1754_v55  ;;  %v2016_v5 = vld [vmem:[%s6776_s5 + $0x78] sm:$0xff]  ;;  %v2355_v55 = vld [vmem:[#allocation15] sm:$0xff] }
0x1348   :  { %v5194_v38 = vpack.c.bf16 %v2016_v5, %v2014_v36 }
0x1349   :  { %1782 = vrot.lane.b32.xlu1 %v1756_v48, %s5825_s19  ;;  %v2356_v48 = vld [vmem:[#allocation15 + $0x8] sm:$0xff] }
0x1362   :  { %v1778_v57 = vpop.permute.xlu0 %1777 }
0x1363   :  { %v1780_v58 = vmul.f32 %v5459_v46, %v1778_v57  ;;  %v2004_v46 = vld [vmem:[%s6776_s5 + $0x18] sm:$0xff]  ;;  %v6318_v57 = vpack.c.bf16 %v2356_v48, %v2355_v55 }
0x1364   :  { %v5198_v42 = vpack.c.bf16 %v2004_v46, %v2002_v40 }
0x1365   :  { %1788 = vrot.lane.b32.xlu0 %v1780_v58, %s5825_s19  ;;  %v2357_v58 = vld [vmem:[#allocation15 + $0x10] sm:$0xff] }
0x13bb   :  { %v1783_v60 = vpop.permute.xlu1 %1782 }
0x13bc   :  { %1786 = vst.msk [vmem:[#allocation4 + $0x30] sm:$0xff] %vm326_vm2, %v1783_v60  ;;  %4868 = vmatmul.mubr.msk.f32.vlgmr.msra.gmra.mrb[26].mxu0 %vm326_vm2, %v1783_v60  ;;  %v2358_v60 = vld [vmem:[#allocation15 + $0x18] sm:$0xff] }
0x13bd   :  { %2121 = vmatprep.mubr.f32.mxu0 %v5822_v2  ;;  %5193 = vmatpush1.bf16.msra.mxu0 %v5192_v35 }
0x13be   :  { %5195 = vmatprep.subr.bf16.mxu0 %v5194_v38 }
0x13c1   :  { %5197 = vmatpush1.bf16.msra.mxu0 %v5196_v41 }
0x13c2   :  { %5199 = vmatprep.subr.bf16.mxu0 %v5198_v42 }
0x13d7   :  { %v1789_v62 = vpop.permute.xlu0 %1788 }
0x13d8   :  { %1792 = vst.msk [vmem:[#allocation5 + $0x8] sm:$0xff] %vm326_vm2, %v1789_v62  ;;  %4879 = vmatmul.mubr.msk.f32.vlgmr.msra.gmra.mrb[18].mxu1 %vm326_vm2, %v1789_v62  ;;  %v6322_v62 = vpack.c.bf16 %v2358_v60, %v2357_v58 }
0x13d9   :  { %4889 = vmatprep.mubr.msk.f32.mxu1 %vm5823_vm0, %v5822_v2 }
0x148f   :  { %v1863_v3 = vpop.f32.mrb[26].mxu0 }
0x1490   :  { %v1867_v63 = vadd.f32 %v1863_v3, %v6088_v9  ;;  %v4869_v0 = vpop.f32.mrb[27].mxu0 }
0x1491   :  { %v2001_v0 = vld [vmem:[%s6776_s5] sm:$0xff] }
0x1492   :  { %5464 = vtanh.f32 %v1867_v63  ;;  %v4476_v43 = vmul.f32 -1.442695, %v1867_v63 }
0x149c   :  { %v5465_v4 = vpop.eup %5464 }
0x149d   :  { %1951 = vrot.lane.b32.xlu1 %v5465_v4, %s5824_s4  ;;  %v2003_v4 = vld [vmem:[%s6776_s5 + $0x10] sm:$0xff] }
0x14ab   :  { %v1937_v6 = vpop.f32.mrb[18].mxu1 }
0x14ac   :  { %v1941_v8 = vadd.f32 %v1937_v6, %v6061_v39  ;;  %v4880_v50 = vpop.f32.mrb[19].mxu1  ;;  %v2006_v6 = vld [vmem:[%s6776_s5 + $0x28] sm:$0xff] }
0x14ad   :  { %v5200_v50 = vpack.c.bf16 %v2003_v4, %v2001_v0 }
0x14ae   :  { %5466 = vtanh.f32 %v1941_v8  ;;  %v4477_v14 = vmul.f32 -1.442695, %v1941_v8  ;;  %v2008_v8 = vld [vmem:[%s6776_s5 + $0x38] sm:$0xff] }
0x14af   :  { %5468 = vpow2.f32 %v4476_v43  ;;  %v2005_v43 = vld [vmem:[%s6776_s5 + $0x20] sm:$0xff] }
0x14b8   :  { %v5467_v11 = vpop.eup %5466 }
0x14b9   :  { %1975 = vrot.lane.b32.xlu0 %v5467_v11, %s5824_s4  ;;  %v5469_v12 = vpop.eup %5468  ;;  %v5202_v11 = vpack.c.bf16 %v2008_v8, %v2006_v6 }
0x14ba   :  { %v1945_v13 = vadd.f32 1.0, %v5469_v12  ;;  %v2007_v12 = vld [vmem:[%s6776_s5 + $0x30] sm:$0xff] }
0x14bc   :  { %5470 = vrcp.f32 %v1945_v13 }
0x14bd   :  { %5472 = vpow2.f32 %v4477_v14  ;;  %v5204_v14 = vpack.c.bf16 %v2007_v12, %v2005_v43 }
0x14c6   :  { %v5471_v9 = vpop.eup %5470 }
0x14c7   :  { %v5473_v17 = vpop.eup %5472  ;;  %v1949_v59 = vmul.f32 %v5471_v9, %v1750_v45  ;;  %v2351_v45 = vld [vmem:[#allocation14] sm:$0xff] }
0x14c8   :  { %v1969_v18 = vadd.f32 1.0, %v5473_v17  ;;  %v6307_v49 = vpack.c.bf16 %v2352_v47, %v2351_v45  ;;  %v2029_v17 = vld [vmem:[#allocation5 + $0x20] sm:$0xff] }
0x14ca   :  { %5474 = vrcp.f32 %v1969_v18  ;;  %5208 = vmatpush3.bf16.msra.mxu1 %v6307_v49  ;;  %v2030_v18 = vld [vmem:[#allocation5 + $0x28] sm:$0xff] }
0x14cb   :  { %5209 = vmatprep.subr.bf16.mxu1 %v5821_v1 }
0x14d4   :  { %v5475_v39 = vpop.eup %5474 }
0x14d5   :  { %v1973_v26 = vmul.f32 %v5475_v39, %v1774_v52  ;;  %v2354_v52 = vld [vmem:[#allocation14 + $0x18] sm:$0xff] }
0x14d6   :  { %v6311_v54 = vpack.c.bf16 %v2354_v52, %v2353_v51 }
0x14d8   :  { %5211 = vmatpush3.bf16.msra.mxu1 %v6311_v54 }
0x14d9   :  { %5212 = vmatprep.subr.bf16.mxu1 %v5821_v1 }
0x14db   :  { %4890 = vmatmul.mubr.f32.vlgmr.msra.gmra.mrb[20].mxu1 %v5822_v2 }
0x14dc   :  { %4900 = vmatprep.mubr.msk.f32.mxu1 %vm5823_vm0, %v5822_v2  ;;  %5214 = vmatpush3.bf16.msra.mxu1 %v6318_v57 }
0x14dd   :  { %5215 = vmatprep.subr.bf16.mxu1 %v5821_v1 }
0x14e0   :  { %5217 = vmatpush3.bf16.msra.mxu1 %v6322_v62 }
0x14e1   :  { %5218 = vmatprep.subr.bf16.mxu1 %v5821_v1 }
0x14e3   :  { %4901 = vmatmul.mubr.f32.vlgmr.msra.gmra.mrb[22].mxu1 %v5822_v2 }
0x14e4   :  { %5220 = vmatpush3.bf16.msra.mxu1 %v6307_v49  ;;  %4911 = vmatprep.mubr.msk.f32.mxu1 %vm5823_vm0, %v5822_v2 }
0x14e5   :  { %5221 = vmatprep.subr.bf16.mxu1 %v5821_v1 }
0x14e8   :  { %5223 = vmatpush3.bf16.msra.mxu1 %v6311_v54 }
0x14e9   :  { %5224 = vmatprep.subr.bf16.mxu1 %v5821_v1 }
0x150f   :  { %v1952_v16 = vpop.permute.xlu1 %1951 }
0x1510   :  { %v1954_v7 = vmul.f32 %v5471_v9, %v1952_v16  ;;  %v2027_v16 = vld [vmem:[#allocation5 + $0x10] sm:$0xff] }
0x1512   :  { %1956 = vrot.lane.b32.xlu1 %v1954_v7, %s5825_s19  ;;  %v2028_v7 = vld [vmem:[#allocation5 + $0x18] sm:$0xff] }
0x152b   :  { %v1976_v20 = vpop.permute.xlu0 %1975 }
0x152c   :  { %v1978_v21 = vmul.f32 %v5475_v39, %v1976_v20  ;;  %v2032_v20 = vld [vmem:[#allocation5 + $0x38] sm:$0xff] }
0x152e   :  { %1980 = vrot.lane.b32.xlu0 %v1978_v21, %s5825_s19  ;;  %v2017_v21 = vld [vmem:[#allocation4] sm:$0xff] }
0x1584   :  { %v1957_v22 = vpop.permute.xlu1 %1956 }
0x1585   :  { %v1959_v24 = vadd.f32 %v1957_v22, %v1949_v59  ;;  %v2018_v59 = vld [vmem:[#allocation4 + $0x8] sm:$0xff]  ;;  %v2019_v22 = vld [vmem:[#allocation4 + $0x10] sm:$0xff] }
0x1587   :  { %5476 = vtanh.f32 %v1959_v24  ;;  %v2020_v24 = vld [vmem:[#allocation4 + $0x18] sm:$0xff] }
0x1591   :  { %v5477_v25 = vpop.eup %5476 }
0x1592   :  { %1962 = vrot.lane.b32.xlu1 %v5477_v25, %s5824_s4  ;;  %v2021_v25 = vld [vmem:[#allocation4 + $0x20] sm:$0xff] }
0x15a0   :  { %v1981_v10 = vpop.permute.xlu0 %1980 }
0x15a1   :  { %v1983_v56 = vadd.f32 %v1981_v10, %v1973_v26  ;;  %v2022_v26 = vld [vmem:[#allocation4 + $0x28] sm:$0xff]  ;;  %v2023_v10 = vld [vmem:[#allocation4 + $0x30] sm:$0xff] }
0x15a3   :  { %5478 = vtanh.f32 %v1983_v56 }
0x15ad   :  { %v5479_v15 = vpop.eup %5478 }
0x15ae   :  { %1986 = vrot.lane.b32.xlu0 %v5479_v15, %s5824_s4  ;;  %v2426_v15 = vpop.f32.mrb[20].mxu1 }
0x15af   :  { %v4891_v27 = vpop.f32.mrb[21].mxu1 }
0x15b6   :  { %v2498_v28 = vpop.f32.mrb[22].mxu1 }
0x15b7   :  { %v4902_v19 = vpop.f32.mrb[23].mxu1 }
0x1604   :  { %v1963_v29 = vpop.permute.xlu1 %1962 }
0x1605   :  { %v1965_v32 = vmul.f32 %v5471_v9, %v1963_v29  ;;  %v2026_v9 = vld [vmem:[#allocation5 + $0x8] sm:$0xff]  ;;  %v2307_v29 = vld [vmem:[#allocation17] sm:$0x3] }
0x1606   :  { %v2316_v34 = vrot.slane %v2307_v29, %v159_v33 }
0x1607   :  { %1991 = vrot.lane.b32.xlu1 %v1965_v32, %s5825_s19  ;;  %v2312_v32 = vrot.slane %v2307_v29, %v155_v31 }
0x1620   :  { %v1987_v44 = vpop.permute.xlu0 %1986 }
0x1621   :  { %v1989_v61 = vmul.f32 %v5475_v39, %v1987_v44  ;;  %v2031_v39 = vld [vmem:[#allocation5 + $0x30] sm:$0xff] }
0x1623   :  { %1997 = vrot.lane.b32.xlu0 %v1989_v61, %s5825_s19 }
0x1679   :  { %v1992_v3 = vpop.permute.xlu1 %1991 }
0x167a   :  { %1995 = vst.msk [vmem:[#allocation4 + $0x38] sm:$0xff] %vm326_vm2, %v1992_v3 }
0x1681   :  { %v2024_v56 = vld [vmem:[#allocation4 + $0x38] sm:$0xff] }
0x1695   :  { %v1998_v63 = vpop.permute.xlu0 %1997 }
0x1696   :  { %2000 = vst.msk [vmem:[#allocation5] sm:$0xff] %vm326_vm2, %v1998_v63 }
0x169d   :  { %v2025_v13 = vld [vmem:[#allocation5] sm:$0xff] }
0x169e   :  { %4478 = vmatmul.mubr.msk.f32.vlgmr.msra.gmra.mrb[28].mxu0 %vm326_vm2, %v2025_v13 }
0x169f   :  { %5201 = vmatpush1.bf16.msra.mxu0 %v5200_v50  ;;  %2127 = vmatprep.mubr.f32.mxu0 %v5822_v2 }
0x16a0   :  { %5203 = vmatprep.subr.bf16.mxu0 %v5202_v11 }
0x16a2   :  { %4479 = vmatmul.mubr.msk.f32.gmra.mrb[30].mxu0 %vm326_vm2, %v2026_v9 }
0x16a3   :  { %2133 = vmatprep.mubr.f32.mxu0 %v5822_v2  ;;  %5205 = vmatpush1.bf16.msra.mxu0 %v5204_v14 }
0x16a4   :  { %5254 = vmatprep.subr.bf16.mxu0 %v5821_v1 }
0x16a6   :  { %4480 = vmatmul.mubr.msk.f32.gmra.mrb[32].mxu0 %vm326_vm2, %v2027_v16 }
0x16a7   :  { %2139 = vmatprep.mubr.f32.mxu0 %v5822_v2 }
0x16aa   :  { %4481 = vmatmul.mubr.msk.f32.gmra.mrb[34].mxu0 %vm326_vm2, %v2028_v7 }
0x16ab   :  { %2145 = vmatprep.mubr.f32.mxu0 %v5822_v2 }
0x16ae   :  { %4482 = vmatmul.mubr.msk.f32.gmra.mrb[36].mxu0 %vm326_vm2, %v2029_v17 }
0x16af   :  { %2151 = vmatprep.mubr.f32.mxu0 %v5822_v2 }
0x16b2   :  { %4483 = vmatmul.mubr.msk.f32.gmra.mrb[38].mxu0 %vm326_vm2, %v2030_v18 }
0x16b3   :  { %2157 = vmatprep.mubr.f32.mxu0 %v5822_v2 }
0x16b6   :  { %4484 = vmatmul.mubr.msk.f32.gmra.mrb[40].mxu0 %vm326_vm2, %v2031_v39 }
0x16b7   :  { %2163 = vmatprep.mubr.f32.mxu0 %v5822_v2 }
0x16ba   :  { %4485 = vmatmul.mubr.msk.f32.gmra.mrb[42].mxu0 %vm326_vm2, %v2032_v20 }
0x16bb   :  { %2258 = vmatprep.mubr.f32.mxu0 %v5822_v2 }
0x16be   :  { %4486 = vmatmul.mubr.msk.f32.vlgmr.msra.gmra.mrb[28].mxu0 %vm326_vm2, %v2017_v21 }
0x16bf   :  { %2264 = vmatprep.mubr.f32.mxu0 %v5822_v2  ;;  %5256 = vmatpush3.bf16.msra.mxu0 %v6307_v49 }
0x16c0   :  { %5257 = vmatprep.subr.bf16.mxu0 %v5821_v1 }
0x16c2   :  { %4487 = vmatmul.mubr.msk.f32.gmra.mrb[30].mxu0 %vm326_vm2, %v2018_v59 }
0x16c3   :  { %2270 = vmatprep.mubr.f32.mxu0 %v5822_v2  ;;  %5259 = vmatpush3.bf16.msra.mxu0 %v6311_v54 }
0x16c4   :  { %5266 = vmatprep.subr.bf16.mxu0 %v5821_v1 }
0x16c6   :  { %4488 = vmatmul.mubr.msk.f32.gmra.mrb[32].mxu0 %vm326_vm2, %v2019_v22 }
0x16c7   :  { %2276 = vmatprep.mubr.f32.mxu0 %v5822_v2 }
0x16ca   :  { %4489 = vmatmul.mubr.msk.f32.gmra.mrb[34].mxu0 %vm326_vm2, %v2020_v24 }
0x16cb   :  { %2282 = vmatprep.mubr.f32.mxu0 %v5822_v2 }
0x16ce   :  { %4490 = vmatmul.mubr.msk.f32.gmra.mrb[36].mxu0 %vm326_vm2, %v2021_v25 }
0x16cf   :  { %2288 = vmatprep.mubr.f32.mxu0 %v5822_v2 }
0x16d2   :  { %4491 = vmatmul.mubr.msk.f32.gmra.mrb[38].mxu0 %vm326_vm2, %v2022_v26 }
0x16d3   :  { %2294 = vmatprep.mubr.f32.mxu0 %v5822_v2 }
0x16d6   :  { %4492 = vmatmul.mubr.msk.f32.gmra.mrb[40].mxu0 %vm326_vm2, %v2023_v10 }
0x16d7   :  { %2300 = vmatprep.mubr.f32.mxu0 %v5822_v2 }
0x16da   :  { %4493 = vmatmul.mubr.msk.f32.gmra.mrb[42].mxu0 %vm326_vm2, %v2024_v56 }
0x16db   :  { %4977 = vmatprep.mubr.msk.f32.mxu0 %vm5823_vm0, %v5822_v2 }
0x1791   :  { %v2260_v23 = vpop.f32.mrb[28].mxu0 }
0x1792   :  { %v2319_v35 = vadd.f32 %v2312_v32, %v2260_v23  ;;  %v2262_v36 = vpop.f32.mrb[29].mxu0 }
0x1793   :  { %v6395_v5 = vadd.f32 %v2316_v34, %v2262_v36 }
0x1794   :  { %v2430_v37 = vadd.f32 %v2426_v15, %v2319_v35 }
0x1795   :  { %v2266_v38 = vpop.f32.mrb[30].mxu0 }
0x1796   :  { %5480 = vtanh.f32 %v2430_v37  ;;  %v6397_v53 = vadd.f32 %v2312_v32, %v2266_v38  ;;  %v2268_v40 = vpop.f32.mrb[31].mxu0  ;;  %v4494_v9 = vmul.f32 -1.442695, %v2430_v37 }
0x1797   :  { %v6399_v46 = vadd.f32 %v2316_v34, %v2268_v40 }
0x1799   :  { %v2272_v41 = vpop.f32.mrb[32].mxu0 }
0x179a   :  { %v6401_v42 = vadd.f32 %v2312_v32, %v2272_v41  ;;  %v2274_v31 = vpop.f32.mrb[33].mxu0 }
0x179b   :  { %v6403_v44 = vadd.f32 %v2316_v34, %v2274_v31 }
0x179d   :  { %v2278_v30 = vpop.f32.mrb[34].mxu0 }
0x179e   :  { %v6405_v33 = vadd.f32 %v2312_v32, %v2278_v30  ;;  %v2280_v61 = vpop.f32.mrb[35].mxu0 }
0x179f   :  { %v6407_v45 = vadd.f32 %v2316_v34, %v2280_v61 }
0x17a0   :  { %v5481_v47 = vpop.eup %5480 }
0x17a1   :  { %2512 = vrot.lane.b32.xlu0 %v5481_v47, %s5824_s4  ;;  %v2284_v51 = vpop.f32.mrb[36].mxu0 }
0x17a2   :  { %v6410_v52 = vadd.f32 %v2312_v32, %v2284_v51  ;;  %v2286_v55 = vpop.f32.mrb[37].mxu0 }
0x17a3   :  { %v6412_v48 = vadd.f32 %v2316_v34, %v2286_v55 }
0x17a5   :  { %v2290_v58 = vpop.f32.mrb[38].mxu0 }
0x17a6   :  { %v6414_v60 = vadd.f32 %v2312_v32, %v2290_v58  ;;  %v2292_v3 = vpop.f32.mrb[39].mxu0 }
0x17a7   :  { %v6416_v63 = vadd.f32 %v2316_v34, %v2292_v3 }
0x17a9   :  { %v2296_v0 = vpop.f32.mrb[40].mxu0 }
0x17aa   :  { %v6418_v4 = vadd.f32 %v2312_v32, %v2296_v0  ;;  %v2298_v6 = vpop.f32.mrb[41].mxu0 }
0x17ab   :  { %v6420_v8 = vadd.f32 %v2316_v34, %v2298_v6 }
0x17ad   :  { %v2302_v50 = vpop.f32.mrb[42].mxu0 }
0x17ae   :  { %v6422_v11 = vadd.f32 %v2312_v32, %v2302_v50  ;;  %v2304_v43 = vpop.f32.mrb[43].mxu0 }
0x17af   :  { %v2334_v12 = vadd.f32 %v2316_v34, %v2304_v43 }
0x17b1   :  { %v2502_v13 = vadd.f32 %v2498_v28, %v2334_v12 }
0x17b3   :  { %5482 = vtanh.f32 %v2502_v13  ;;  %v4495_v17 = vmul.f32 -1.442695, %v2502_v13 }
0x17b4   :  { %5484 = vpow2.f32 %v4494_v9 }
0x17bd   :  { %v5483_v14 = vpop.eup %5482 }
0x17be   :  { %2536 = vrot.lane.b32.xlu1 %v5483_v14, %s5824_s4  ;;  %v5485_v16 = vpop.eup %5484 }
0x17bf   :  { %v2506_v7 = vadd.f32 1.0, %v5485_v16 }
0x17c1   :  { %5486 = vrcp.f32 %v2506_v7 }
0x17c2   :  { %5488 = vpow2.f32 %v4495_v17 }
0x17cb   :  { %v5487_v18 = vpop.eup %5486 }
0x17cc   :  { %v5489_v21 = vpop.eup %5488  ;;  %v2510_v26 = vmul.f32 0.0, %v5487_v18 }
0x17cd   :  { %v2530_v59 = vadd.f32 1.0, %v5489_v21 }
0x17cf   :  { %5490 = vrcp.f32 %v2530_v59 }
0x17d9   :  { %v5491_v22 = vpop.eup %5490 }
0x17da   :  { %v2534_v27 = vmul.f32 0.0, %v5491_v22 }
0x1813   :  { %v2513_v39 = vpop.permute.xlu0 %2512 }
0x1814   :  { %v2515_v20 = vmul.f32 %v5487_v18, %v2513_v39 }
0x1816   :  { %2517 = vrot.lane.b32.xlu0 %v2515_v20, %s5825_s19 }
0x1830   :  { %v2537_v24 = vpop.permute.xlu1 %2536 }
0x1831   :  { %v2539_v25 = vmul.f32 %v5491_v22, %v2537_v24 }
0x1833   :  { %2541 = vrot.lane.b32.xlu1 %v2539_v25, %s5825_s19 }
0x1888   :  { %v2518_v10 = vpop.permute.xlu0 %2517 }
0x1889   :  { %v2520_v56 = vadd.f32 %v2518_v10, %v2510_v26 }
0x188b   :  { %5492 = vtanh.f32 %v2520_v56 }
0x1895   :  { %v5493_v15 = vpop.eup %5492 }
0x1896   :  { %2523 = vrot.lane.b32.xlu0 %v5493_v15, %s5824_s4 }
0x18a5   :  { %v2542_v28 = vpop.permute.xlu1 %2541 }
0x18a6   :  { %v2544_v19 = vadd.f32 %v2542_v28, %v2534_v27 }
0x18a8   :  { %5494 = vtanh.f32 %v2544_v19 }
0x18b2   :  { %v5495_v29 = vpop.eup %5494 }
0x18b3   :  { %2547 = vrot.lane.b32.xlu1 %v5495_v29, %s5824_s4 }
0x1908   :  { %v2524_v32 = vpop.permute.xlu0 %2523 }
0x1909   :  { %v2526_v34 = vmul.f32 %v5487_v18, %v2524_v32 }
0x190b   :  { %2552 = vrot.lane.b32.xlu0 %v2526_v34, %s5825_s19 }
0x1925   :  { %v2548_v23 = vpop.permute.xlu1 %2547 }
0x1926   :  { %v2550_v35 = vmul.f32 %v5491_v22, %v2548_v23 }
0x1928   :  { %2557 = vrot.lane.b32.xlu1 %v2550_v35, %s5825_s19 }
0x197d   :  { %v2553_v36 = vpop.permute.xlu0 %2552 }
0x197e   :  { %2555 = vst.msk [vmem:[#allocation4] sm:$0xff] %vm326_vm2, %v2553_v36  ;;  %4912 = vmatmul.mubr.msk.f32.vlgmr.msra.gmra.mrb[24].mxu1 %vm326_vm2, %v2553_v36 }
0x197f   :  { %5226 = vmatpush3.bf16.msra.mxu1 %v6318_v57  ;;  %4922 = vmatprep.mubr.msk.f32.mxu1 %vm5823_vm0, %v5822_v2 }
0x1980   :  { %5227 = vmatprep.subr.bf16.mxu1 %v5821_v1 }
0x1983   :  { %5229 = vmatpush3.bf16.msra.mxu1 %v6322_v62 }
0x1984   :  { %5230 = vmatprep.subr.bf16.mxu1 %v5821_v1 }
0x199a   :  { %v2558_v37 = vpop.permute.xlu1 %2557 }
0x199b   :  { %2560 = vst.msk [vmem:[#allocation5 + $0x38] sm:$0xff] %vm326_vm2, %v2558_v37  ;;  %4923 = vmatmul.mubr.msk.f32.vlgmr.msra.gmra.mrb[26].mxu1 %vm326_vm2, %v2558_v37 }
0x199c   :  { %5232 = vmatpush3.bf16.msra.mxu1 %v6307_v49  ;;  %4933 = vmatprep.mubr.msk.f32.mxu1 %vm5823_vm0, %v5822_v2 }
0x199d   :  { %5233 = vmatprep.subr.bf16.mxu1 %v5821_v1 }
0x19a0   :  { %5235 = vmatpush3.bf16.msra.mxu1 %v6311_v54 }
0x19a1   :  { %5236 = vmatprep.subr.bf16.mxu1 %v5821_v1 }
0x1a51   :  { %v2630_v38 = vpop.f32.mrb[24].mxu1 }
0x1a52   :  { %v2634_v40 = vadd.f32 %v2630_v38, %v6397_v53  ;;  %v4913_v41 = vpop.f32.mrb[25].mxu1 }
0x1a54   :  { %5496 = vtanh.f32 %v2634_v40  ;;  %v4498_v55 = vmul.f32 -1.442695, %v2634_v40 }
0x1a5e   :  { %v5497_v31 = vpop.eup %5496 }
0x1a5f   :  { %2718 = vrot.lane.b32.xlu0 %v5497_v31, %s5824_s4 }
0x1a6e   :  { %v2704_v30 = vpop.f32.mrb[26].mxu1 }
0x1a6f   :  { %v2708_v61 = vadd.f32 %v2704_v30, %v6420_v8  ;;  %v4924_v47 = vpop.f32.mrb[27].mxu1 }
0x1a71   :  { %5498 = vtanh.f32 %v2708_v61  ;;  %v4499_v0 = vmul.f32 -1.442695, %v2708_v61 }
0x1a72   :  { %5500 = vpow2.f32 %v4498_v55 }
0x1a7b   :  { %v5499_v51 = vpop.eup %5498 }
0x1a7c   :  { %2742 = vrot.lane.b32.xlu1 %v5499_v51, %s5824_s4  ;;  %v5501_v58 = vpop.eup %5500 }
0x1a7d   :  { %v2712_v3 = vadd.f32 1.0, %v5501_v58 }
0x1a7f   :  { %5502 = vrcp.f32 %v2712_v3 }
0x1a80   :  { %5504 = vpow2.f32 %v4499_v0 }
0x1a89   :  { %v5503_v53 = vpop.eup %5502 }
0x1a8a   :  { %v5505_v43 = vpop.eup %5504  ;;  %v2716_v9 = vmul.f32 %v5503_v53, %v2520_v56 }
0x1a8b   :  { %v2736_v12 = vadd.f32 1.0, %v5505_v43 }
0x1a8d   :  { %5506 = vrcp.f32 %v2736_v12 }
0x1a97   :  { %v5507_v8 = vpop.eup %5506 }
0x1a98   :  { %v2740_v18 = vmul.f32 %v5507_v8, %v2544_v19 }
0x1ad1   :  { %v2719_v6 = vpop.permute.xlu0 %2718 }
0x1ad2   :  { %v2721_v50 = vmul.f32 %v5503_v53, %v2719_v6 }
0x1ad4   :  { %2723 = vrot.lane.b32.xlu0 %v2721_v50, %s5825_s19 }
0x1aee   :  { %v2743_v13 = vpop.permute.xlu1 %2742 }
0x1aef   :  { %v2745_v14 = vmul.f32 %v5507_v8, %v2743_v13 }
0x1af1   :  { %2747 = vrot.lane.b32.xlu1 %v2745_v14, %s5825_s19 }
0x1b46   :  { %v2724_v16 = vpop.permute.xlu0 %2723 }
0x1b47   :  { %v2726_v7 = vadd.f32 %v2724_v16, %v2716_v9 }
0x1b49   :  { %5508 = vtanh.f32 %v2726_v7 }
0x1b53   :  { %v5509_v17 = vpop.eup %5508 }
0x1b54   :  { %2729 = vrot.lane.b32.xlu0 %v5509_v17, %s5824_s4 }
0x1b63   :  { %v2748_v39 = vpop.permute.xlu1 %2747 }
0x1b64   :  { %v2750_v20 = vadd.f32 %v2748_v39, %v2740_v18 }
0x1b66   :  { %5510 = vtanh.f32 %v2750_v20 }
0x1b70   :  { %v5511_v21 = vpop.eup %5510 }
0x1b71   :  { %2753 = vrot.lane.b32.xlu1 %v5511_v21, %s5824_s4 }
0x1bc6   :  { %v2730_v59 = vpop.permute.xlu0 %2729 }
0x1bc7   :  { %v2732_v22 = vmul.f32 %v5503_v53, %v2730_v59 }
0x1bc9   :  { %2758 = vrot.lane.b32.xlu0 %v2732_v22, %s5825_s19 }
0x1be3   :  { %v2754_v24 = vpop.permute.xlu1 %2753 }
0x1be4   :  { %v2756_v25 = vmul.f32 %v5507_v8, %v2754_v24 }
0x1be6   :  { %2763 = vrot.lane.b32.xlu1 %v2756_v25, %s5825_s19 }
0x1c3b   :  { %v2759_v26 = vpop.permute.xlu0 %2758 }
0x1c3c   :  { %2761 = vst.msk [vmem:[#allocation4 + $0x8] sm:$0xff] %vm326_vm2, %v2759_v26  ;;  %4934 = vmatmul.mubr.msk.f32.vlgmr.msra.gmra.mrb[28].mxu1 %vm326_vm2, %v2759_v26 }
0x1c3d   :  { %5238 = vmatpush3.bf16.msra.mxu1 %v6318_v57  ;;  %4944 = vmatprep.mubr.msk.f32.mxu1 %vm5823_vm0, %v5822_v2 }
0x1c3e   :  { %5239 = vmatprep.subr.bf16.mxu1 %v5821_v1 }
0x1c41   :  { %5241 = vmatpush3.bf16.msra.mxu1 %v6322_v62 }
0x1c42   :  { %5242 = vmatprep.subr.bf16.mxu1 %v5821_v1 }
0x1c58   :  { %v2764_v10 = vpop.permute.xlu1 %2763 }
0x1c59   :  { %2766 = vst.msk [vmem:[#allocation5 + $0x30] sm:$0xff] %vm326_vm2, %v2764_v10  ;;  %4945 = vmatmul.mubr.msk.f32.vlgmr.msra.gmra.mrb[30].mxu1 %vm326_vm2, %v2764_v10 }
0x1c5a   :  { %5244 = vmatpush3.bf16.msra.mxu1 %v6307_v49  ;;  %4955 = vmatprep.mubr.msk.f32.mxu1 %vm5823_vm0, %v5822_v2 }
0x1c5b   :  { %5245 = vmatprep.subr.bf16.mxu1 %v5821_v1 }
0x1c5e   :  { %5247 = vmatpush3.bf16.msra.mxu1 %v6311_v54 }
0x1c5f   :  { %5248 = vmatprep.subr.bf16.mxu1 %v5821_v1 }
0x1d0f   :  { %v2836_v56 = vpop.f32.mrb[28].mxu1 }
0x1d10   :  { %v2840_v15 = vadd.f32 %v2836_v56, %v6401_v42  ;;  %v4935_v27 = vpop.f32.mrb[29].mxu1 }
0x1d12   :  { %5512 = vtanh.f32 %v2840_v15  ;;  %v4502_v23 = vmul.f32 -1.442695, %v2840_v15 }
0x1d1c   :  { %v5513_v28 = vpop.eup %5512 }
0x1d1d   :  { %2924 = vrot.lane.b32.xlu0 %v5513_v28, %s5824_s4 }
0x1d2c   :  { %v2910_v19 = vpop.f32.mrb[30].mxu1 }
0x1d2d   :  { %v2914_v29 = vadd.f32 %v2910_v19, %v6416_v63  ;;  %v4946_v32 = vpop.f32.mrb[31].mxu1 }
0x1d2f   :  { %5514 = vtanh.f32 %v2914_v29  ;;  %v4503_v37 = vmul.f32 -1.442695, %v2914_v29 }
0x1d30   :  { %5516 = vpow2.f32 %v4502_v23 }
0x1d39   :  { %v5515_v34 = vpop.eup %5514 }
0x1d3a   :  { %2948 = vrot.lane.b32.xlu1 %v5515_v34, %s5824_s4  ;;  %v5517_v35 = vpop.eup %5516 }
0x1d3b   :  { %v2918_v36 = vadd.f32 1.0, %v5517_v35 }
0x1d3d   :  { %5518 = vrcp.f32 %v2918_v36 }
0x1d3e   :  { %5520 = vpow2.f32 %v4503_v37 }
0x1d47   :  { %v5519_v42 = vpop.eup %5518 }
0x1d48   :  { %v5521_v41 = vpop.eup %5520  ;;  %v2922_v47 = vmul.f32 %v5519_v42, %v2726_v7 }
0x1d49   :  { %v2942_v31 = vadd.f32 1.0, %v5521_v41 }
0x1d4b   :  { %5522 = vrcp.f32 %v2942_v31 }
0x1d55   :  { %v5523_v63 = vpop.eup %5522 }
0x1d56   :  { %v2946_v3 = vmul.f32 %v5523_v63, %v2750_v20 }
0x1d8f   :  { %v2925_v38 = vpop.permute.xlu0 %2924 }
0x1d90   :  { %v2927_v40 = vmul.f32 %v5519_v42, %v2925_v38 }
0x1d92   :  { %2929 = vrot.lane.b32.xlu0 %v2927_v40, %s5825_s19 }
0x1dac   :  { %v2949_v30 = vpop.permute.xlu1 %2948 }
0x1dad   :  { %v2951_v61 = vmul.f32 %v5523_v63, %v2949_v30 }
0x1daf   :  { %2953 = vrot.lane.b32.xlu1 %v2951_v61, %s5825_s19 }
0x1e04   :  { %v2930_v51 = vpop.permute.xlu0 %2929 }
0x1e05   :  { %v2932_v55 = vadd.f32 %v2930_v51, %v2922_v47 }
0x1e07   :  { %5524 = vtanh.f32 %v2932_v55 }
0x1e11   :  { %v5525_v58 = vpop.eup %5524 }
0x1e12   :  { %2935 = vrot.lane.b32.xlu0 %v5525_v58, %s5824_s4 }
0x1e21   :  { %v2954_v0 = vpop.permute.xlu1 %2953 }
0x1e22   :  { %v2956_v53 = vadd.f32 %v2954_v0, %v2946_v3 }
0x1e24   :  { %5526 = vtanh.f32 %v2956_v53 }
0x1e2e   :  { %v5527_v6 = vpop.eup %5526 }
0x1e2f   :  { %2959 = vrot.lane.b32.xlu1 %v5527_v6, %s5824_s4 }
0x1e84   :  { %v2936_v50 = vpop.permute.xlu0 %2935 }
0x1e85   :  { %v2938_v43 = vmul.f32 %v5519_v42, %v2936_v50 }
0x1e87   :  { %2964 = vrot.lane.b32.xlu0 %v2938_v43, %s5825_s19 }
0x1ea1   :  { %v2960_v12 = vpop.permute.xlu1 %2959 }
0x1ea2   :  { %v2962_v8 = vmul.f32 %v5523_v63, %v2960_v12 }
0x1ea4   :  { %2969 = vrot.lane.b32.xlu1 %v2962_v8, %s5825_s19 }
0x1ef9   :  { %v2965_v13 = vpop.permute.xlu0 %2964 }
0x1efa   :  { %2967 = vst.msk [vmem:[#allocation4 + $0x10] sm:$0xff] %vm326_vm2, %v2965_v13  ;;  %4956 = vmatmul.mubr.msk.f32.vlgmr.msra.gmra.mrb[32].mxu1 %vm326_vm2, %v2965_v13 }
0x1efb   :  { %5250 = vmatpush3.bf16.msra.mxu1 %v6318_v57  ;;  %4966 = vmatprep.mubr.msk.f32.mxu1 %vm5823_vm0, %v5822_v2 }
0x1efc   :  { %5251 = vmatprep.subr.bf16.mxu1 %v5821_v1 }
0x1eff   :  { %5253 = vmatpush3.bf16.msra.mxu1 %v6322_v62 }
0x1f00   :  { %5260 = vmatprep.subr.bf16.mxu1 %v5821_v1 }
0x1f16   :  { %v2970_v14 = vpop.permute.xlu1 %2969 }
0x1f17   :  { %2972 = vst.msk [vmem:[#allocation5 + $0x28] sm:$0xff] %vm326_vm2, %v2970_v14  ;;  %4967 = vmatmul.mubr.msk.f32.vlgmr.msra.gmra.mrb[34].mxu1 %vm326_vm2, %v2970_v14 }
0x1f18   :  { %5262 = vmatpush3.bf16.msra.mxu1 %v6318_v57  ;;  %4988 = vmatprep.mubr.msk.f32.mxu1 %vm5823_vm0, %v5822_v2 }
0x1f19   :  { %5263 = vmatprep.subr.bf16.mxu1 %v5821_v1 }
0x1f1c   :  { %5265 = vmatpush3.bf16.msra.mxu1 %v6322_v62 }
0x1f1d   :  { %5272 = vmatprep.subr.bf16.mxu1 %v5821_v1 }
0x1fcd   :  { %v3042_v9 = vpop.f32.mrb[32].mxu1 }
0x1fce   :  { %v3046_v16 = vadd.f32 %v3042_v9, %v6405_v33  ;;  %v4957_v7 = vpop.f32.mrb[33].mxu1 }
0x1fd0   :  { %5528 = vtanh.f32 %v3046_v16  ;;  %v4506_v59 = vmul.f32 -1.442695, %v3046_v16 }
0x1fda   :  { %v5529_v17 = vpop.eup %5528 }
0x1fdb   :  { %3130 = vrot.lane.b32.xlu0 %v5529_v17, %s5824_s4 }
0x1fea   :  { %v3116_v18 = vpop.f32.mrb[34].mxu1 }
0x1feb   :  { %v3120_v39 = vadd.f32 %v3116_v18, %v6412_v48  ;;  %v4968_v20 = vpop.f32.mrb[35].mxu1 }
0x1fed   :  { %5530 = vtanh.f32 %v3120_v39  ;;  %v4507_v25 = vmul.f32 -1.442695, %v3120_v39 }
0x1fee   :  { %5532 = vpow2.f32 %v4506_v59 }
0x1ff7   :  { %v5531_v21 = vpop.eup %5530 }
0x1ff8   :  { %3154 = vrot.lane.b32.xlu1 %v5531_v21, %s5824_s4  ;;  %v5533_v22 = vpop.eup %5532 }
0x1ff9   :  { %v3124_v24 = vadd.f32 1.0, %v5533_v22 }
0x1ffb   :  { %5534 = vrcp.f32 %v3124_v24 }
0x1ffc   :  { %5536 = vpow2.f32 %v4507_v25 }
0x2005   :  { %v5535_v33 = vpop.eup %5534 }
0x2006   :  { %v5537_v56 = vpop.eup %5536  ;;  %v3128_v19 = vmul.f32 %v5535_v33, %v2932_v55 }
0x2007   :  { %v3148_v15 = vadd.f32 1.0, %v5537_v56 }
0x2009   :  { %5538 = vrcp.f32 %v3148_v15 }
0x2013   :  { %v5539_v48 = vpop.eup %5538 }
0x2014   :  { %v3152_v23 = vmul.f32 %v5539_v48, %v2956_v53 }
0x204d   :  { %v3131_v26 = vpop.permute.xlu0 %3130 }
0x204e   :  { %v3133_v10 = vmul.f32 %v5535_v33, %v3131_v26 }
0x2050   :  { %3135 = vrot.lane.b32.xlu0 %v3133_v10, %s5825_s19 }
0x206a   :  { %v3155_v27 = vpop.permute.xlu1 %3154 }
0x206b   :  { %v3157_v28 = vmul.f32 %v5539_v48, %v3155_v27 }
0x206d   :  { %3159 = vrot.lane.b32.xlu1 %v3157_v28, %s5825_s19 }
0x20c2   :  { %v3136_v29 = vpop.permute.xlu0 %3135 }
0x20c3   :  { %v3138_v32 = vadd.f32 %v3136_v29, %v3128_v19 }
0x20c5   :  { %5540 = vtanh.f32 %v3138_v32 }
0x20cf   :  { %v5541_v34 = vpop.eup %5540 }
0x20d0   :  { %3141 = vrot.lane.b32.xlu0 %v5541_v34, %s5824_s4 }
0x20df   :  { %v3160_v35 = vpop.permute.xlu1 %3159 }
0x20e0   :  { %v3162_v36 = vadd.f32 %v3160_v35, %v3152_v23 }
0x20e2   :  { %5542 = vtanh.f32 %v3162_v36 }
0x20ec   :  { %v5543_v37 = vpop.eup %5542 }
0x20ed   :  { %3165 = vrot.lane.b32.xlu1 %v5543_v37, %s5824_s4 }
0x2142   :  { %v3142_v42 = vpop.permute.xlu0 %3141 }
0x2143   :  { %v3144_v38 = vmul.f32 %v5535_v33, %v3142_v42 }
0x2145   :  { %3170 = vrot.lane.b32.xlu0 %v3144_v38, %s5825_s19 }
0x215f   :  { %v3166_v40 = vpop.permute.xlu1 %3165 }
0x2160   :  { %v3168_v41 = vmul.f32 %v5539_v48, %v3166_v40 }
0x2162   :  { %3175 = vrot.lane.b32.xlu1 %v3168_v41, %s5825_s19 }
0x21b7   :  { %v3171_v31 = vpop.permute.xlu0 %3170 }
0x21b8   :  { %3173 = vst.msk [vmem:[#allocation4 + $0x18] sm:$0xff] %vm326_vm2, %v3171_v31  ;;  %4978 = vmatmul.mubr.msk.f32.vlgmr.msra.gmra.mrb[44].mxu0 %vm326_vm2, %v3171_v31 }
0x21b9   :  { %5268 = vmatpush3.bf16.msra.mxu0 %v6307_v49  ;;  %4999 = vmatprep.mubr.msk.f32.mxu0 %vm5823_vm0, %v5822_v2 }
0x21ba   :  { %5269 = vmatprep.subr.bf16.mxu0 %v5821_v1 }
0x21bd   :  { %5271 = vmatpush3.bf16.msra.mxu0 %v6311_v54 }
0x21be   :  { %5278 = vmatprep.subr.bf16.mxu0 %v5821_v1 }
0x21d4   :  { %v3176_v63 = vpop.permute.xlu1 %3175 }
0x21d5   :  { %3178 = vst.msk [vmem:[#allocation5 + $0x20] sm:$0xff] %vm326_vm2, %v3176_v63  ;;  %4989 = vmatmul.mubr.msk.f32.vlgmr.msra.gmra.mrb[36].mxu1 %vm326_vm2, %v3176_v63 }
0x21d6   :  { %5274 = vmatpush3.bf16.msra.mxu1 %v6318_v57  ;;  %5010 = vmatprep.mubr.msk.f32.mxu1 %vm5823_vm0, %v5822_v2 }
0x21d7   :  { %5275 = vmatprep.subr.bf16.mxu1 %v5821_v1 }
0x21da   :  { %5277 = vmatpush3.bf16.msra.mxu1 %v6322_v62 }
0x21db   :  { %5284 = vmatprep.subr.bf16.mxu1 %v5821_v1 }
0x228b   :  { %v3248_v30 = vpop.f32.mrb[44].mxu0 }
0x228c   :  { %v3252_v61 = vadd.f32 %v3248_v30, %v6410_v52  ;;  %v4979_v47 = vpop.f32.mrb[45].mxu0 }
0x228e   :  { %5544 = vtanh.f32 %v3252_v61  ;;  %v4510_v53 = vmul.f32 -1.442695, %v3252_v61 }
0x2298   :  { %v5545_v51 = vpop.eup %5544 }
0x2299   :  { %3336 = vrot.lane.b32.xlu0 %v5545_v51, %s5824_s4 }
0x22a8   :  { %v3322_v55 = vpop.f32.mrb[36].mxu1 }
0x22a9   :  { %v3326_v58 = vadd.f32 %v3322_v55, %v6407_v45  ;;  %v4990_v3 = vpop.f32.mrb[37].mxu1 }
0x22ab   :  { %5546 = vtanh.f32 %v3326_v58  ;;  %v4511_v43 = vmul.f32 -1.442695, %v3326_v58 }
0x22ac   :  { %5548 = vpow2.f32 %v4510_v53 }
0x22b5   :  { %v5547_v0 = vpop.eup %5546 }
0x22b6   :  { %3360 = vrot.lane.b32.xlu1 %v5547_v0, %s5824_s4  ;;  %v5549_v6 = vpop.eup %5548 }
0x22b7   :  { %v3330_v50 = vadd.f32 1.0, %v5549_v6 }
0x22b9   :  { %5550 = vrcp.f32 %v3330_v50 }
0x22ba   :  { %5552 = vpow2.f32 %v4511_v43 }
0x22c3   :  { %v5551_v52 = vpop.eup %5550 }
0x22c4   :  { %v5553_v13 = vpop.eup %5552  ;;  %v3334_v7 = vmul.f32 %v5551_v52, %v3138_v32 }
0x22c5   :  { %v3354_v14 = vadd.f32 1.0, %v5553_v13 }
0x22c7   :  { %5554 = vrcp.f32 %v3354_v14 }
0x22d1   :  { %v5555_v45 = vpop.eup %5554 }
0x22d2   :  { %v3358_v20 = vmul.f32 %v5555_v45, %v3162_v36 }
0x230b   :  { %v3337_v12 = vpop.permute.xlu0 %3336 }
0x230c   :  { %v3339_v8 = vmul.f32 %v5551_v52, %v3337_v12 }
0x230e   :  { %3341 = vrot.lane.b32.xlu0 %v3339_v8, %s5825_s19 }
0x2328   :  { %v3361_v9 = vpop.permute.xlu1 %3360 }
0x2329   :  { %v3363_v16 = vmul.f32 %v5555_v45, %v3361_v9 }
0x232b   :  { %3365 = vrot.lane.b32.xlu1 %v3363_v16, %s5825_s19 }
0x2380   :  { %v3342_v17 = vpop.permute.xlu0 %3341 }
0x2381   :  { %v3344_v18 = vadd.f32 %v3342_v17, %v3334_v7 }
0x2383   :  { %5556 = vtanh.f32 %v3344_v18 }
0x238d   :  { %v5557_v39 = vpop.eup %5556 }
0x238e   :  { %3347 = vrot.lane.b32.xlu0 %v5557_v39, %s5824_s4 }
0x239d   :  { %v3366_v21 = vpop.permute.xlu1 %3365 }
0x239e   :  { %v3368_v59 = vadd.f32 %v3366_v21, %v3358_v20 }
0x23a0   :  { %5558 = vtanh.f32 %v3368_v59 }
0x23aa   :  { %v5559_v22 = vpop.eup %5558 }
0x23ab   :  { %3371 = vrot.lane.b32.xlu1 %v5559_v22, %s5824_s4 }
0x2400   :  { %v3348_v24 = vpop.permute.xlu0 %3347 }
0x2401   :  { %v3350_v25 = vmul.f32 %v5551_v52, %v3348_v24 }
0x2403   :  { %3376 = vrot.lane.b32.xlu0 %v3350_v25, %s5825_s19 }
0x241d   :  { %v3372_v33 = vpop.permute.xlu1 %3371 }
0x241e   :  { %v3374_v26 = vmul.f32 %v5555_v45, %v3372_v33 }
0x2420   :  { %3381 = vrot.lane.b32.xlu1 %v3374_v26, %s5825_s19 }
0x2475   :  { %v3377_v10 = vpop.permute.xlu0 %3376 }
0x2476   :  { %3379 = vst.msk [vmem:[#allocation4 + $0x20] sm:$0xff] %vm326_vm2, %v3377_v10  ;;  %5000 = vmatmul.mubr.msk.f32.vlgmr.msra.gmra.mrb[46].mxu0 %vm326_vm2, %v3377_v10 }
0x2477   :  { %5280 = vmatpush3.bf16.msra.mxu0 %v6307_v49  ;;  %5021 = vmatprep.mubr.msk.f32.mxu0 %vm5823_vm0, %v5822_v2 }
0x2478   :  { %5281 = vmatprep.subr.bf16.mxu0 %v5821_v1 }
0x247b   :  { %5283 = vmatpush3.bf16.msra.mxu0 %v6311_v54 }
0x247c   :  { %5290 = vmatprep.subr.bf16.mxu0 %v5821_v1 }
0x2492   :  { %v3382_v56 = vpop.permute.xlu1 %3381 }
0x2493   :  { %3384 = vst.msk [vmem:[#allocation5 + $0x18] sm:$0xff] %vm326_vm2, %v3382_v56  ;;  %5011 = vmatmul.mubr.msk.f32.vlgmr.msra.gmra.mrb[38].mxu1 %vm326_vm2, %v3382_v56 }
0x2494   :  { %5286 = vmatpush3.bf16.msra.mxu1 %v6318_v57  ;;  %5032 = vmatprep.mubr.msk.f32.mxu1 %vm5823_vm0, %v5822_v2 }
0x2495   :  { %5287 = vmatprep.subr.bf16.mxu1 %v5821_v1 }
0x2498   :  { %5289 = vmatpush3.bf16.msra.mxu1 %v6322_v62 }
0x2499   :  { %5296 = vmatprep.subr.bf16.mxu1 %v5821_v1 }
0x2549   :  { %v3454_v15 = vpop.f32.mrb[46].mxu0 }
0x254a   :  { %v3458_v48 = vadd.f32 %v3454_v15, %v6414_v60  ;;  %v5001_v27 = vpop.f32.mrb[47].mxu0 }
0x254c   :  { %5560 = vtanh.f32 %v3458_v48  ;;  %v4514_v23 = vmul.f32 -1.442695, %v3458_v48 }
0x2556   :  { %v5561_v28 = vpop.eup %5560 }
0x2557   :  { %3542 = vrot.lane.b32.xlu0 %v5561_v28, %s5824_s4 }
0x2566   :  { %v3528_v19 = vpop.f32.mrb[38].mxu1 }
0x2567   :  { %v3532_v29 = vadd.f32 %v3528_v19, %v6403_v44  ;;  %v5012_v32 = vpop.f32.mrb[39].mxu1 }
0x2569   :  { %5562 = vtanh.f32 %v3532_v29  ;;  %v4515_v37 = vmul.f32 -1.442695, %v3532_v29 }
0x256a   :  { %5564 = vpow2.f32 %v4514_v23 }
0x2573   :  { %v5563_v34 = vpop.eup %5562 }
0x2574   :  { %3566 = vrot.lane.b32.xlu1 %v5563_v34, %s5824_s4  ;;  %v5565_v35 = vpop.eup %5564 }
0x2575   :  { %v3536_v36 = vadd.f32 1.0, %v5565_v35 }
0x2577   :  { %5566 = vrcp.f32 %v3536_v36 }
0x2578   :  { %5568 = vpow2.f32 %v4515_v37 }
0x2581   :  { %v5567_v60 = vpop.eup %5566 }
0x2582   :  { %v5569_v40 = vpop.eup %5568  ;;  %v3540_v30 = vmul.f32 %v5567_v60, %v3344_v18 }
0x2583   :  { %v3560_v41 = vadd.f32 1.0, %v5569_v40 }
0x2585   :  { %5570 = vrcp.f32 %v3560_v41 }
0x258f   :  { %v5571_v44 = vpop.eup %5570 }
0x2590   :  { %v3564_v55 = vmul.f32 %v5571_v44, %v3368_v59 }
0x25c9   :  { %v3543_v42 = vpop.permute.xlu0 %3542 }
0x25ca   :  { %v3545_v38 = vmul.f32 %v5567_v60, %v3543_v42 }
0x25cc   :  { %3547 = vrot.lane.b32.xlu0 %v3545_v38, %s5825_s19 }
0x25e6   :  { %v3567_v31 = vpop.permute.xlu1 %3566 }
0x25e7   :  { %v3569_v63 = vmul.f32 %v5571_v44, %v3567_v31 }
0x25e9   :  { %3571 = vrot.lane.b32.xlu1 %v3569_v63, %s5825_s19 }
0x263e   :  { %v3548_v61 = vpop.permute.xlu0 %3547 }
0x263f   :  { %v3550_v47 = vadd.f32 %v3548_v61, %v3540_v30 }
0x2641   :  { %5572 = vtanh.f32 %v3550_v47 }
0x264b   :  { %v5573_v51 = vpop.eup %5572 }
0x264c   :  { %3553 = vrot.lane.b32.xlu0 %v5573_v51, %s5824_s4 }
0x265b   :  { %v3572_v58 = vpop.permute.xlu1 %3571 }
0x265c   :  { %v3574_v3 = vadd.f32 %v3572_v58, %v3564_v55 }
0x265e   :  { %5574 = vtanh.f32 %v3574_v3 }
0x2668   :  { %v5575_v0 = vpop.eup %5574 }
0x2669   :  { %3577 = vrot.lane.b32.xlu1 %v5575_v0, %s5824_s4 }
0x26be   :  { %v3554_v53 = vpop.permute.xlu0 %3553 }
0x26bf   :  { %v3556_v6 = vmul.f32 %v5567_v60, %v3554_v53 }
0x26c1   :  { %3582 = vrot.lane.b32.xlu0 %v3556_v6, %s5825_s19 }
0x26db   :  { %v3578_v50 = vpop.permute.xlu1 %3577 }
0x26dc   :  { %v3580_v43 = vmul.f32 %v5571_v44, %v3578_v50 }
0x26de   :  { %3587 = vrot.lane.b32.xlu1 %v3580_v43, %s5825_s19 }
0x2733   :  { %v3583_v52 = vpop.permute.xlu0 %3582 }
0x2734   :  { %3585 = vst.msk [vmem:[#allocation4 + $0x28] sm:$0xff] %vm326_vm2, %v3583_v52  ;;  %5022 = vmatmul.mubr.msk.f32.vlgmr.msra.gmra.mrb[48].mxu0 %vm326_vm2, %v3583_v52 }
0x2735   :  { %5292 = vmatpush3.bf16.msra.mxu0 %v6307_v49  ;;  %5043 = vmatprep.mubr.msk.f32.mxu0 %vm5823_vm0, %v5822_v2 }
0x2736   :  { %5293 = vmatprep.subr.bf16.mxu0 %v5821_v1 }
0x2739   :  { %5295 = vmatpush3.bf16.msra.mxu0 %v6311_v54 }
0x273a   :  { %5302 = vmatprep.subr.bf16.mxu0 %v5821_v1 }
0x2750   :  { %v3588_v12 = vpop.permute.xlu1 %3587 }
0x2751   :  { %3590 = vst.msk [vmem:[#allocation5 + $0x10] sm:$0xff] %vm326_vm2, %v3588_v12  ;;  %5033 = vmatmul.mubr.msk.f32.vlgmr.msra.gmra.mrb[40].mxu1 %vm326_vm2, %v3588_v12 }
0x2752   :  { %5298 = vmatpush3.bf16.msra.mxu1 %v6318_v57  ;;  %5054 = vmatprep.mubr.msk.f32.mxu1 %vm5823_vm0, %v5822_v2 }
0x2753   :  { %5299 = vmatprep.subr.bf16.mxu1 %v5821_v1 }
0x2756   :  { %5301 = vmatpush3.bf16.msra.mxu1 %v6322_v62 }
0x2757   :  { %5308 = vmatprep.subr.bf16.mxu1 %v5821_v1 }
0x2807   :  { %v3660_v49 = vpop.f32.mrb[48].mxu0 }
0x2808   :  { %v3664_v54 = vadd.f32 %v3660_v49, %v6418_v4  ;;  %v5023_v8 = vpop.f32.mrb[49].mxu0 }
0x2809   :  { %v4177_v8 = vld [vmem:[%s6780_s9] sm:$0xff] }
0x280a   :  { %5576 = vtanh.f32 %v3664_v54  ;;  %v4518_v16 = vmul.f32 -1.442695, %v3664_v54 }
0x2814   :  { %v5577_v13 = vpop.eup %5576 }
0x2815   :  { %3748 = vrot.lane.b32.xlu0 %v5577_v13, %s5824_s4  ;;  %v4178_v13 = vld [vmem:[%s6780_s9 + $0x8] sm:$0xff] }
0x2824   :  { %v3734_v14 = vpop.f32.mrb[40].mxu1 }
0x2825   :  { %v3738_v57 = vadd.f32 %v3734_v14, %v6399_v46  ;;  %v5034_v45 = vpop.f32.mrb[41].mxu1  ;;  %v4179_v14 = vld [vmem:[%s6780_s9 + $0x10] sm:$0xff] }
0x2826   :  { %v4180_v45 = vld [vmem:[%s6780_s9 + $0x18] sm:$0xff] }
0x2827   :  { %5578 = vtanh.f32 %v3738_v57  ;;  %v4519_v17 = vmul.f32 -1.442695, %v3738_v57  ;;  %v5309_v57 = vpack.c.bf16 %v4178_v13, %v4177_v8  ;;  %v6666_v13 = vld [vmem:[#allocation5 + $0x10] sm:$0xff] }
0x2828   :  { %5580 = vpow2.f32 %v4518_v16 }
0x2831   :  { %v5579_v9 = vpop.eup %5578 }
0x2832   :  { %3772 = vrot.lane.b32.xlu1 %v5579_v9, %s5824_s4  ;;  %v5581_v62 = vpop.eup %5580  ;;  %v5312_v9 = vpack.c.bf16 %v4180_v45, %v4179_v14 }
0x2833   :  { %v3742_v7 = vadd.f32 1.0, %v5581_v62 }
0x2835   :  { %5582 = vrcp.f32 %v3742_v7  ;;  %v4181_v7 = vld [vmem:[%s6780_s9 + $0x20] sm:$0xff] }
0x2836   :  { %5584 = vpow2.f32 %v4519_v17  ;;  %v4182_v17 = vld [vmem:[%s6780_s9 + $0x28] sm:$0xff] }
0x283f   :  { %v5583_v4 = vpop.eup %5582 }
0x2840   :  { %v5585_v20 = vpop.eup %5584  ;;  %v3746_v24 = vmul.f32 %v5583_v4, %v3550_v47 }
0x2841   :  { %v3766_v21 = vadd.f32 1.0, %v5585_v20 }
0x2843   :  { %5586 = vrcp.f32 %v3766_v21 }
0x284d   :  { %v5587_v46 = vpop.eup %5586 }
0x284e   :  { %v3770_v10 = vmul.f32 %v5587_v46, %v3574_v3 }
0x2887   :  { %v3749_v18 = vpop.permute.xlu0 %3748 }
0x2888   :  { %v3751_v39 = vmul.f32 %v5583_v4, %v3749_v18  ;;  %v5303_v18 = vpack.c.bf16 %v4182_v17, %v4181_v7 }
0x288a   :  { %3753 = vrot.lane.b32.xlu0 %v3751_v39, %s5825_s19  ;;  %v4184_v39 = vld [vmem:[%s6780_s9 + $0x38] sm:$0xff] }
0x28a4   :  { %v3773_v59 = vpop.permute.xlu1 %3772 }
0x28a5   :  { %v3775_v22 = vmul.f32 %v5587_v46, %v3773_v59  ;;  %v4004_v59 = vld [vmem:[#allocation4 + $0x8] sm:$0xff] }
0x28a7   :  { %3777 = vrot.lane.b32.xlu1 %v3775_v22, %s5825_s19  ;;  %v6635_v22 = vld [vmem:[#allocation4 + $0x20] sm:$0xff] }
0x28fc   :  { %v3754_v25 = vpop.permute.xlu0 %3753 }
0x28fd   :  { %v3756_v33 = vadd.f32 %v3754_v25, %v3746_v24 }
0x28ff   :  { %5588 = vtanh.f32 %v3756_v33 }
0x2909   :  { %v5589_v26 = vpop.eup %5588 }
0x290a   :  { %3759 = vrot.lane.b32.xlu0 %v5589_v26, %s5824_s4  ;;  %v4005_v26 = vld [vmem:[#allocation4 + $0x10] sm:$0xff] }
0x2919   :  { %v3778_v56 = vpop.permute.xlu1 %3777 }
0x291a   :  { %v3780_v15 = vadd.f32 %v3778_v56, %v3770_v10  ;;  %v6641_v10 = vld [vmem:[#allocation4 + $0x18] sm:$0xff]  ;;  %v4012_v56 = vsel %vm326_vm2, %v4004_v59, -inf }
0x291c   :  { %5590 = vtanh.f32 %v3780_v15 }
0x2926   :  { %v5591_v48 = vpop.eup %5590 }
0x2927   :  { %3783 = vrot.lane.b32.xlu1 %v5591_v48, %s5824_s4 }
0x297c   :  { %v3760_v27 = vpop.permute.xlu0 %3759 }
0x297d   :  { %v3762_v28 = vmul.f32 %v5583_v4, %v3760_v27  ;;  %v4183_v4 = vld [vmem:[%s6780_s9 + $0x30] sm:$0xff] }
0x297e   :  { %v5306_v20 = vpack.c.bf16 %v4184_v39, %v4183_v4 }
0x297f   :  { %3788 = vrot.lane.b32.xlu0 %v3762_v28, %s5825_s19 }
0x2999   :  { %v3784_v19 = vpop.permute.xlu1 %3783 }
0x299a   :  { %v3786_v29 = vmul.f32 %v5587_v46, %v3784_v19  ;;  %v6633_v46 = vld [vmem:[#allocation4 + $0x28] sm:$0xff] }
0x299b   :  { %v4017_v25 = vsel %vm326_vm2, %v6633_v46, -inf }
0x299c   :  { %3793 = vrot.lane.b32.xlu1 %v3786_v29, %s5825_s19  ;;  %v4018_v28 = vmax.f32 %v4012_v56, %v4017_v25  ;;  %v4013_v29 = vsel %vm326_vm2, %v4005_v26, -inf }
0x29f1   :  { %v3789_v32 = vpop.permute.xlu0 %3788 }
0x29f2   :  { %3791 = vst.msk [vmem:[#allocation4 + $0x30] sm:$0xff] %vm326_vm2, %v3789_v32  ;;  %5044 = vmatmul.mubr.msk.f32.vlgmr.msra.gmra.mrb[50].mxu0 %vm326_vm2, %v3789_v32  ;;  %v4014_v32 = vsel %vm326_vm2, %v6641_v10, -inf }
0x29f3   :  { %5065 = vmatprep.mubr.msk.f32.mxu0 %vm5823_vm0, %v5822_v2  ;;  %5304 = vmatpush3.bf16.msra.mxu0 %v5303_v18  ;;  %v6677_v18 = vld [vmem:[#allocation5 + $0x28] sm:$0xff] }
0x29f4   :  { %5305 = vmatprep.subr.bf16.mxu0 %v5821_v1 }
0x29f7   :  { %5307 = vmatpush3.bf16.msra.mxu0 %v5306_v20 }
0x29f8   :  { %5314 = vmatprep.subr.bf16.mxu0 %v5821_v1 }
0x29f9   :  { %v6637_v24 = vld [vmem:[#allocation4 + $0x30] sm:$0xff] }
0x29fa   :  { %v4019_v48 = vsel %vm326_vm2, %v6637_v24, -inf }
0x2a0e   :  { %v3794_v34 = vpop.permute.xlu1 %3793 }
0x2a0f   :  { %3796 = vst.msk [vmem:[#allocation5 + $0x8] sm:$0xff] %vm326_vm2, %v3794_v34  ;;  %5055 = vmatmul.mubr.msk.f32.vlgmr.msra.gmra.mrb[42].mxu1 %vm326_vm2, %v3794_v34 }
0x2a10   :  { %5076 = vmatprep.mubr.msk.f32.mxu1 %vm5823_vm0, %v5822_v2  ;;  %5310 = vmatpush3.bf16.msra.mxu1 %v5309_v57 }
0x2a11   :  { %5311 = vmatprep.subr.bf16.mxu1 %v5821_v1 }
0x2a14   :  { %5313 = vmatpush3.bf16.msra.mxu1 %v5312_v9 }
0x2a16   :  { %v6675_v4 = vld [vmem:[#allocation5 + $0x8] sm:$0xff] }
0x2ac5   :  { %v3866_v23 = vpop.f32.mrb[50].mxu0 }
0x2ac6   :  { %v3870_v35 = vadd.f32 %v3866_v23, %v6422_v11  ;;  %v5045_v36 = vpop.f32.mrb[51].mxu0 }
0x2ac8   :  { %5592 = vtanh.f32 %v3870_v35  ;;  %v4522_v41 = vmul.f32 -1.442695, %v3870_v35  ;;  %v4020_v35 = vmax.f32 %v4013_v29, %v4019_v48 }
0x2ad2   :  { %v5593_v37 = vpop.eup %5592 }
0x2ad3   :  { %3954 = vrot.lane.b32.xlu0 %v5593_v37, %s5824_s4 }
0x2ae2   :  { %v3940_v60 = vpop.f32.mrb[42].mxu1 }
0x2ae3   :  { %v3944_v42 = vadd.f32 %v3940_v60, %v6395_v5  ;;  %v5056_v38 = vpop.f32.mrb[43].mxu1 }
0x2ae5   :  { %5594 = vtanh.f32 %v3944_v42  ;;  %v4523_v63 = vmul.f32 -1.442695, %v3944_v42 }
0x2ae6   :  { %5596 = vpow2.f32 %v4522_v41 }
0x2aef   :  { %v5595_v40 = vpop.eup %5594 }
0x2af0   :  { %3978 = vrot.lane.b32.xlu1 %v5595_v40, %s5824_s4  ;;  %v5597_v44 = vpop.eup %5596 }
0x2af1   :  { %v3948_v31 = vadd.f32 1.0, %v5597_v44 }
0x2af3   :  { %5598 = vrcp.f32 %v3948_v31 }
0x2af4   :  { %5600 = vpow2.f32 %v4523_v63 }
0x2afd   :  { %v5599_v11 = vpop.eup %5598 }
0x2afe   :  { %v5601_v47 = vpop.eup %5600  ;;  %v3952_v3 = vmul.f32 %v5599_v11, %v3756_v33  ;;  %v4003_v33 = vld [vmem:[#allocation4] sm:$0xff] }
0x2aff   :  { %v3972_v51 = vadd.f32 1.0, %v5601_v47  ;;  %v4011_v19 = vsel %vm326_vm2, %v4003_v33, -inf }
0x2b01   :  { %5602 = vrcp.f32 %v3972_v51 }
0x2b0b   :  { %v5603_v5 = vpop.eup %5602 }
0x2b0c   :  { %v3976_v50 = vmul.f32 %v5603_v5, %v3780_v15  ;;  %v4015_v15 = vsel %vm326_vm2, %v6635_v22, -inf }
0x2b0d   :  { %v4016_v23 = vmax.f32 %v4011_v19, %v4015_v15 }
0x2b0f   :  { %v4023_v37 = vmax.f32 %v4016_v23, %v4018_v28  ;;  %v4104_v23 = vsel %vm326_vm2, %v6677_v18, -inf }
0x2b45   :  { %v3955_v30 = vpop.permute.xlu0 %3954 }
0x2b46   :  { %v3957_v61 = vmul.f32 %v5599_v11, %v3955_v30 }
0x2b48   :  { %3959 = vrot.lane.b32.xlu0 %v3957_v61, %s5825_s19 }
0x2b62   :  { %v3979_v55 = vpop.permute.xlu1 %3978 }
0x2b63   :  { %v3981_v58 = vmul.f32 %v5603_v5, %v3979_v55 }
0x2b65   :  { %3983 = vrot.lane.b32.xlu1 %v3981_v58, %s5825_s19 }
0x2bba   :  { %v3960_v0 = vpop.permute.xlu0 %3959 }
0x2bbb   :  { %v3962_v53 = vadd.f32 %v3960_v0, %v3952_v3 }
0x2bbd   :  { %5604 = vtanh.f32 %v3962_v53 }
0x2bc7   :  { %v5605_v6 = vpop.eup %5604 }
0x2bc8   :  { %3965 = vrot.lane.b32.xlu0 %v5605_v6, %s5824_s4 }
0x2bd7   :  { %v3984_v43 = vpop.permute.xlu1 %3983 }
0x2bd8   :  { %v3986_v52 = vadd.f32 %v3984_v43, %v3976_v50 }
0x2bda   :  { %5606 = vtanh.f32 %v3986_v52 }
0x2be4   :  { %v5607_v12 = vpop.eup %5606 }
0x2be5   :  { %3989 = vrot.lane.b32.xlu1 %v5607_v12, %s5824_s4  ;;  %v6663_v12 = vld [vmem:[#allocation5 + $0x18] sm:$0xff] }
0x2be6   :  { %v4101_v39 = vsel %vm326_vm2, %v6663_v12, -inf }
0x2c3a   :  { %v3966_v49 = vpop.permute.xlu0 %3965 }
0x2c3b   :  { %v3968_v54 = vmul.f32 %v5599_v11, %v3966_v49 }
0x2c3d   :  { %3994 = vrot.lane.b32.xlu0 %v3968_v54, %s5825_s19 }
0x2c57   :  { %v3990_v16 = vpop.permute.xlu1 %3989 }
0x2c58   :  { %v3992_v62 = vmul.f32 %v5603_v5, %v3990_v16  ;;  %v6669_v16 = vld [vmem:[#allocation5 + $0x30] sm:$0xff] }
0x2c59   :  { %v4106_v48 = vsel %vm326_vm2, %v6669_v16, -inf }
0x2c5a   :  { %3999 = vrot.lane.b32.xlu1 %v3992_v62, %s5825_s19  ;;  %v6671_v62 = vld [vmem:[#allocation5 + $0x38] sm:$0xff] }
0x2c5b   :  { %v4108_v28 = vsel %vm326_vm2, %v6671_v62, -inf }
0x2caf   :  { %v3995_v21 = vpop.permute.xlu0 %3994 }
0x2cb0   :  { %3997 = vst.msk [vmem:[#allocation4 + $0x38] sm:$0xff] %vm326_vm2, %v3995_v21 }
0x2cb7   :  { %v6648_v27 = vld [vmem:[#allocation4 + $0x38] sm:$0xff] }
0x2cb8   :  { %v4021_v34 = vsel %vm326_vm2, %v6648_v27, -inf }
0x2cb9   :  { %v4022_v36 = vmax.f32 %v4014_v32, %v4021_v34  ;;  %v4099_v34 = vsel %vm326_vm2, %v6675_v4, -inf }
0x2cbb   :  { %v4024_v60 = vmax.f32 %v4020_v35, %v4022_v36 }
0x2cbd   :  { %v4025_v42 = vmax.f32 %v4023_v37, %v4024_v60  ;;  %v4109_v60 = vmax.f32 %v4101_v39, %v4108_v28 }
0x2cbf   :  { %v4026_v38 = vsub.f32 %v4003_v33, %v4025_v42  ;;  %v4027_v40 = vsub.f32 %v4004_v59, %v4025_v42  ;;  %v4028_v41 = vsub.f32 %v4005_v26, %v4025_v42  ;;  %v4029_v44 = vsub.f32 %v6641_v10, %v4025_v42 }
0x2cc0   :  { %v4030_v31 = vsub.f32 %v6635_v22, %v4025_v42  ;;  %v4031_v61 = vsub.f32 %v6633_v46, %v4025_v42  ;;  %v4032_v51 = vsub.f32 %v6637_v24, %v4025_v42  ;;  %v4033_v55 = vsub.f32 %v6648_v27, %v4025_v42 }
0x2cc1   :  { %v4034_v63 = vmul.f32 1.442695, %v4026_v38  ;;  %v4036_v11 = vmul.f32 1.442695, %v4027_v40  ;;  %v4038_v30 = vmul.f32 1.442695, %v4028_v41 }
0x2cc2   :  { %v4040_v47 = vmul.f32 1.442695, %v4029_v44  ;;  %v4042_v5 = vmul.f32 1.442695, %v4030_v31  ;;  %v4044_v58 = vmul.f32 1.442695, %v4031_v61 }
0x2cc3   :  { %5608 = vpow2.f32 %v4034_v63  ;;  %v4046_v3 = vmul.f32 1.442695, %v4032_v51  ;;  %v4048_v0 = vmul.f32 1.442695, %v4033_v55 }
0x2cc4   :  { %5610 = vpow2.f32 %v4036_v11 }
0x2cc5   :  { %5612 = vpow2.f32 %v4038_v30  ;;  %v4105_v30 = vmax.f32 %v4099_v34, %v4104_v23 }
0x2cc6   :  { %5614 = vpow2.f32 %v4040_v47 }
0x2cc7   :  { %5616 = vpow2.f32 %v4042_v5 }
0x2cc8   :  { %5618 = vpow2.f32 %v4044_v58 }
0x2cc9   :  { %5620 = vpow2.f32 %v4046_v3 }
0x2cca   :  { %5622 = vpow2.f32 %v4048_v0 }
0x2ccc   :  { %v4000_v53 = vpop.permute.xlu1 %3999 }
0x2ccd   :  { %v5609_v6 = vpop.eup %5608  ;;  %4002 = vst.msk [vmem:[#allocation5] sm:$0xff] %vm326_vm2, %v4000_v53 }
0x2cce   :  { %v5611_v50 = vpop.eup %5610  ;;  %v4050_v43 = vsel %vm326_vm2, %v5609_v6, 0.0  ;;  %v4065_v52 = vmul.f32 %v5609_v6, %v4003_v33  ;;  %v6682_v33 = vld [vmem:[#allocation5 + $0x20] sm:$0xff] }
0x2ccf   :  { %v5613_v49 = vpop.eup %5612  ;;  %v4051_v54 = vsel %vm326_vm2, %v5611_v50, 0.0  ;;  %v4066_v8 = vmul.f32 %v5611_v50, %v4004_v59  ;;  %v4102_v36 = vsel %vm326_vm2, %v6682_v33, -inf }
0x2cd0   :  { %v5615_v14 = vpop.eup %5614  ;;  %v4052_v57 = vadd.f32 %v4051_v54, %v4050_v43  ;;  %v4067_v45 = vmul.f32 %v5613_v49, %v4005_v26  ;;  %v4073_v9 = vsel %vm326_vm2, %v4065_v52, 0.0  ;;  %v4053_v7 = vsel %vm326_vm2, %v5613_v49, 0.0 }
0x2cd1   :  { %v4074_v17 = vsel %vm326_vm2, %v4066_v8, 0.0  ;;  %v5617_v20 = vpop.eup %5616  ;;  %v4068_v59 = vmul.f32 %v5615_v14, %v6641_v10  ;;  %v4100_v26 = vsel %vm326_vm2, %v6666_v13, -inf  ;;  %v4055_v56 = vsel %vm326_vm2, %v5615_v14, 0.0 }
0x2cd2   :  { %v4054_v21 = vadd.f32 %v4053_v7, %v4052_v57  ;;  %v4075_v25 = vadd.f32 %v4074_v17, %v4073_v9  ;;  %v4076_v15 = vsel %vm326_vm2, %v4067_v45, 0.0  ;;  %v5619_v19 = vpop.eup %5618  ;;  %v4057_v35 = vsel %vm326_vm2, %v5617_v20, 0.0 }
0x2cd3   :  { %v4107_v37 = vmax.f32 %v4100_v26, %v4106_v48  ;;  %v5621_v42 = vpop.eup %5620  ;;  %v4069_v40 = vmul.f32 %v5617_v20, %v6635_v22  ;;  %v4078_v41 = vsel %vm326_vm2, %v4068_v59, 0.0  ;;  %v4059_v31 = vsel %vm326_vm2, %v5619_v19, 0.0 }
0x2cd4   :  { %v4056_v29 = vadd.f32 %v4055_v56, %v4054_v21  ;;  %v4077_v32 = vadd.f32 %v4076_v15, %v4075_v25  ;;  %v6692_v10 = vld [vmem:[#allocation5] sm:$0xff]  ;;  %v5623_v61 = vpop.eup %5622  ;;  %v4061_v51 = vsel %vm326_vm2, %v5621_v42, 0.0  ;;  %v4070_v3 = vmul.f32 %v5619_v19, %v6633_v46 }
0x2cd5   :  { %v4098_v44 = vsel %vm326_vm2, %v6692_v10, -inf  ;;  %v4111_v55 = vmax.f32 %v4107_v37, %v4109_v60  ;;  %v4080_v22 = vsel %vm326_vm2, %v4069_v40, 0.0  ;;  %v4063_v0 = vsel %vm326_vm2, %v5623_v61, 0.0 }
0x2cd6   :  { %v4058_v38 = vadd.f32 %v4057_v35, %v4056_v29  ;;  %v4079_v63 = vadd.f32 %v4078_v41, %v4077_v32  ;;  %v4103_v11 = vmax.f32 %v4098_v44, %v4102_v36  ;;  %v4071_v8 = vmul.f32 %v5621_v42, %v6637_v24 }
0x2cd7   :  { %v4082_v14 = vsel %vm326_vm2, %v4070_v3, 0.0  ;;  %v4072_v20 = vmul.f32 %v5623_v61, %v6648_v27 }
0x2cd8   :  { %v4060_v47 = vadd.f32 %v4059_v31, %v4058_v38  ;;  %v4110_v5 = vmax.f32 %v4103_v11, %v4105_v30  ;;  %v4081_v53 = vadd.f32 %v4080_v22, %v4079_v63  ;;  %v4084_v21 = vsel %vm326_vm2, %v4071_v8, 0.0 }
0x2cd9   :  { %v4086_v15 = vsel %vm326_vm2, %v4072_v20, 0.0 }
0x2cda   :  { %v4062_v58 = vadd.f32 %v4061_v51, %v4060_v47  ;;  %v4112_v6 = vmax.f32 %v4110_v5, %v4111_v55  ;;  %v4083_v57 = vadd.f32 %v4082_v14, %v4081_v53 }
0x2cdc   :  { %v4064_v50 = vadd.f32 %v4063_v0, %v4062_v58  ;;  %v4113_v43 = vsub.f32 %v6692_v10, %v4112_v6  ;;  %v4114_v52 = vsub.f32 %v6675_v4, %v4112_v6  ;;  %v4115_v49 = vsub.f32 %v6666_v13, %v4112_v6 }
0x2cdd   :  { %v4116_v54 = vsub.f32 %v6663_v12, %v4112_v6  ;;  %v4117_v46 = vsub.f32 %v6682_v33, %v4112_v6  ;;  %v4118_v7 = vsub.f32 %v6677_v18, %v4112_v6  ;;  %v4119_v59 = vsub.f32 %v6669_v16, %v4112_v6 }
0x2cde   :  { %5624 = vrcp.f32 %v4064_v50  ;;  %v4121_v45 = vmul.f32 1.442695, %v4113_v43  ;;  %v4123_v9 = vmul.f32 1.442695, %v4114_v52  ;;  %v4125_v17 = vmul.f32 1.442695, %v4115_v49 }
0x2cdf   :  { %v4127_v39 = vmul.f32 1.442695, %v4116_v54  ;;  %v4129_v24 = vmul.f32 1.442695, %v4117_v46  ;;  %v4085_v25 = vadd.f32 %v4084_v21, %v4083_v57  ;;  %v4120_v26 = vsub.f32 %v6671_v62, %v4112_v6 }
0x2ce0   :  { %5626 = vpow2.f32 %v4121_v45  ;;  %v4131_v56 = vmul.f32 1.442695, %v4118_v7  ;;  %v4133_v48 = vmul.f32 1.442695, %v4119_v59  ;;  %v4342_v59 = vld [vmem:[%s6782_s11 + $0x10] sm:$0xff] }
0x2ce1   :  { %5628 = vpow2.f32 %v4123_v9  ;;  %v4087_v28 = vadd.f32 %v4086_v15, %v4085_v25  ;;  %v4135_v27 = vmul.f32 1.442695, %v4120_v26  ;;  %v4526_v15 = vld [vmem:[%s6781_s10] ss:$0 sm:$0xff] }
0x2ce2   :  { %5630 = vpow2.f32 %v4125_v17 }
0x2ce3   :  { %5632 = vpow2.f32 %v4127_v39 }
0x2ce4   :  { %5634 = vpow2.f32 %v4129_v24  ;;  %v4343_v24 = vld [vmem:[%s6782_s11 + $0x18] sm:$0xff] }
0x2ce5   :  { %5636 = vpow2.f32 %v4131_v56  ;;  %v5318_v25 = vpack.c.bf16 %v4343_v24, %v4342_v59 }
0x2ce6   :  { %5638 = vpow2.f32 %v4133_v48 }
0x2ce7   :  { %5640 = vpow2.f32 %v4135_v27 }
0x2ce8   :  { %v5625_v19 = vpop.eup %5624 }
0x2ce9   :  { %v4089_v29 = vmul.f32 %v5625_v19, %v4087_v28 }
0x2cea   :  { %v5627_v32 = vpop.eup %5626 }
0x2ceb   :  { %5077 = vmatmul.mubr.msk.f32.vlgmr.msra.gmra.mrb[44].mxu1 %vm326_vm2, %v4089_v29  ;;  %v5629_v34 = vpop.eup %5628  ;;  %v4137_v23 = vsel %vm326_vm2, %v5627_v32, 0.0  ;;  %v4152_v35 = vmul.f32 %v5627_v32, %v6692_v10  ;;  %v4527_v29 = vld [vmem:[#allocation6] ss:$0 sm:$0xff] }
0x2cec   :  { %v5631_v36 = vpop.eup %5630  ;;  %v4138_v37 = vsel %vm326_vm2, %v5629_v34, 0.0  ;;  %v4153_v60 = vmul.f32 %v5629_v34, %v6675_v4 }
0x2ced   :  { %v5633_v42 = vpop.eup %5632  ;;  %v4139_v38 = vadd.f32 %v4138_v37, %v4137_v23  ;;  %v4154_v40 = vmul.f32 %v5631_v36, %v6666_v13  ;;  %v4160_v41 = vsel %vm326_vm2, %v4152_v35, 0.0  ;;  %v4140_v44 = vsel %vm326_vm2, %v5631_v36, 0.0 }
0x2cee   :  { %v4161_v31 = vsel %vm326_vm2, %v4153_v60, 0.0  ;;  %v5635_v63 = vpop.eup %5634  ;;  %v4155_v30 = vmul.f32 %v5633_v42, %v6663_v12  ;;  %v4142_v61 = vsel %vm326_vm2, %v5633_v42, 0.0 }
0x2cef   :  { %v4141_v11 = vadd.f32 %v4140_v44, %v4139_v38  ;;  %v4162_v10 = vadd.f32 %v4161_v31, %v4160_v41  ;;  %v4163_v47 = vsel %vm326_vm2, %v4154_v40, 0.0  ;;  %v5637_v4 = vpop.eup %5636  ;;  %v4144_v13 = vsel %vm326_vm2, %v5635_v63, 0.0 }
0x2cf0   :  { %v5639_v55 = vpop.eup %5638  ;;  %v4156_v3 = vmul.f32 %v5635_v63, %v6682_v33  ;;  %v4165_v22 = vsel %vm326_vm2, %v4155_v30, 0.0  ;;  %v4146_v0 = vsel %vm326_vm2, %v5637_v4, 0.0  ;;  %v4157_v52 = vmul.f32 %v5637_v4, %v6677_v18 }
0x2cf1   :  { %v4143_v51 = vadd.f32 %v4142_v61, %v4141_v11  ;;  %v4164_v5 = vadd.f32 %v4163_v47, %v4162_v10  ;;  %v5641_v12 = vpop.eup %5640  ;;  %v4148_v50 = vsel %vm326_vm2, %v5639_v55, 0.0  ;;  %v4158_v33 = vmul.f32 %v5639_v55, %v6669_v16  ;;  %v4340_v16 = vld [vmem:[%s6782_s11] sm:$0xff] }
0x2cf2   :  { %v4167_v49 = vsel %vm326_vm2, %v4156_v3, 0.0  ;;  %v4150_v54 = vsel %vm326_vm2, %v5641_v12, 0.0  ;;  %v4169_v46 = vsel %vm326_vm2, %v4157_v52, 0.0  ;;  %v4159_v45 = vmul.f32 %v5641_v12, %v6671_v62  ;;  %v4341_v62 = vld [vmem:[%s6782_s11 + $0x8] sm:$0xff] }
0x2cf3   :  { %v4145_v58 = vadd.f32 %v4144_v13, %v4143_v51  ;;  %v4166_v53 = vadd.f32 %v4165_v22, %v4164_v5  ;;  %v4171_v9 = vsel %vm326_vm2, %v4158_v33, 0.0  ;;  %v5315_v21 = vpack.c.bf16 %v4341_v62, %v4340_v16 }
0x2cf4   :  { %v4173_v17 = vsel %vm326_vm2, %v4159_v45, 0.0 }
0x2cf5   :  { %v4147_v6 = vadd.f32 %v4146_v0, %v4145_v58  ;;  %v4168_v8 = vadd.f32 %v4167_v49, %v4166_v53 }
0x2cf7   :  { %v4149_v43 = vadd.f32 %v4148_v50, %v4147_v6  ;;  %v4170_v57 = vadd.f32 %v4169_v46, %v4168_v8 }
0x2cf9   :  { %v4151_v14 = vadd.f32 %v4150_v54, %v4149_v43  ;;  %v4172_v7 = vadd.f32 %v4171_v9, %v4170_v57 }
0x2cfb   :  { %5642 = vrcp.f32 %v4151_v14  ;;  %v4174_v18 = vadd.f32 %v4173_v17, %v4172_v7 }
0x2d05   :  { %v5643_v39 = vpop.eup %5642 }
0x2d06   :  { %v4176_v20 = vmul.f32 %v5643_v39, %v4174_v18 }
0x2d08   :  { %5066 = vmatmul.mubr.msk.f32.vlgmr.msra.gmra.mrb[52].mxu0 %vm326_vm2, %v4176_v20 }
0x2d09   :  { %5087 = vmatprep.mubr.msk.f32.mxu0 %vm5823_vm0, %v5822_v2  ;;  %5316 = vmatpush3.bf16.msra.mxu0 %v5315_v21 }
0x2d0a   :  { %5317 = vmatprep.subr.bf16.mxu0 %v5821_v1 }
0x2d0d   :  { %5319 = vmatpush3.bf16.msra.mxu0 %v5318_v25 }
0x2dbe   :  { %v4327_v2 = vpop.f32.mrb[44].mxu1 }
0x2dbf   :  { %v5078_v26 = vpop.f32.mrb[45].mxu1 }
0x2ddb   :  { %v4254_v56 = vpop.f32.mrb[52].mxu0 }
0x2ddc   :  { %v4328_v48 = vadd.f32 %v4327_v2, %v4254_v56  ;;  %v5067_v28 = vpop.f32.mrb[53].mxu0 }
0x2dde   :  { %v4338_v19 = vadd.f32 %v4526_v15, %v4328_v48 }
0x2de0   :  { %v4339_v27 = vmax.f32 %v4338_v19, 0.0 }
0x2de2   :  { %5088 = vmatmul.mubr.msk.f32.vlgmr.msra.gmra.mrb[54].mxu0 %vm326_vm2, %v4339_v27 }
0x2eb5   :  { %v4420_v32 = vpop.f32.mrb[54].mxu0 }
0x2eb6   :  { %v4421_v34 = vadd.f32 %v4527_v29, %v4420_v32  ;;  %v5089_v23 = vpop.f32.mrb[55].mxu0 }
0x2eb8   :  { %v4529_v35 = vmul.f32 -1.442695, %v4421_v34 }
0x2eba   :  { %5644 = vpow2.f32 %v4529_v35 }
0x2ec4   :  { %v5645_v1 = vpop.eup %5644 }
0x2ec5   :  { %v4427_v36 = vadd.f32 1.0, %v5645_v1 }
0x2ec7   :  { %5646 = vrcp.f32 %v4427_v36 }
0x2ed1   :  { %v5647_v37 = vpop.eup %5646 }
0x2ed2   :  { %4431 = vst.msk [vmem:[%s6784_s13] sm:$0xff] %vm4430_vm3, %v5647_v37 }
0x2ed3   :  { %4436 = vsyncpa [#allocation8], 1 }
0x2ed4   :  { %4437 = vsyncpa [#allocation10], 1 }
0x2ed5   :  { %4438 = vsyncpa [#allocation13], 1 }
0x2ed6   :  { %4439 = vsyncpa [#allocation16], 1 }

</bundles_post_ra>
